<compile_context>
chip_gen: v5e
topology: v5e:2x2
jax: 0.10.0
libtpu: 0.0.40
codegen_flags: <defaults>
</compile_context>

<pallas_src>
import jax
import jax.numpy as jnp
from jax import lax
from jax.experimental import pallas as pl
from jax.experimental.pallas import tpu as pltpu


# ----------------------------- tiling heuristics -----------------------------
def _select_tiling(B, C, HWp, itemsize=4, max_block_b=32):
    """Pick batch block size + scoped-VMEM limit for the current TPU generation."""
    kind = ""
    try:
        kind = jax.devices()[0].device_kind.lower()
    except Exception:
        pass

    force_multi_step = False
    if "v5 lite" in kind or "v5e" in kind:
        budget, base_limit, cap = 3 << 20, 48 << 20, 100 << 20
    elif "v6" in kind:
        budget, base_limit, cap = 6 << 20, 64 << 20, 100 << 20
    elif "v7" in kind or "tpu7" in kind:
        # 64 MiB physical VMEM, 2 TensorCores -> keep >= 2 grid steps so the
        # "parallel" batch axis can shard across both cores.
        budget, base_limit, cap = 4 << 20, 40 << 20, 48 << 20
        force_multi_step = True
    else:
        budget, base_limit, cap = 2 << 20, None, 64 << 20

    per_sample = C * HWp * itemsize
    block_b = 1
    for d in range(1, B + 1):
        if B % d:
            continue
        if d > max_block_b:
            continue
        if d * per_sample > budget:
            continue
        if force_multi_step and B >= 2 and B // d < 2:
            continue
        block_b = d

    # x-in + out blocks are double buffered; y temp + plane/acc temps add more.
    needed = 6 * block_b * per_sample + (4 << 20)
    if base_limit is None:
        vmem_limit = None if needed <= (16 << 20) else min(cap, needed)
    else:
        vmem_limit = min(cap, max(base_limit, needed))
    return block_b, vmem_limit


def _conv_boundary_masks(H, W, HW, HWp):
    """(14, HWp) float masks: rows 0..6 = row validity for dy=-3..3,
    rows 7..13 = column validity for dx=-3..3 (computed on host, no in-kernel
    integer division)."""
    pos = jnp.arange(HWp)
    row = pos // W
    col = pos % W
    rmask = jnp.stack([((row + dy) >= 0) & ((row + dy) < H) for dy in range(-3, 4)])
    cmask = jnp.stack([((col + dx) >= 0) & ((col + dx) < W) for dx in range(-3, 4)])
    return jnp.concatenate([rmask, cmask], axis=0).astype(jnp.float32)


# --------------------------------- kernel ------------------------------------
def _make_cbam_kernel(H, W, HW, HWp, C, bt):
    inv_hw = 1.0 / float(HW)
    inv_c = 1.0 / float(C)
    padded = HWp != HW

    def kernel(scal_ref, mask_ref, x_ref, w1_ref, b1_ref, w2_ref, b2_ref, o_ref):
        x3 = x_ref[...].astype(jnp.float32)                    # (bt, C, HWp)

        # ---------------- channel attention (batched over the block) --------
        avg3 = jnp.sum(x3, axis=2, keepdims=True) * inv_hw     # (bt, C, 1)
        if padded:
            lane_valid = lax.broadcasted_iota(jnp.int32, (1, 1, HWp), 2) < HW
            mx_src = jnp.where(lane_valid, x3, -1e30)
        else:
            mx_src = x3
        mx3 = jnp.max(mx_src, axis=2, keepdims=True)           # (bt, C, 1)
        pooled3 = jnp.concatenate([avg3, mx3], axis=2)         # (bt, C, 2)

        w1 = w1_ref[...]
        b1 = b1_ref[...]
        w2 = w2_ref[...]
        b2 = b2_ref[...]
        mid = w1.shape[0]
        w1b = jnp.broadcast_to(w1[None], (bt, mid, C))
        w2b = jnp.broadcast_to(w2[None], (bt, C, mid))
        h3 = lax.dot_general(w1b, pooled3, (((2,), (1,)), ((0,), (0,))),
                             preferred_element_type=jnp.float32) + b1[None]
        h3 = jnp.maximum(h3, 0.0)                              # ReLU
        z3 = lax.dot_general(w2b, h3, (((2,), (1,)), ((0,), (0,))),
                             preferred_element_type=jnp.float32) + b2[None]
        ca3 = jax.nn.sigmoid(z3[:, :, 0:1] + z3[:, :, 1:2])    # (bt, C, 1)
        y3 = x3 * ca3                                          # channel-attended

        # ---------------- spatial attention ---------------------------------
        # Stack the channel-mean / channel-max planes of every sample on the
        # sublane axis: rows [0, bt) = avg planes, rows [bt, 2bt) = max planes.
        rows = ([jnp.sum(y3[i], axis=0, keepdims=True) * inv_c for i in range(bt)]
                + [jnp.max(y3[i], axis=0, keepdims=True) for i in range(bt)])
        planes = jnp.concatenate(rows, axis=0)                 # (2*bt, HWp)

        half_is_avg = lax.broadcasted_iota(jnp.int32, (2 * bt, 1), 0) < bt
        col_masks = [mask_ref[pl.ds(7 + k, 1), :] for k in range(7)]   # (1, HWp)
        bn_scale = scal_ref[98]
        bn_bias = scal_ref[99]

        # 7x7 conv (2 -> 1, pad=3, no bias): each (dy, dx) tap is one lane roll
        # of the full (2*bt, HWp) stack, one boundary mask multiply and one
        # weighted add (weight column selects avg/max tap weight per half).
        acc = jnp.zeros((2 * bt, HWp), jnp.float32)
        for idy in range(7):
            dy = idy - 3
            shr = (-dy * W) % HWp
            pd = planes if shr == 0 else pltpu.roll(planes, shr, axis=1)
            if dy != 0:
                pd = pd * mask_ref[pl.ds(idy, 1), :]
            for idx in range(7):
                dx = idx - 3
                shc = (-dx) % HWp
                p = pd if shc == 0 else pltpu.roll(pd, shc, axis=1)
                if dx != 0:
                    p = p * col_masks[idx]
                w_avg = scal_ref[idy * 7 + idx]
                w_max = scal_ref[49 + idy * 7 + idx]
                wcol = jnp.where(half_is_avg, w_avg, w_max)    # (2*bt, 1)
                acc = acc + wcol * p

        conv = acc[0:bt, :] + acc[bt:2 * bt, :]                # (bt, HWp)
        # TODO(synk): BatchNorm folded in eval mode (running stats), matching
        # the reference; training-mode batch statistics are not computed.
        zc = conv * bn_scale + bn_bias
        zs = zc * jax.nn.sigmoid(zc)                           # SiLU
        att = jax.nn.sigmoid(zs)                               # (bt, HWp)

        for i in range(bt):
            o_ref[i] = (y3[i] * att[i:i + 1, :]).astype(o_ref.dtype)

    return kernel


# -------------------------------- wrapper ------------------------------------
def cbam_forward(x, params, *, block_b=None, io_dtype=None):
    B, C, H, W = x.shape
    HW = H * W
    HWp = ((HW + 127) // 128) * 128            # lane-dense (128-aligned) spatial axis
    mid = params["w1"].shape[0]

    if block_b is None:
        block_b, vmem_limit = _select_tiling(B, C, HWp)
    else:
        assert B % block_b == 0, "block_b must divide batch"
        vmem_limit = min(100 << 20, max(48 << 20, 6 * block_b * C * HWp * 4 + (4 << 20)))

    if io_dtype is None:
        io_dtype = x.dtype                     # pass jnp.bfloat16 to halve HBM traffic

    # Flat scalar table for SMEM: 98 conv taps + folded BN scale & bias.
    scal = jnp.concatenate([
        params["conv_w"].reshape(-1).astype(jnp.float32),      # (1,2,7,7) -> (98,)
        params["bn_scale"].reshape(1).astype(jnp.float32),
        params["bn_bias"].reshape(1).astype(jnp.float32),
    ])                                                         # (100,)
    masks = _conv_boundary_masks(H, W, HW, HWp)                # (14, HWp)

    x_flat = x.reshape(B, C, HW)                               # metadata-only reshape
    if HWp != HW:
        x_flat = jnp.pad(x_flat, ((0, 0), (0, 0), (0, HWp - HW)))
    x_flat = x_flat.astype(io_dtype)

    kernel = _make_cbam_kernel(H, W, HW, HWp, C, block_b)
    cp_kwargs = dict(dimension_semantics=("parallel",))
    if vmem_limit is not None:
        cp_kwargs["vmem_limit_bytes"] = int(vmem_limit)

    out_flat = pl.pallas_call(
        kernel,
        out_shape=jax.ShapeDtypeStruct((B, C, HWp), io_dtype),
        grid=(B // block_b,),
        in_specs=[
            pl.BlockSpec(memory_space=pltpu.MemorySpace.SMEM),        # scalar table
            pl.BlockSpec((14, HWp), lambda b: (0, 0)),                # boundary masks
            pl.BlockSpec((block_b, C, HWp), lambda b: (b, 0, 0)),     # x
            pl.BlockSpec((mid, C), lambda b: (0, 0)),                 # w1
            pl.BlockSpec((mid, 1), lambda b: (0, 0)),                 # b1
            pl.BlockSpec((C, mid), lambda b: (0, 0)),                 # w2
            pl.BlockSpec((C, 1), lambda b: (0, 0)),                   # b2
        ],
        out_specs=pl.BlockSpec((block_b, C, HWp), lambda b: (b, 0, 0)),
        compiler_params=pltpu.CompilerParams(**cp_kwargs),
    )(scal, masks, x_flat, params["w1"], params["b1"], params["w2"], params["b2"])

    out = out_flat[..., :HW].reshape(B, C, H, W)
    return out.astype(x.dtype)


# -------------------------- Parameters / reference ---------------------------
def init_params(key, c1, reduction=16):
    mid = c1 // reduction
    ks = jax.random.split(key, 5)
    w1 = jax.random.normal(ks[0], (mid, c1), jnp.float32) * 0.1   # Linear(c1, mid)
    b1 = jax.random.normal(ks[1], (mid, 1), jnp.float32) * 0.1
    w2 = jax.random.normal(ks[2], (c1, mid), jnp.float32) * 0.1   # Linear(mid, c1)
    b2 = jax.random.normal(ks[3], (c1, 1), jnp.float32) * 0.1
    conv_w = jax.random.normal(ks[4], (1, 2, 7, 7), jnp.float32) * 0.1  # Conv2d(2,1,7)
    # BatchNorm2d(1) with default init (gamma=1, beta=0, mean=0, var=1), eps=1e-5
    gamma = jnp.ones((1,), jnp.float32)
    beta = jnp.zeros((1,), jnp.float32)
    run_mean = jnp.zeros((1,), jnp.float32)
    run_var = jnp.ones((1,), jnp.float32)
    eps = 1e-5
    bn_scale = gamma / jnp.sqrt(run_var + eps)
    bn_bias = beta - run_mean * bn_scale
    return dict(w1=w1, b1=b1, w2=w2, b2=b2, conv_w=conv_w,
                bn_scale=bn_scale, bn_bias=bn_bias)


def cbam_reference(x, params):
    # Pure-JAX reference mirroring the PyTorch forward.
    avg = jnp.mean(x, axis=(2, 3))                      # (B, C)
    mx = jnp.max(x, axis=(2, 3))                        # (B, C)

    def mlp(v):
        h = jax.nn.relu(v @ params["w1"].T + params["b1"][:, 0])
        return h @ params["w2"].T + params["b2"][:, 0]

    ca = jax.nn.sigmoid(mlp(avg) + mlp(mx))[:, :, None, None]
    out1 = ca * x

    s_avg = jnp.mean(out1, axis=1, keepdims=True)
    s_max = jnp.max(out1, axis=1, keepdims=True)
    cat = jnp.concatenate([s_avg, s_max], axis=1)       # (B, 2, H, W)
    conv = lax.conv_general_dilated(
        cat, params["conv_w"], window_strides=(1, 1),
        padding=((3, 3), (3, 3)),
        dimension_numbers=("NCHW", "OIHW", "NCHW"))
    z = conv * params["bn_scale"] + params["bn_bias"]
    z = z * jax.nn.sigmoid(z)                           # SiLU
    att = jax.nn.sigmoid(z)
    return att * out1


if __name__ == "__main__":
    key = jax.random.PRNGKey(0)
    kx, kp, kx2 = jax.random.split(key, 3)

    # Test 1: H*W already a multiple of 128.
    B, C, H, W = 2, 32, 16, 16                          # C >= reduction so mid >= 1
    x = jax.random.normal(kx, (B, C, H, W), jnp.float32)
    params = init_params(kp, C)

    out = jax.block_until_ready(jax.jit(cbam_forward)(x, params))
    ref = cbam_reference(x, params)
    assert out.shape == (B, C, H, W)
    if not bool(jnp.allclose(out, ref, rtol=1e-4, atol=5e-5)):
        raise AssertionError(
            f"test1 mismatch, max abs err={float(jnp.max(jnp.abs(out - ref)))}")

    # Test 2: H != W and H*W not a multiple of 128 (exercises lane padding + masks).
    B2, H2, W2 = 2, 9, 20
    x2 = jax.random.normal(kx2, (B2, C, H2, W2), jnp.float32)
    out2 = jax.block_until_ready(jax.jit(cbam_forward)(x2, params))
    ref2 = cbam_reference(x2, params)
    assert out2.shape == (B2, C, H2, W2)
    if not bool(jnp.allclose(out2, ref2, rtol=1e-4, atol=5e-5)):
        raise AssertionError(
            f"test2 mismatch, max abs err={float(jnp.max(jnp.abs(out2 - ref2)))}")

    print("KERNEL_OK")
</pallas_src>

<mosaic_0001>
module attributes {stable_mosaic.version = 11 : i64} {
  func.func @kernel(%arg0: i32, %arg1: memref<100xf32, #tpu.memory_space<smem>>, %arg2: memref<14x256xf32, #tpu.memory_space<vmem>>, %arg3: memref<2x32x256xf32, #tpu.memory_space<vmem>>, %arg4: memref<2x32xf32, #tpu.memory_space<vmem>>, %arg5: memref<2x1xf32, #tpu.memory_space<vmem>>, %arg6: memref<32x2xf32, #tpu.memory_space<vmem>>, %arg7: memref<32x1xf32, #tpu.memory_space<vmem>>, %arg8: memref<2x32x256xf32, #tpu.memory_space<vmem>>) attributes {dimension_semantics = [#tpu.dimension_semantics<parallel>], iteration_bounds = array<i64: 1>, scalar_prefetch = 0 : i64, scratch_operands = 0 : i64, tpu.core_type = #tpu.core_type<tc>, window_params = [{transform_indices = @transform_0, window_bounds = array<i64: 100>}, {pipeline_mode = #tpu.pipeline_mode<synchronous>, transform_indices = @transform_1, window_bounds = array<i64: 14, 256>}, {transform_indices = @transform_2, window_bounds = array<i64: 2, 32, 256>}, {pipeline_mode = #tpu.pipeline_mode<synchronous>, transform_indices = @transform_3, window_bounds = array<i64: 2, 32>}, {pipeline_mode = #tpu.pipeline_mode<synchronous>, transform_indices = @transform_4, window_bounds = array<i64: 2, 1>}, {pipeline_mode = #tpu.pipeline_mode<synchronous>, transform_indices = @transform_5, window_bounds = array<i64: 32, 2>}, {pipeline_mode = #tpu.pipeline_mode<synchronous>, transform_indices = @transform_6, window_bounds = array<i64: 32, 1>}, {transform_indices = @transform_7, window_bounds = array<i64: 2, 32, 256>}]} {
    %c0 = arith.constant 0 : index
    %c0_0 = arith.constant 0 : index
    %c0_1 = arith.constant 0 : index
    %0 = vector.load %arg3[%c0, %c0_0, %c0_1] : memref<2x32x256xf32, #tpu.memory_space<vmem>>, vector<2x32x256xf32>
    %cst = arith.constant dense<0.000000e+00> : vector<2x32xf32>
    %1 = vector.multi_reduction <add>, %0, %cst [2] : vector<2x32x256xf32> to vector<2x32xf32>
    %2 = vector.shape_cast %1 : vector<2x32xf32> to vector<2x32x1xf32>
    %cst_2 = arith.constant 3.906250e-03 : f32
    %3 = vector.broadcast %cst_2 : f32 to vector<2x32x1xf32>
    %4 = arith.mulf %2, %3 : vector<2x32x1xf32>
    %cst_3 = arith.constant dense<0xFF800000> : vector<2x32xf32>
    %5 = vector.multi_reduction <maximumf>, %0, %cst_3 [2] : vector<2x32x256xf32> to vector<2x32xf32>
    %6 = vector.shape_cast %5 : vector<2x32xf32> to vector<2x32x1xf32>
    %7 = tpu.concatenate %4, %6 in 2 : vector<2x32x1xf32>, vector<2x32x1xf32> -> vector<2x32x2xf32>
    %c0_4 = arith.constant 0 : index
    %c0_5 = arith.constant 0 : index
    %8 = vector.load %arg4[%c0_4, %c0_5] : memref<2x32xf32, #tpu.memory_space<vmem>>, vector<2x32xf32>
    %c0_6 = arith.constant 0 : index
    %c0_7 = arith.constant 0 : index
    %9 = vector.load %arg5[%c0_6, %c0_7] : memref<2x1xf32, #tpu.memory_space<vmem>>, vector<2x1xf32>
    %c0_8 = arith.constant 0 : index
    %c0_9 = arith.constant 0 : index
    %10 = vector.load %arg6[%c0_8, %c0_9] : memref<32x2xf32, #tpu.memory_space<vmem>>, vector<32x2xf32>
    %c0_10 = arith.constant 0 : index
    %c0_11 = arith.constant 0 : index
    %11 = vector.load %arg7[%c0_10, %c0_11] : memref<32x1xf32, #tpu.memory_space<vmem>>, vector<32x1xf32>
    %12 = vector.shape_cast %8 : vector<2x32xf32> to vector<1x2x32xf32>
    %13 = vector.shape_cast %12 : vector<1x2x32xf32> to vector<1x2x32xf32>
    %14 = vector.broadcast %13 : vector<1x2x32xf32> to vector<2x2x32xf32>
    %15 = vector.shape_cast %10 : vector<32x2xf32> to vector<1x32x2xf32>
    %16 = vector.shape_cast %15 : vector<1x32x2xf32> to vector<1x32x2xf32>
    %17 = vector.broadcast %16 : vector<1x32x2xf32> to vector<2x32x2xf32>
    %cst_12 = arith.constant dense<0.000000e+00> : vector<2x2x2xf32>
    %18 = tpu.matmul %14, %7, %cst_12 {dimension_numbers = #tpu.dot_dimension_numbers<[2], [1], [1], [2], [0, 0, 0, 1, 1, 2], [0], [0]>} : vector<2x2x32xf32>, vector<2x32x2xf32>, vector<2x2x2xf32> -> vector<2x2x2xf32>
    %19 = vector.shape_cast %9 : vector<2x1xf32> to vector<1x2x1xf32>
    %20 = vector.broadcast %19 : vector<1x2x1xf32> to vector<2x2x2xf32>
    %21 = arith.addf %18, %20 : vector<2x2x2xf32>
    %cst_13 = arith.constant 0.000000e+00 : f32
    %22 = vector.broadcast %cst_13 : f32 to vector<2x2x2xf32>
    %23 = arith.maximumf %21, %22 : vector<2x2x2xf32>
    %cst_14 = arith.constant dense<0.000000e+00> : vector<2x32x2xf32>
    %24 = tpu.matmul %17, %23, %cst_14 {dimension_numbers = #tpu.dot_dimension_numbers<[2], [1], [1], [2], [0, 0, 0, 1, 1, 2], [0], [0]>} : vector<2x32x2xf32>, vector<2x2x2xf32>, vector<2x32x2xf32> -> vector<2x32x2xf32>
    %25 = vector.shape_cast %11 : vector<32x1xf32> to vector<1x32x1xf32>
    %26 = vector.broadcast %25 : vector<1x32x1xf32> to vector<2x32x2xf32>
    %27 = arith.addf %24, %26 : vector<2x32x2xf32>
    %28 = vector.extract_strided_slice %27 {offsets = [0, 0, 0], sizes = [2, 32, 1], strides = [1, 1, 1]} : vector<2x32x2xf32> to vector<2x32x1xf32>
    %29 = vector.extract_strided_slice %27 {offsets = [0, 0, 1], sizes = [2, 32, 1], strides = [1, 1, 1]} : vector<2x32x2xf32> to vector<2x32x1xf32>
    %30 = arith.addf %28, %29 : vector<2x32x1xf32>
    %31 = arith.negf %30 : vector<2x32x1xf32>
    %32 = math.exp %31 : vector<2x32x1xf32>
    %cst_15 = arith.constant 1.000000e+00 : f32
    %33 = vector.broadcast %cst_15 : f32 to vector<2x32x1xf32>
    %34 = arith.addf %33, %32 : vector<2x32x1xf32>
    %35 = arith.divf %33, %34 : vector<2x32x1xf32>
    %36 = vector.broadcast %35 : vector<2x32x1xf32> to vector<2x32x256xf32>
    %37 = arith.mulf %0, %36 : vector<2x32x256xf32>
    %38 = vector.extract_strided_slice %37 {offsets = [0, 0, 0], sizes = [1, 32, 256], strides = [1, 1, 1]} : vector<2x32x256xf32> to vector<1x32x256xf32>
    %39 = vector.shape_cast %38 : vector<1x32x256xf32> to vector<32x256xf32>
    %cst_16 = arith.constant dense<0.000000e+00> : vector<256xf32>
    %40 = vector.multi_reduction <add>, %39, %cst_16 [0] : vector<32x256xf32> to vector<256xf32>
    %41 = vector.shape_cast %40 : vector<256xf32> to vector<1x256xf32>
    %cst_17 = arith.constant 3.125000e-02 : f32
    %42 = vector.broadcast %cst_17 : f32 to vector<1x256xf32>
    %43 = arith.mulf %41, %42 : vector<1x256xf32>
    %44 = vector.extract_strided_slice %37 {offsets = [1, 0, 0], sizes = [1, 32, 256], strides = [1, 1, 1]} : vector<2x32x256xf32> to vector<1x32x256xf32>
    %45 = vector.shape_cast %44 : vector<1x32x256xf32> to vector<32x256xf32>
    %cst_18 = arith.constant dense<0.000000e+00> : vector<256xf32>
    %46 = vector.multi_reduction <add>, %45, %cst_18 [0] : vector<32x256xf32> to vector<256xf32>
    %47 = vector.shape_cast %46 : vector<256xf32> to vector<1x256xf32>
    %cst_19 = arith.constant 3.125000e-02 : f32
    %48 = vector.broadcast %cst_19 : f32 to vector<1x256xf32>
    %49 = arith.mulf %47, %48 : vector<1x256xf32>
    %50 = vector.extract_strided_slice %37 {offsets = [0, 0, 0], sizes = [1, 32, 256], strides = [1, 1, 1]} : vector<2x32x256xf32> to vector<1x32x256xf32>
    %51 = vector.shape_cast %50 : vector<1x32x256xf32> to vector<32x256xf32>
    %cst_20 = arith.constant dense<0xFF800000> : vector<256xf32>
    %52 = vector.multi_reduction <maximumf>, %51, %cst_20 [0] : vector<32x256xf32> to vector<256xf32>
    %53 = vector.shape_cast %52 : vector<256xf32> to vector<1x256xf32>
    %54 = vector.extract_strided_slice %37 {offsets = [1, 0, 0], sizes = [1, 32, 256], strides = [1, 1, 1]} : vector<2x32x256xf32> to vector<1x32x256xf32>
    %55 = vector.shape_cast %54 : vector<1x32x256xf32> to vector<32x256xf32>
    %cst_21 = arith.constant dense<0xFF800000> : vector<256xf32>
    %56 = vector.multi_reduction <maximumf>, %55, %cst_21 [0] : vector<32x256xf32> to vector<256xf32>
    %57 = vector.shape_cast %56 : vector<256xf32> to vector<1x256xf32>
    %58 = tpu.concatenate %43, %49, %53, %57 in 0 : vector<1x256xf32>, vector<1x256xf32>, vector<1x256xf32>, vector<1x256xf32> -> vector<4x256xf32>
    %59 = tpu.iota {dimensions = array<i32: 0>} : vector<4x1xi32>
    %c2_i32 = arith.constant 2 : i32
    %60 = vector.broadcast %c2_i32 : i32 to vector<4x1xi32>
    %61 = arith.cmpi slt, %59, %60 : vector<4x1xi32>
    %c7 = arith.constant 7 : index
    %c0_22 = arith.constant 0 : index
    %62 = vector.load %arg2[%c7, %c0_22] : memref<14x256xf32, #tpu.memory_space<vmem>>, vector<1x256xf32>
    %c8 = arith.constant 8 : index
    %c0_23 = arith.constant 0 : index
    %63 = vector.load %arg2[%c8, %c0_23] : memref<14x256xf32, #tpu.memory_space<vmem>>, vector<1x256xf32>
    %c9 = arith.constant 9 : index
    %c0_24 = arith.constant 0 : index
    %64 = vector.load %arg2[%c9, %c0_24] : memref<14x256xf32, #tpu.memory_space<vmem>>, vector<1x256xf32>
    %c11 = arith.constant 11 : index
    %c0_25 = arith.constant 0 : index
    %65 = vector.load %arg2[%c11, %c0_25] : memref<14x256xf32, #tpu.memory_space<vmem>>, vector<1x256xf32>
    %c12 = arith.constant 12 : index
    %c0_26 = arith.constant 0 : index
    %66 = vector.load %arg2[%c12, %c0_26] : memref<14x256xf32, #tpu.memory_space<vmem>>, vector<1x256xf32>
    %c13 = arith.constant 13 : index
    %c0_27 = arith.constant 0 : index
    %67 = vector.load %arg2[%c13, %c0_27] : memref<14x256xf32, #tpu.memory_space<vmem>>, vector<1x256xf32>
    %c98 = arith.constant 98 : index
    %68 = memref.load %arg1[%c98] : memref<100xf32, #tpu.memory_space<smem>>
    %c99 = arith.constant 99 : index
    %69 = memref.load %arg1[%c99] : memref<100xf32, #tpu.memory_space<smem>>
    %cst_28 = arith.constant 0.000000e+00 : f32
    %70 = vector.broadcast %cst_28 : f32 to vector<4x256xf32>
    %c48_i32 = arith.constant 48 : i32
    %71 = tpu.dynamic_rotate %58 by %c48_i32 dim 1 : vector<4x256xf32>, i32 -> vector<4x256xf32>
    %c0_29 = arith.constant 0 : index
    %c0_30 = arith.constant 0 : index
    %72 = vector.load %arg2[%c0_29, %c0_30] : memref<14x256xf32, #tpu.memory_space<vmem>>, vector<1x256xf32>
    %73 = vector.broadcast %72 : vector<1x256xf32> to vector<4x256xf32>
    %74 = arith.mulf %71, %73 : vector<4x256xf32>
    %c3_i32 = arith.constant 3 : i32
    %75 = tpu.dynamic_rotate %74 by %c3_i32 dim 1 : vector<4x256xf32>, i32 -> vector<4x256xf32>
    %76 = vector.broadcast %62 : vector<1x256xf32> to vector<4x256xf32>
    %77 = arith.mulf %75, %76 : vector<4x256xf32>
    %c0_31 = arith.constant 0 : index
    %78 = memref.load %arg1[%c0_31] : memref<100xf32, #tpu.memory_space<smem>>
    %c49 = arith.constant 49 : index
    %79 = memref.load %arg1[%c49] : memref<100xf32, #tpu.memory_space<smem>>
    %80 = vector.broadcast %78 : f32 to vector<4x1xf32>
    %81 = vector.broadcast %79 : f32 to vector<4x1xf32>
    %82 = arith.select %61, %80, %81 : vector<4x1xi1>, vector<4x1xf32>
    %83 = vector.broadcast %82 : vector<4x1xf32> to vector<4x256xf32>
    %84 = arith.mulf %83, %77 : vector<4x256xf32>
    %85 = arith.addf %70, %84 : vector<4x256xf32>
    %c2_i32_32 = arith.constant 2 : i32
    %86 = tpu.dynamic_rotate %74 by %c2_i32_32 dim 1 : vector<4x256xf32>, i32 -> vector<4x256xf32>
    %87 = vector.broadcast %63 : vector<1x256xf32> to vector<4x256xf32>
    %88 = arith.mulf %86, %87 : vector<4x256xf32>
    %c1 = arith.constant 1 : index
    %89 = memref.load %arg1[%c1] : memref<100xf32, #tpu.memory_space<smem>>
    %c50 = arith.constant 50 : index
    %90 = memref.load %arg1[%c50] : memref<100xf32, #tpu.memory_space<smem>>
    %91 = vector.broadcast %89 : f32 to vector<4x1xf32>
    %92 = vector.broadcast %90 : f32 to vector<4x1xf32>
    %93 = arith.select %61, %91, %92 : vector<4x1xi1>, vector<4x1xf32>
    %94 = vector.broadcast %93 : vector<4x1xf32> to vector<4x256xf32>
    %95 = arith.mulf %94, %88 : vector<4x256xf32>
    %96 = arith.addf %85, %95 : vector<4x256xf32>
    %c1_i32 = arith.constant 1 : i32
    %97 = tpu.dynamic_rotate %74 by %c1_i32 dim 1 : vector<4x256xf32>, i32 -> vector<4x256xf32>
    %98 = vector.broadcast %64 : vector<1x256xf32> to vector<4x256xf32>
    %99 = arith.mulf %97, %98 : vector<4x256xf32>
    %c2 = arith.constant 2 : index
    %100 = memref.load %arg1[%c2] : memref<100xf32, #tpu.memory_space<smem>>
    %c51 = arith.constant 51 : index
    %101 = memref.load %arg1[%c51] : memref<100xf32, #tpu.memory_space<smem>>
    %102 = vector.broadcast %100 : f32 to vector<4x1xf32>
    %103 = vector.broadcast %101 : f32 to vector<4x1xf32>
    %104 = arith.select %61, %102, %103 : vector<4x1xi1>, vector<4x1xf32>
    %105 = vector.broadcast %104 : vector<4x1xf32> to vector<4x256xf32>
    %106 = arith.mulf %105, %99 : vector<4x256xf32>
    %107 = arith.addf %96, %106 : vector<4x256xf32>
    %c3 = arith.constant 3 : index
    %108 = memref.load %arg1[%c3] : memref<100xf32, #tpu.memory_space<smem>>
    %c52 = arith.constant 52 : index
    %109 = memref.load %arg1[%c52] : memref<100xf32, #tpu.memory_space<smem>>
    %110 = vector.broadcast %108 : f32 to vector<4x1xf32>
    %111 = vector.broadcast %109 : f32 to vector<4x1xf32>
    %112 = arith.select %61, %110, %111 : vector<4x1xi1>, vector<4x1xf32>
    %113 = vector.broadcast %112 : vector<4x1xf32> to vector<4x256xf32>
    %114 = arith.mulf %113, %74 : vector<4x256xf32>
    %115 = arith.addf %107, %114 : vector<4x256xf32>
    %c255_i32 = arith.constant 255 : i32
    %116 = tpu.dynamic_rotate %74 by %c255_i32 dim 1 : vector<4x256xf32>, i32 -> vector<4x256xf32>
    %117 = vector.broadcast %65 : vector<1x256xf32> to vector<4x256xf32>
    %118 = arith.mulf %116, %117 : vector<4x256xf32>
    %c4 = arith.constant 4 : index
    %119 = memref.load %arg1[%c4] : memref<100xf32, #tpu.memory_space<smem>>
    %c53 = arith.constant 53 : index
    %120 = memref.load %arg1[%c53] : memref<100xf32, #tpu.memory_space<smem>>
    %121 = vector.broadcast %119 : f32 to vector<4x1xf32>
    %122 = vector.broadcast %120 : f32 to vector<4x1xf32>
    %123 = arith.select %61, %121, %122 : vector<4x1xi1>, vector<4x1xf32>
    %124 = vector.broadcast %123 : vector<4x1xf32> to vector<4x256xf32>
    %125 = arith.mulf %124, %118 : vector<4x256xf32>
    %126 = arith.addf %115, %125 : vector<4x256xf32>
    %c254_i32 = arith.constant 254 : i32
    %127 = tpu.dynamic_rotate %74 by %c254_i32 dim 1 : vector<4x256xf32>, i32 -> vector<4x256xf32>
    %128 = vector.broadcast %66 : vector<1x256xf32> to vector<4x256xf32>
    %129 = arith.mulf %127, %128 : vector<4x256xf32>
    %c5 = arith.constant 5 : index
    %130 = memref.load %arg1[%c5] : memref<100xf32, #tpu.memory_space<smem>>
    %c54 = arith.constant 54 : index
    %131 = memref.load %arg1[%c54] : memref<100xf32, #tpu.memory_space<smem>>
    %132 = vector.broadcast %130 : f32 to vector<4x1xf32>
    %133 = vector.broadcast %131 : f32 to vector<4x1xf32>
    %134 = arith.select %61, %132, %133 : vector<4x1xi1>, vector<4x1xf32>
    %135 = vector.broadcast %134 : vector<4x1xf32> to vector<4x256xf32>
    %136 = arith.mulf %135, %129 : vector<4x256xf32>
    %137 = arith.addf %126, %136 : vector<4x256xf32>
    %c253_i32 = arith.constant 253 : i32
    %138 = tpu.dynamic_rotate %74 by %c253_i32 dim 1 : vector<4x256xf32>, i32 -> vector<4x256xf32>
    %139 = vector.broadcast %67 : vector<1x256xf32> to vector<4x256xf32>
    %140 = arith.mulf %138, %139 : vector<4x256xf32>
    %c6 = arith.constant 6 : index
    %141 = memref.load %arg1[%c6] : memref<100xf32, #tpu.memory_space<smem>>
    %c55 = arith.constant 55 : index
    %142 = memref.load %arg1[%c55] : memref<100xf32, #tpu.memory_space<smem>>
    %143 = vector.broadcast %141 : f32 to vector<4x1xf32>
    %144 = vector.broadcast %142 : f32 to vector<4x1xf32>
    %145 = arith.select %61, %143, %144 : vector<4x1xi1>, vector<4x1xf32>
    %146 = vector.broadcast %145 : vector<4x1xf32> to vector<4x256xf32>
    %147 = arith.mulf %146, %140 : vector<4x256xf32>
    %148 = arith.addf %137, %147 : vector<4x256xf32>
    %c32_i32 = arith.constant 32 : i32
    %149 = tpu.dynamic_rotate %58 by %c32_i32 dim 1 : vector<4x256xf32>, i32 -> vector<4x256xf32>
    %c1_33 = arith.constant 1 : index
    %c0_34 = arith.constant 0 : index
    %150 = vector.load %arg2[%c1_33, %c0_34] : memref<14x256xf32, #tpu.memory_space<vmem>>, vector<1x256xf32>
    %151 = vector.broadcast %150 : vector<1x256xf32> to vector<4x256xf32>
    %152 = arith.mulf %149, %151 : vector<4x256xf32>
    %c3_i32_35 = arith.constant 3 : i32
    %153 = tpu.dynamic_rotate %152 by %c3_i32_35 dim 1 : vector<4x256xf32>, i32 -> vector<4x256xf32>
    %154 = vector.broadcast %62 : vector<1x256xf32> to vector<4x256xf32>
    %155 = arith.mulf %153, %154 : vector<4x256xf32>
    %c7_36 = arith.constant 7 : index
    %156 = memref.load %arg1[%c7_36] : memref<100xf32, #tpu.memory_space<smem>>
    %c56 = arith.constant 56 : index
    %157 = memref.load %arg1[%c56] : memref<100xf32, #tpu.memory_space<smem>>
    %158 = vector.broadcast %156 : f32 to vector<4x1xf32>
    %159 = vector.broadcast %157 : f32 to vector<4x1xf32>
    %160 = arith.select %61, %158, %159 : vector<4x1xi1>, vector<4x1xf32>
    %161 = vector.broadcast %160 : vector<4x1xf32> to vector<4x256xf32>
    %162 = arith.mulf %161, %155 : vector<4x256xf32>
    %163 = arith.addf %148, %162 : vector<4x256xf32>
    %c2_i32_37 = arith.constant 2 : i32
    %164 = tpu.dynamic_rotate %152 by %c2_i32_37 dim 1 : vector<4x256xf32>, i32 -> vector<4x256xf32>
    %165 = vector.broadcast %63 : vector<1x256xf32> to vector<4x256xf32>
    %166 = arith.mulf %164, %165 : vector<4x256xf32>
    %c8_38 = arith.constant 8 : index
    %167 = memref.load %arg1[%c8_38] : memref<100xf32, #tpu.memory_space<smem>>
    %c57 = arith.constant 57 : index
    %168 = memref.load %arg1[%c57] : memref<100xf32, #tpu.memory_space<smem>>
    %169 = vector.broadcast %167 : f32 to vector<4x1xf32>
    %170 = vector.broadcast %168 : f32 to vector<4x1xf32>
    %171 = arith.select %61, %169, %170 : vector<4x1xi1>, vector<4x1xf32>
    %172 = vector.broadcast %171 : vector<4x1xf32> to vector<4x256xf32>
    %173 = arith.mulf %172, %166 : vector<4x256xf32>
    %174 = arith.addf %163, %173 : vector<4x256xf32>
    %c1_i32_39 = arith.constant 1 : i32
    %175 = tpu.dynamic_rotate %152 by %c1_i32_39 dim 1 : vector<4x256xf32>, i32 -> vector<4x256xf32>
    %176 = vector.broadcast %64 : vector<1x256xf32> to vector<4x256xf32>
    %177 = arith.mulf %175, %176 : vector<4x256xf32>
    %c9_40 = arith.constant 9 : index
    %178 = memref.load %arg1[%c9_40] : memref<100xf32, #tpu.memory_space<smem>>
    %c58 = arith.constant 58 : index
    %179 = memref.load %arg1[%c58] : memref<100xf32, #tpu.memory_space<smem>>
    %180 = vector.broadcast %178 : f32 to vector<4x1xf32>
    %181 = vector.broadcast %179 : f32 to vector<4x1xf32>
    %182 = arith.select %61, %180, %181 : vector<4x1xi1>, vector<4x1xf32>
    %183 = vector.broadcast %182 : vector<4x1xf32> to vector<4x256xf32>
    %184 = arith.mulf %183, %177 : vector<4x256xf32>
    %185 = arith.addf %174, %184 : vector<4x256xf32>
    %c10 = arith.constant 10 : index
    %186 = memref.load %arg1[%c10] : memref<100xf32, #tpu.memory_space<smem>>
    %c59 = arith.constant 59 : index
    %187 = memref.load %arg1[%c59] : memref<100xf32, #tpu.memory_space<smem>>
    %188 = vector.broadcast %186 : f32 to vector<4x1xf32>
    %189 = vector.broadcast %187 : f32 to vector<4x1xf32>
    %190 = arith.select %61, %188, %189 : vector<4x1xi1>, vector<4x1xf32>
    %191 = vector.broadcast %190 : vector<4x1xf32> to vector<4x256xf32>
    %192 = arith.mulf %191, %152 : vector<4x256xf32>
    %193 = arith.addf %185, %192 : vector<4x256xf32>
    %c255_i32_41 = arith.constant 255 : i32
    %194 = tpu.dynamic_rotate %152 by %c255_i32_41 dim 1 : vector<4x256xf32>, i32 -> vector<4x256xf32>
    %195 = vector.broadcast %65 : vector<1x256xf32> to vector<4x256xf32>
    %196 = arith.mulf %194, %195 : vector<4x256xf32>
    %c11_42 = arith.constant 11 : index
    %197 = memref.load %arg1[%c11_42] : memref<100xf32, #tpu.memory_space<smem>>
    %c60 = arith.constant 60 : index
    %198 = memref.load %arg1[%c60] : memref<100xf32, #tpu.memory_space<smem>>
    %199 = vector.broadcast %197 : f32 to vector<4x1xf32>
    %200 = vector.broadcast %198 : f32 to vector<4x1xf32>
    %201 = arith.select %61, %199, %200 : vector<4x1xi1>, vector<4x1xf32>
    %202 = vector.broadcast %201 : vector<4x1xf32> to vector<4x256xf32>
    %203 = arith.mulf %202, %196 : vector<4x256xf32>
    %204 = arith.addf %193, %203 : vector<4x256xf32>
    %c254_i32_43 = arith.constant 254 : i32
    %205 = tpu.dynamic_rotate %152 by %c254_i32_43 dim 1 : vector<4x256xf32>, i32 -> vector<4x256xf32>
    %206 = vector.broadcast %66 : vector<1x256xf32> to vector<4x256xf32>
    %207 = arith.mulf %205, %206 : vector<4x256xf32>
    %c12_44 = arith.constant 12 : index
    %208 = memref.load %arg1[%c12_44] : memref<100xf32, #tpu.memory_space<smem>>
    %c61 = arith.constant 61 : index
    %209 = memref.load %arg1[%c61] : memref<100xf32, #tpu.memory_space<smem>>
    %210 = vector.broadcast %208 : f32 to vector<4x1xf32>
    %211 = vector.broadcast %209 : f32 to vector<4x1xf32>
    %212 = arith.select %61, %210, %211 : vector<4x1xi1>, vector<4x1xf32>
    %213 = vector.broadcast %212 : vector<4x1xf32> to vector<4x256xf32>
    %214 = arith.mulf %213, %207 : vector<4x256xf32>
    %215 = arith.addf %204, %214 : vector<4x256xf32>
    %c253_i32_45 = arith.constant 253 : i32
    %216 = tpu.dynamic_rotate %152 by %c253_i32_45 dim 1 : vector<4x256xf32>, i32 -> vector<4x256xf32>
    %217 = vector.broadcast %67 : vector<1x256xf32> to vector<4x256xf32>
    %218 = arith.mulf %216, %217 : vector<4x256xf32>
    %c13_46 = arith.constant 13 : index
    %219 = memref.load %arg1[%c13_46] : memref<100xf32, #tpu.memory_space<smem>>
    %c62 = arith.constant 62 : index
    %220 = memref.load %arg1[%c62] : memref<100xf32, #tpu.memory_space<smem>>
    %221 = vector.broadcast %219 : f32 to vector<4x1xf32>
    %222 = vector.broadcast %220 : f32 to vector<4x1xf32>
    %223 = arith.select %61, %221, %222 : vector<4x1xi1>, vector<4x1xf32>
    %224 = vector.broadcast %223 : vector<4x1xf32> to vector<4x256xf32>
    %225 = arith.mulf %224, %218 : vector<4x256xf32>
    %226 = arith.addf %215, %225 : vector<4x256xf32>
    %c16_i32 = arith.constant 16 : i32
    %227 = tpu.dynamic_rotate %58 by %c16_i32 dim 1 : vector<4x256xf32>, i32 -> vector<4x256xf32>
    %c2_47 = arith.constant 2 : index
    %c0_48 = arith.constant 0 : index
    %228 = vector.load %arg2[%c2_47, %c0_48] : memref<14x256xf32, #tpu.memory_space<vmem>>, vector<1x256xf32>
    %229 = vector.broadcast %228 : vector<1x256xf32> to vector<4x256xf32>
    %230 = arith.mulf %227, %229 : vector<4x256xf32>
    %c3_i32_49 = arith.constant 3 : i32
    %231 = tpu.dynamic_rotate %230 by %c3_i32_49 dim 1 : vector<4x256xf32>, i32 -> vector<4x256xf32>
    %232 = vector.broadcast %62 : vector<1x256xf32> to vector<4x256xf32>
    %233 = arith.mulf %231, %232 : vector<4x256xf32>
    %c14 = arith.constant 14 : index
    %234 = memref.load %arg1[%c14] : memref<100xf32, #tpu.memory_space<smem>>
    %c63 = arith.constant 63 : index
    %235 = memref.load %arg1[%c63] : memref<100xf32, #tpu.memory_space<smem>>
    %236 = vector.broadcast %234 : f32 to vector<4x1xf32>
    %237 = vector.broadcast %235 : f32 to vector<4x1xf32>
    %238 = arith.select %61, %236, %237 : vector<4x1xi1>, vector<4x1xf32>
    %239 = vector.broadcast %238 : vector<4x1xf32> to vector<4x256xf32>
    %240 = arith.mulf %239, %233 : vector<4x256xf32>
    %241 = arith.addf %226, %240 : vector<4x256xf32>
    %c2_i32_50 = arith.constant 2 : i32
    %242 = tpu.dynamic_rotate %230 by %c2_i32_50 dim 1 : vector<4x256xf32>, i32 -> vector<4x256xf32>
    %243 = vector.broadcast %63 : vector<1x256xf32> to vector<4x256xf32>
    %244 = arith.mulf %242, %243 : vector<4x256xf32>
    %c15 = arith.constant 15 : index
    %245 = memref.load %arg1[%c15] : memref<100xf32, #tpu.memory_space<smem>>
    %c64 = arith.constant 64 : index
    %246 = memref.load %arg1[%c64] : memref<100xf32, #tpu.memory_space<smem>>
    %247 = vector.broadcast %245 : f32 to vector<4x1xf32>
    %248 = vector.broadcast %246 : f32 to vector<4x1xf32>
    %249 = arith.select %61, %247, %248 : vector<4x1xi1>, vector<4x1xf32>
    %250 = vector.broadcast %249 : vector<4x1xf32> to vector<4x256xf32>
    %251 = arith.mulf %250, %244 : vector<4x256xf32>
    %252 = arith.addf %241, %251 : vector<4x256xf32>
    %c1_i32_51 = arith.constant 1 : i32
    %253 = tpu.dynamic_rotate %230 by %c1_i32_51 dim 1 : vector<4x256xf32>, i32 -> vector<4x256xf32>
    %254 = vector.broadcast %64 : vector<1x256xf32> to vector<4x256xf32>
    %255 = arith.mulf %253, %254 : vector<4x256xf32>
    %c16 = arith.constant 16 : index
    %256 = memref.load %arg1[%c16] : memref<100xf32, #tpu.memory_space<smem>>
    %c65 = arith.constant 65 : index
    %257 = memref.load %arg1[%c65] : memref<100xf32, #tpu.memory_space<smem>>
    %258 = vector.broadcast %256 : f32 to vector<4x1xf32>
    %259 = vector.broadcast %257 : f32 to vector<4x1xf32>
    %260 = arith.select %61, %258, %259 : vector<4x1xi1>, vector<4x1xf32>
    %261 = vector.broadcast %260 : vector<4x1xf32> to vector<4x256xf32>
    %262 = arith.mulf %261, %255 : vector<4x256xf32>
    %263 = arith.addf %252, %262 : vector<4x256xf32>
    %c17 = arith.constant 17 : index
    %264 = memref.load %arg1[%c17] : memref<100xf32, #tpu.memory_space<smem>>
    %c66 = arith.constant 66 : index
    %265 = memref.load %arg1[%c66] : memref<100xf32, #tpu.memory_space<smem>>
    %266 = vector.broadcast %264 : f32 to vector<4x1xf32>
    %267 = vector.broadcast %265 : f32 to vector<4x1xf32>
    %268 = arith.select %61, %266, %267 : vector<4x1xi1>, vector<4x1xf32>
    %269 = vector.broadcast %268 : vector<4x1xf32> to vector<4x256xf32>
    %270 = arith.mulf %269, %230 : vector<4x256xf32>
    %271 = arith.addf %263, %270 : vector<4x256xf32>
    %c255_i32_52 = arith.constant 255 : i32
    %272 = tpu.dynamic_rotate %230 by %c255_i32_52 dim 1 : vector<4x256xf32>, i32 -> vector<4x256xf32>
    %273 = vector.broadcast %65 : vector<1x256xf32> to vector<4x256xf32>
    %274 = arith.mulf %272, %273 : vector<4x256xf32>
    %c18 = arith.constant 18 : index
    %275 = memref.load %arg1[%c18] : memref<100xf32, #tpu.memory_space<smem>>
    %c67 = arith.constant 67 : index
    %276 = memref.load %arg1[%c67] : memref<100xf32, #tpu.memory_space<smem>>
    %277 = vector.broadcast %275 : f32 to vector<4x1xf32>
    %278 = vector.broadcast %276 : f32 to vector<4x1xf32>
    %279 = arith.select %61, %277, %278 : vector<4x1xi1>, vector<4x1xf32>
    %280 = vector.broadcast %279 : vector<4x1xf32> to vector<4x256xf32>
    %281 = arith.mulf %280, %274 : vector<4x256xf32>
    %282 = arith.addf %271, %281 : vector<4x256xf32>
    %c254_i32_53 = arith.constant 254 : i32
    %283 = tpu.dynamic_rotate %230 by %c254_i32_53 dim 1 : vector<4x256xf32>, i32 -> vector<4x256xf32>
    %284 = vector.broadcast %66 : vector<1x256xf32> to vector<4x256xf32>
    %285 = arith.mulf %283, %284 : vector<4x256xf32>
    %c19 = arith.constant 19 : index
    %286 = memref.load %arg1[%c19] : memref<100xf32, #tpu.memory_space<smem>>
    %c68 = arith.constant 68 : index
    %287 = memref.load %arg1[%c68] : memref<100xf32, #tpu.memory_space<smem>>
    %288 = vector.broadcast %286 : f32 to vector<4x1xf32>
    %289 = vector.broadcast %287 : f32 to vector<4x1xf32>
    %290 = arith.select %61, %288, %289 : vector<4x1xi1>, vector<4x1xf32>
    %291 = vector.broadcast %290 : vector<4x1xf32> to vector<4x256xf32>
    %292 = arith.mulf %291, %285 : vector<4x256xf32>
    %293 = arith.addf %282, %292 : vector<4x256xf32>
    %c253_i32_54 = arith.constant 253 : i32
    %294 = tpu.dynamic_rotate %230 by %c253_i32_54 dim 1 : vector<4x256xf32>, i32 -> vector<4x256xf32>
    %295 = vector.broadcast %67 : vector<1x256xf32> to vector<4x256xf32>
    %296 = arith.mulf %294, %295 : vector<4x256xf32>
    %c20 = arith.constant 20 : index
    %297 = memref.load %arg1[%c20] : memref<100xf32, #tpu.memory_space<smem>>
    %c69 = arith.constant 69 : index
    %298 = memref.load %arg1[%c69] : memref<100xf32, #tpu.memory_space<smem>>
    %299 = vector.broadcast %297 : f32 to vector<4x1xf32>
    %300 = vector.broadcast %298 : f32 to vector<4x1xf32>
    %301 = arith.select %61, %299, %300 : vector<4x1xi1>, vector<4x1xf32>
    %302 = vector.broadcast %301 : vector<4x1xf32> to vector<4x256xf32>
    %303 = arith.mulf %302, %296 : vector<4x256xf32>
    %304 = arith.addf %293, %303 : vector<4x256xf32>
    %c3_i32_55 = arith.constant 3 : i32
    %305 = tpu.dynamic_rotate %58 by %c3_i32_55 dim 1 : vector<4x256xf32>, i32 -> vector<4x256xf32>
    %306 = vector.broadcast %62 : vector<1x256xf32> to vector<4x256xf32>
    %307 = arith.mulf %305, %306 : vector<4x256xf32>
    %c21 = arith.constant 21 : index
    %308 = memref.load %arg1[%c21] : memref<100xf32, #tpu.memory_space<smem>>
    %c70 = arith.constant 70 : index
    %309 = memref.load %arg1[%c70] : memref<100xf32, #tpu.memory_space<smem>>
    %310 = vector.broadcast %308 : f32 to vector<4x1xf32>
    %311 = vector.broadcast %309 : f32 to vector<4x1xf32>
    %312 = arith.select %61, %310, %311 : vector<4x1xi1>, vector<4x1xf32>
    %313 = vector.broadcast %312 : vector<4x1xf32> to vector<4x256xf32>
    %314 = arith.mulf %313, %307 : vector<4x256xf32>
    %315 = arith.addf %304, %314 : vector<4x256xf32>
    %c2_i32_56 = arith.constant 2 : i32
    %316 = tpu.dynamic_rotate %58 by %c2_i32_56 dim 1 : vector<4x256xf32>, i32 -> vector<4x256xf32>
    %317 = vector.broadcast %63 : vector<1x256xf32> to vector<4x256xf32>
    %318 = arith.mulf %316, %317 : vector<4x256xf32>
    %c22 = arith.constant 22 : index
    %319 = memref.load %arg1[%c22] : memref<100xf32, #tpu.memory_space<smem>>
    %c71 = arith.constant 71 : index
    %320 = memref.load %arg1[%c71] : memref<100xf32, #tpu.memory_space<smem>>
    %321 = vector.broadcast %319 : f32 to vector<4x1xf32>
    %322 = vector.broadcast %320 : f32 to vector<4x1xf32>
    %323 = arith.select %61, %321, %322 : vector<4x1xi1>, vector<4x1xf32>
    %324 = vector.broadcast %323 : vector<4x1xf32> to vector<4x256xf32>
    %325 = arith.mulf %324, %318 : vector<4x256xf32>
    %326 = arith.addf %315, %325 : vector<4x256xf32>
    %c1_i32_57 = arith.constant 1 : i32
    %327 = tpu.dynamic_rotate %58 by %c1_i32_57 dim 1 : vector<4x256xf32>, i32 -> vector<4x256xf32>
    %328 = vector.broadcast %64 : vector<1x256xf32> to vector<4x256xf32>
    %329 = arith.mulf %327, %328 : vector<4x256xf32>
    %c23 = arith.constant 23 : index
    %330 = memref.load %arg1[%c23] : memref<100xf32, #tpu.memory_space<smem>>
    %c72 = arith.constant 72 : index
    %331 = memref.load %arg1[%c72] : memref<100xf32, #tpu.memory_space<smem>>
    %332 = vector.broadcast %330 : f32 to vector<4x1xf32>
    %333 = vector.broadcast %331 : f32 to vector<4x1xf32>
    %334 = arith.select %61, %332, %333 : vector<4x1xi1>, vector<4x1xf32>
    %335 = vector.broadcast %334 : vector<4x1xf32> to vector<4x256xf32>
    %336 = arith.mulf %335, %329 : vector<4x256xf32>
    %337 = arith.addf %326, %336 : vector<4x256xf32>
    %c24 = arith.constant 24 : index
    %338 = memref.load %arg1[%c24] : memref<100xf32, #tpu.memory_space<smem>>
    %c73 = arith.constant 73 : index
    %339 = memref.load %arg1[%c73] : memref<100xf32, #tpu.memory_space<smem>>
    %340 = vector.broadcast %338 : f32 to vector<4x1xf32>
    %341 = vector.broadcast %339 : f32 to vector<4x1xf32>
    %342 = arith.select %61, %340, %341 : vector<4x1xi1>, vector<4x1xf32>
    %343 = vector.broadcast %342 : vector<4x1xf32> to vector<4x256xf32>
    %344 = arith.mulf %343, %58 : vector<4x256xf32>
    %345 = arith.addf %337, %344 : vector<4x256xf32>
    %c255_i32_58 = arith.constant 255 : i32
    %346 = tpu.dynamic_rotate %58 by %c255_i32_58 dim 1 : vector<4x256xf32>, i32 -> vector<4x256xf32>
    %347 = vector.broadcast %65 : vector<1x256xf32> to vector<4x256xf32>
    %348 = arith.mulf %346, %347 : vector<4x256xf32>
    %c25 = arith.constant 25 : index
    %349 = memref.load %arg1[%c25] : memref<100xf32, #tpu.memory_space<smem>>
    %c74 = arith.constant 74 : index
    %350 = memref.load %arg1[%c74] : memref<100xf32, #tpu.memory_space<smem>>
    %351 = vector.broadcast %349 : f32 to vector<4x1xf32>
    %352 = vector.broadcast %350 : f32 to vector<4x1xf32>
    %353 = arith.select %61, %351, %352 : vector<4x1xi1>, vector<4x1xf32>
    %354 = vector.broadcast %353 : vector<4x1xf32> to vector<4x256xf32>
    %355 = arith.mulf %354, %348 : vector<4x256xf32>
    %356 = arith.addf %345, %355 : vector<4x256xf32>
    %c254_i32_59 = arith.constant 254 : i32
    %357 = tpu.dynamic_rotate %58 by %c254_i32_59 dim 1 : vector<4x256xf32>, i32 -> vector<4x256xf32>
    %358 = vector.broadcast %66 : vector<1x256xf32> to vector<4x256xf32>
    %359 = arith.mulf %357, %358 : vector<4x256xf32>
    %c26 = arith.constant 26 : index
    %360 = memref.load %arg1[%c26] : memref<100xf32, #tpu.memory_space<smem>>
    %c75 = arith.constant 75 : index
    %361 = memref.load %arg1[%c75] : memref<100xf32, #tpu.memory_space<smem>>
    %362 = vector.broadcast %360 : f32 to vector<4x1xf32>
    %363 = vector.broadcast %361 : f32 to vector<4x1xf32>
    %364 = arith.select %61, %362, %363 : vector<4x1xi1>, vector<4x1xf32>
    %365 = vector.broadcast %364 : vector<4x1xf32> to vector<4x256xf32>
    %366 = arith.mulf %365, %359 : vector<4x256xf32>
    %367 = arith.addf %356, %366 : vector<4x256xf32>
    %c253_i32_60 = arith.constant 253 : i32
    %368 = tpu.dynamic_rotate %58 by %c253_i32_60 dim 1 : vector<4x256xf32>, i32 -> vector<4x256xf32>
    %369 = vector.broadcast %67 : vector<1x256xf32> to vector<4x256xf32>
    %370 = arith.mulf %368, %369 : vector<4x256xf32>
    %c27 = arith.constant 27 : index
    %371 = memref.load %arg1[%c27] : memref<100xf32, #tpu.memory_space<smem>>
    %c76 = arith.constant 76 : index
    %372 = memref.load %arg1[%c76] : memref<100xf32, #tpu.memory_space<smem>>
    %373 = vector.broadcast %371 : f32 to vector<4x1xf32>
    %374 = vector.broadcast %372 : f32 to vector<4x1xf32>
    %375 = arith.select %61, %373, %374 : vector<4x1xi1>, vector<4x1xf32>
    %376 = vector.broadcast %375 : vector<4x1xf32> to vector<4x256xf32>
    %377 = arith.mulf %376, %370 : vector<4x256xf32>
    %378 = arith.addf %367, %377 : vector<4x256xf32>
    %c240_i32 = arith.constant 240 : i32
    %379 = tpu.dynamic_rotate %58 by %c240_i32 dim 1 : vector<4x256xf32>, i32 -> vector<4x256xf32>
    %c4_61 = arith.constant 4 : index
    %c0_62 = arith.constant 0 : index
    %380 = vector.load %arg2[%c4_61, %c0_62] : memref<14x256xf32, #tpu.memory_space<vmem>>, vector<1x256xf32>
    %381 = vector.broadcast %380 : vector<1x256xf32> to vector<4x256xf32>
    %382 = arith.mulf %379, %381 : vector<4x256xf32>
    %c3_i32_63 = arith.constant 3 : i32
    %383 = tpu.dynamic_rotate %382 by %c3_i32_63 dim 1 : vector<4x256xf32>, i32 -> vector<4x256xf32>
    %384 = vector.broadcast %62 : vector<1x256xf32> to vector<4x256xf32>
    %385 = arith.mulf %383, %384 : vector<4x256xf32>
    %c28 = arith.constant 28 : index
    %386 = memref.load %arg1[%c28] : memref<100xf32, #tpu.memory_space<smem>>
    %c77 = arith.constant 77 : index
    %387 = memref.load %arg1[%c77] : memref<100xf32, #tpu.memory_space<smem>>
    %388 = vector.broadcast %386 : f32 to vector<4x1xf32>
    %389 = vector.broadcast %387 : f32 to vector<4x1xf32>
    %390 = arith.select %61, %388, %389 : vector<4x1xi1>, vector<4x1xf32>
    %391 = vector.broadcast %390 : vector<4x1xf32> to vector<4x256xf32>
    %392 = arith.mulf %391, %385 : vector<4x256xf32>
    %393 = arith.addf %378, %392 : vector<4x256xf32>
    %c2_i32_64 = arith.constant 2 : i32
    %394 = tpu.dynamic_rotate %382 by %c2_i32_64 dim 1 : vector<4x256xf32>, i32 -> vector<4x256xf32>
    %395 = vector.broadcast %63 : vector<1x256xf32> to vector<4x256xf32>
    %396 = arith.mulf %394, %395 : vector<4x256xf32>
    %c29 = arith.constant 29 : index
    %397 = memref.load %arg1[%c29] : memref<100xf32, #tpu.memory_space<smem>>
    %c78 = arith.constant 78 : index
    %398 = memref.load %arg1[%c78] : memref<100xf32, #tpu.memory_space<smem>>
    %399 = vector.broadcast %397 : f32 to vector<4x1xf32>
    %400 = vector.broadcast %398 : f32 to vector<4x1xf32>
    %401 = arith.select %61, %399, %400 : vector<4x1xi1>, vector<4x1xf32>
    %402 = vector.broadcast %401 : vector<4x1xf32> to vector<4x256xf32>
    %403 = arith.mulf %402, %396 : vector<4x256xf32>
    %404 = arith.addf %393, %403 : vector<4x256xf32>
    %c1_i32_65 = arith.constant 1 : i32
    %405 = tpu.dynamic_rotate %382 by %c1_i32_65 dim 1 : vector<4x256xf32>, i32 -> vector<4x256xf32>
    %406 = vector.broadcast %64 : vector<1x256xf32> to vector<4x256xf32>
    %407 = arith.mulf %405, %406 : vector<4x256xf32>
    %c30 = arith.constant 30 : index
    %408 = memref.load %arg1[%c30] : memref<100xf32, #tpu.memory_space<smem>>
    %c79 = arith.constant 79 : index
    %409 = memref.load %arg1[%c79] : memref<100xf32, #tpu.memory_space<smem>>
    %410 = vector.broadcast %408 : f32 to vector<4x1xf32>
    %411 = vector.broadcast %409 : f32 to vector<4x1xf32>
    %412 = arith.select %61, %410, %411 : vector<4x1xi1>, vector<4x1xf32>
    %413 = vector.broadcast %412 : vector<4x1xf32> to vector<4x256xf32>
    %414 = arith.mulf %413, %407 : vector<4x256xf32>
    %415 = arith.addf %404, %414 : vector<4x256xf32>
    %c31 = arith.constant 31 : index
    %416 = memref.load %arg1[%c31] : memref<100xf32, #tpu.memory_space<smem>>
    %c80 = arith.constant 80 : index
    %417 = memref.load %arg1[%c80] : memref<100xf32, #tpu.memory_space<smem>>
    %418 = vector.broadcast %416 : f32 to vector<4x1xf32>
    %419 = vector.broadcast %417 : f32 to vector<4x1xf32>
    %420 = arith.select %61, %418, %419 : vector<4x1xi1>, vector<4x1xf32>
    %421 = vector.broadcast %420 : vector<4x1xf32> to vector<4x256xf32>
    %422 = arith.mulf %421, %382 : vector<4x256xf32>
    %423 = arith.addf %415, %422 : vector<4x256xf32>
    %c255_i32_66 = arith.constant 255 : i32
    %424 = tpu.dynamic_rotate %382 by %c255_i32_66 dim 1 : vector<4x256xf32>, i32 -> vector<4x256xf32>
    %425 = vector.broadcast %65 : vector<1x256xf32> to vector<4x256xf32>
    %426 = arith.mulf %424, %425 : vector<4x256xf32>
    %c32 = arith.constant 32 : index
    %427 = memref.load %arg1[%c32] : memref<100xf32, #tpu.memory_space<smem>>
    %c81 = arith.constant 81 : index
    %428 = memref.load %arg1[%c81] : memref<100xf32, #tpu.memory_space<smem>>
    %429 = vector.broadcast %427 : f32 to vector<4x1xf32>
    %430 = vector.broadcast %428 : f32 to vector<4x1xf32>
    %431 = arith.select %61, %429, %430 : vector<4x1xi1>, vector<4x1xf32>
    %432 = vector.broadcast %431 : vector<4x1xf32> to vector<4x256xf32>
    %433 = arith.mulf %432, %426 : vector<4x256xf32>
    %434 = arith.addf %423, %433 : vector<4x256xf32>
    %c254_i32_67 = arith.constant 254 : i32
    %435 = tpu.dynamic_rotate %382 by %c254_i32_67 dim 1 : vector<4x256xf32>, i32 -> vector<4x256xf32>
    %436 = vector.broadcast %66 : vector<1x256xf32> to vector<4x256xf32>
    %437 = arith.mulf %435, %436 : vector<4x256xf32>
    %c33 = arith.constant 33 : index
    %438 = memref.load %arg1[%c33] : memref<100xf32, #tpu.memory_space<smem>>
    %c82 = arith.constant 82 : index
    %439 = memref.load %arg1[%c82] : memref<100xf32, #tpu.memory_space<smem>>
    %440 = vector.broadcast %438 : f32 to vector<4x1xf32>
    %441 = vector.broadcast %439 : f32 to vector<4x1xf32>
    %442 = arith.select %61, %440, %441 : vector<4x1xi1>, vector<4x1xf32>
    %443 = vector.broadcast %442 : vector<4x1xf32> to vector<4x256xf32>
    %444 = arith.mulf %443, %437 : vector<4x256xf32>
    %445 = arith.addf %434, %444 : vector<4x256xf32>
    %c253_i32_68 = arith.constant 253 : i32
    %446 = tpu.dynamic_rotate %382 by %c253_i32_68 dim 1 : vector<4x256xf32>, i32 -> vector<4x256xf32>
    %447 = vector.broadcast %67 : vector<1x256xf32> to vector<4x256xf32>
    %448 = arith.mulf %446, %447 : vector<4x256xf32>
    %c34 = arith.constant 34 : index
    %449 = memref.load %arg1[%c34] : memref<100xf32, #tpu.memory_space<smem>>
    %c83 = arith.constant 83 : index
    %450 = memref.load %arg1[%c83] : memref<100xf32, #tpu.memory_space<smem>>
    %451 = vector.broadcast %449 : f32 to vector<4x1xf32>
    %452 = vector.broadcast %450 : f32 to vector<4x1xf32>
    %453 = arith.select %61, %451, %452 : vector<4x1xi1>, vector<4x1xf32>
    %454 = vector.broadcast %453 : vector<4x1xf32> to vector<4x256xf32>
    %455 = arith.mulf %454, %448 : vector<4x256xf32>
    %456 = arith.addf %445, %455 : vector<4x256xf32>
    %c224_i32 = arith.constant 224 : i32
    %457 = tpu.dynamic_rotate %58 by %c224_i32 dim 1 : vector<4x256xf32>, i32 -> vector<4x256xf32>
    %c5_69 = arith.constant 5 : index
    %c0_70 = arith.constant 0 : index
    %458 = vector.load %arg2[%c5_69, %c0_70] : memref<14x256xf32, #tpu.memory_space<vmem>>, vector<1x256xf32>
    %459 = vector.broadcast %458 : vector<1x256xf32> to vector<4x256xf32>
    %460 = arith.mulf %457, %459 : vector<4x256xf32>
    %c3_i32_71 = arith.constant 3 : i32
    %461 = tpu.dynamic_rotate %460 by %c3_i32_71 dim 1 : vector<4x256xf32>, i32 -> vector<4x256xf32>
    %462 = vector.broadcast %62 : vector<1x256xf32> to vector<4x256xf32>
    %463 = arith.mulf %461, %462 : vector<4x256xf32>
    %c35 = arith.constant 35 : index
    %464 = memref.load %arg1[%c35] : memref<100xf32, #tpu.memory_space<smem>>
    %c84 = arith.constant 84 : index
    %465 = memref.load %arg1[%c84] : memref<100xf32, #tpu.memory_space<smem>>
    %466 = vector.broadcast %464 : f32 to vector<4x1xf32>
    %467 = vector.broadcast %465 : f32 to vector<4x1xf32>
    %468 = arith.select %61, %466, %467 : vector<4x1xi1>, vector<4x1xf32>
    %469 = vector.broadcast %468 : vector<4x1xf32> to vector<4x256xf32>
    %470 = arith.mulf %469, %463 : vector<4x256xf32>
    %471 = arith.addf %456, %470 : vector<4x256xf32>
    %c2_i32_72 = arith.constant 2 : i32
    %472 = tpu.dynamic_rotate %460 by %c2_i32_72 dim 1 : vector<4x256xf32>, i32 -> vector<4x256xf32>
    %473 = vector.broadcast %63 : vector<1x256xf32> to vector<4x256xf32>
    %474 = arith.mulf %472, %473 : vector<4x256xf32>
    %c36 = arith.constant 36 : index
    %475 = memref.load %arg1[%c36] : memref<100xf32, #tpu.memory_space<smem>>
    %c85 = arith.constant 85 : index
    %476 = memref.load %arg1[%c85] : memref<100xf32, #tpu.memory_space<smem>>
    %477 = vector.broadcast %475 : f32 to vector<4x1xf32>
    %478 = vector.broadcast %476 : f32 to vector<4x1xf32>
    %479 = arith.select %61, %477, %478 : vector<4x1xi1>, vector<4x1xf32>
    %480 = vector.broadcast %479 : vector<4x1xf32> to vector<4x256xf32>
    %481 = arith.mulf %480, %474 : vector<4x256xf32>
    %482 = arith.addf %471, %481 : vector<4x256xf32>
    %c1_i32_73 = arith.constant 1 : i32
    %483 = tpu.dynamic_rotate %460 by %c1_i32_73 dim 1 : vector<4x256xf32>, i32 -> vector<4x256xf32>
    %484 = vector.broadcast %64 : vector<1x256xf32> to vector<4x256xf32>
    %485 = arith.mulf %483, %484 : vector<4x256xf32>
    %c37 = arith.constant 37 : index
    %486 = memref.load %arg1[%c37] : memref<100xf32, #tpu.memory_space<smem>>
    %c86 = arith.constant 86 : index
    %487 = memref.load %arg1[%c86] : memref<100xf32, #tpu.memory_space<smem>>
    %488 = vector.broadcast %486 : f32 to vector<4x1xf32>
    %489 = vector.broadcast %487 : f32 to vector<4x1xf32>
    %490 = arith.select %61, %488, %489 : vector<4x1xi1>, vector<4x1xf32>
    %491 = vector.broadcast %490 : vector<4x1xf32> to vector<4x256xf32>
    %492 = arith.mulf %491, %485 : vector<4x256xf32>
    %493 = arith.addf %482, %492 : vector<4x256xf32>
    %c38 = arith.constant 38 : index
    %494 = memref.load %arg1[%c38] : memref<100xf32, #tpu.memory_space<smem>>
    %c87 = arith.constant 87 : index
    %495 = memref.load %arg1[%c87] : memref<100xf32, #tpu.memory_space<smem>>
    %496 = vector.broadcast %494 : f32 to vector<4x1xf32>
    %497 = vector.broadcast %495 : f32 to vector<4x1xf32>
    %498 = arith.select %61, %496, %497 : vector<4x1xi1>, vector<4x1xf32>
    %499 = vector.broadcast %498 : vector<4x1xf32> to vector<4x256xf32>
    %500 = arith.mulf %499, %460 : vector<4x256xf32>
    %501 = arith.addf %493, %500 : vector<4x256xf32>
    %c255_i32_74 = arith.constant 255 : i32
    %502 = tpu.dynamic_rotate %460 by %c255_i32_74 dim 1 : vector<4x256xf32>, i32 -> vector<4x256xf32>
    %503 = vector.broadcast %65 : vector<1x256xf32> to vector<4x256xf32>
    %504 = arith.mulf %502, %503 : vector<4x256xf32>
    %c39 = arith.constant 39 : index
    %505 = memref.load %arg1[%c39] : memref<100xf32, #tpu.memory_space<smem>>
    %c88 = arith.constant 88 : index
    %506 = memref.load %arg1[%c88] : memref<100xf32, #tpu.memory_space<smem>>
    %507 = vector.broadcast %505 : f32 to vector<4x1xf32>
    %508 = vector.broadcast %506 : f32 to vector<4x1xf32>
    %509 = arith.select %61, %507, %508 : vector<4x1xi1>, vector<4x1xf32>
    %510 = vector.broadcast %509 : vector<4x1xf32> to vector<4x256xf32>
    %511 = arith.mulf %510, %504 : vector<4x256xf32>
    %512 = arith.addf %501, %511 : vector<4x256xf32>
    %c254_i32_75 = arith.constant 254 : i32
    %513 = tpu.dynamic_rotate %460 by %c254_i32_75 dim 1 : vector<4x256xf32>, i32 -> vector<4x256xf32>
    %514 = vector.broadcast %66 : vector<1x256xf32> to vector<4x256xf32>
    %515 = arith.mulf %513, %514 : vector<4x256xf32>
    %c40 = arith.constant 40 : index
    %516 = memref.load %arg1[%c40] : memref<100xf32, #tpu.memory_space<smem>>
    %c89 = arith.constant 89 : index
    %517 = memref.load %arg1[%c89] : memref<100xf32, #tpu.memory_space<smem>>
    %518 = vector.broadcast %516 : f32 to vector<4x1xf32>
    %519 = vector.broadcast %517 : f32 to vector<4x1xf32>
    %520 = arith.select %61, %518, %519 : vector<4x1xi1>, vector<4x1xf32>
    %521 = vector.broadcast %520 : vector<4x1xf32> to vector<4x256xf32>
    %522 = arith.mulf %521, %515 : vector<4x256xf32>
    %523 = arith.addf %512, %522 : vector<4x256xf32>
    %c253_i32_76 = arith.constant 253 : i32
    %524 = tpu.dynamic_rotate %460 by %c253_i32_76 dim 1 : vector<4x256xf32>, i32 -> vector<4x256xf32>
    %525 = vector.broadcast %67 : vector<1x256xf32> to vector<4x256xf32>
    %526 = arith.mulf %524, %525 : vector<4x256xf32>
    %c41 = arith.constant 41 : index
    %527 = memref.load %arg1[%c41] : memref<100xf32, #tpu.memory_space<smem>>
    %c90 = arith.constant 90 : index
    %528 = memref.load %arg1[%c90] : memref<100xf32, #tpu.memory_space<smem>>
    %529 = vector.broadcast %527 : f32 to vector<4x1xf32>
    %530 = vector.broadcast %528 : f32 to vector<4x1xf32>
    %531 = arith.select %61, %529, %530 : vector<4x1xi1>, vector<4x1xf32>
    %532 = vector.broadcast %531 : vector<4x1xf32> to vector<4x256xf32>
    %533 = arith.mulf %532, %526 : vector<4x256xf32>
    %534 = arith.addf %523, %533 : vector<4x256xf32>
    %c208_i32 = arith.constant 208 : i32
    %535 = tpu.dynamic_rotate %58 by %c208_i32 dim 1 : vector<4x256xf32>, i32 -> vector<4x256xf32>
    %c6_77 = arith.constant 6 : index
    %c0_78 = arith.constant 0 : index
    %536 = vector.load %arg2[%c6_77, %c0_78] : memref<14x256xf32, #tpu.memory_space<vmem>>, vector<1x256xf32>
    %537 = vector.broadcast %536 : vector<1x256xf32> to vector<4x256xf32>
    %538 = arith.mulf %535, %537 : vector<4x256xf32>
    %c3_i32_79 = arith.constant 3 : i32
    %539 = tpu.dynamic_rotate %538 by %c3_i32_79 dim 1 : vector<4x256xf32>, i32 -> vector<4x256xf32>
    %540 = vector.broadcast %62 : vector<1x256xf32> to vector<4x256xf32>
    %541 = arith.mulf %539, %540 : vector<4x256xf32>
    %c42 = arith.constant 42 : index
    %542 = memref.load %arg1[%c42] : memref<100xf32, #tpu.memory_space<smem>>
    %c91 = arith.constant 91 : index
    %543 = memref.load %arg1[%c91] : memref<100xf32, #tpu.memory_space<smem>>
    %544 = vector.broadcast %542 : f32 to vector<4x1xf32>
    %545 = vector.broadcast %543 : f32 to vector<4x1xf32>
    %546 = arith.select %61, %544, %545 : vector<4x1xi1>, vector<4x1xf32>
    %547 = vector.broadcast %546 : vector<4x1xf32> to vector<4x256xf32>
    %548 = arith.mulf %547, %541 : vector<4x256xf32>
    %549 = arith.addf %534, %548 : vector<4x256xf32>
    %c2_i32_80 = arith.constant 2 : i32
    %550 = tpu.dynamic_rotate %538 by %c2_i32_80 dim 1 : vector<4x256xf32>, i32 -> vector<4x256xf32>
    %551 = vector.broadcast %63 : vector<1x256xf32> to vector<4x256xf32>
    %552 = arith.mulf %550, %551 : vector<4x256xf32>
    %c43 = arith.constant 43 : index
    %553 = memref.load %arg1[%c43] : memref<100xf32, #tpu.memory_space<smem>>
    %c92 = arith.constant 92 : index
    %554 = memref.load %arg1[%c92] : memref<100xf32, #tpu.memory_space<smem>>
    %555 = vector.broadcast %553 : f32 to vector<4x1xf32>
    %556 = vector.broadcast %554 : f32 to vector<4x1xf32>
    %557 = arith.select %61, %555, %556 : vector<4x1xi1>, vector<4x1xf32>
    %558 = vector.broadcast %557 : vector<4x1xf32> to vector<4x256xf32>
    %559 = arith.mulf %558, %552 : vector<4x256xf32>
    %560 = arith.addf %549, %559 : vector<4x256xf32>
    %c1_i32_81 = arith.constant 1 : i32
    %561 = tpu.dynamic_rotate %538 by %c1_i32_81 dim 1 : vector<4x256xf32>, i32 -> vector<4x256xf32>
    %562 = vector.broadcast %64 : vector<1x256xf32> to vector<4x256xf32>
    %563 = arith.mulf %561, %562 : vector<4x256xf32>
    %c44 = arith.constant 44 : index
    %564 = memref.load %arg1[%c44] : memref<100xf32, #tpu.memory_space<smem>>
    %c93 = arith.constant 93 : index
    %565 = memref.load %arg1[%c93] : memref<100xf32, #tpu.memory_space<smem>>
    %566 = vector.broadcast %564 : f32 to vector<4x1xf32>
    %567 = vector.broadcast %565 : f32 to vector<4x1xf32>
    %568 = arith.select %61, %566, %567 : vector<4x1xi1>, vector<4x1xf32>
    %569 = vector.broadcast %568 : vector<4x1xf32> to vector<4x256xf32>
    %570 = arith.mulf %569, %563 : vector<4x256xf32>
    %571 = arith.addf %560, %570 : vector<4x256xf32>
    %c45 = arith.constant 45 : index
    %572 = memref.load %arg1[%c45] : memref<100xf32, #tpu.memory_space<smem>>
    %c94 = arith.constant 94 : index
    %573 = memref.load %arg1[%c94] : memref<100xf32, #tpu.memory_space<smem>>
    %574 = vector.broadcast %572 : f32 to vector<4x1xf32>
    %575 = vector.broadcast %573 : f32 to vector<4x1xf32>
    %576 = arith.select %61, %574, %575 : vector<4x1xi1>, vector<4x1xf32>
    %577 = vector.broadcast %576 : vector<4x1xf32> to vector<4x256xf32>
    %578 = arith.mulf %577, %538 : vector<4x256xf32>
    %579 = arith.addf %571, %578 : vector<4x256xf32>
    %c255_i32_82 = arith.constant 255 : i32
    %580 = tpu.dynamic_rotate %538 by %c255_i32_82 dim 1 : vector<4x256xf32>, i32 -> vector<4x256xf32>
    %581 = vector.broadcast %65 : vector<1x256xf32> to vector<4x256xf32>
    %582 = arith.mulf %580, %581 : vector<4x256xf32>
    %c46 = arith.constant 46 : index
    %583 = memref.load %arg1[%c46] : memref<100xf32, #tpu.memory_space<smem>>
    %c95 = arith.constant 95 : index
    %584 = memref.load %arg1[%c95] : memref<100xf32, #tpu.memory_space<smem>>
    %585 = vector.broadcast %583 : f32 to vector<4x1xf32>
    %586 = vector.broadcast %584 : f32 to vector<4x1xf32>
    %587 = arith.select %61, %585, %586 : vector<4x1xi1>, vector<4x1xf32>
    %588 = vector.broadcast %587 : vector<4x1xf32> to vector<4x256xf32>
    %589 = arith.mulf %588, %582 : vector<4x256xf32>
    %590 = arith.addf %579, %589 : vector<4x256xf32>
    %c254_i32_83 = arith.constant 254 : i32
    %591 = tpu.dynamic_rotate %538 by %c254_i32_83 dim 1 : vector<4x256xf32>, i32 -> vector<4x256xf32>
    %592 = vector.broadcast %66 : vector<1x256xf32> to vector<4x256xf32>
    %593 = arith.mulf %591, %592 : vector<4x256xf32>
    %c47 = arith.constant 47 : index
    %594 = memref.load %arg1[%c47] : memref<100xf32, #tpu.memory_space<smem>>
    %c96 = arith.constant 96 : index
    %595 = memref.load %arg1[%c96] : memref<100xf32, #tpu.memory_space<smem>>
    %596 = vector.broadcast %594 : f32 to vector<4x1xf32>
    %597 = vector.broadcast %595 : f32 to vector<4x1xf32>
    %598 = arith.select %61, %596, %597 : vector<4x1xi1>, vector<4x1xf32>
    %599 = vector.broadcast %598 : vector<4x1xf32> to vector<4x256xf32>
    %600 = arith.mulf %599, %593 : vector<4x256xf32>
    %601 = arith.addf %590, %600 : vector<4x256xf32>
    %c253_i32_84 = arith.constant 253 : i32
    %602 = tpu.dynamic_rotate %538 by %c253_i32_84 dim 1 : vector<4x256xf32>, i32 -> vector<4x256xf32>
    %603 = vector.broadcast %67 : vector<1x256xf32> to vector<4x256xf32>
    %604 = arith.mulf %602, %603 : vector<4x256xf32>
    %c48 = arith.constant 48 : index
    %605 = memref.load %arg1[%c48] : memref<100xf32, #tpu.memory_space<smem>>
    %c97 = arith.constant 97 : index
    %606 = memref.load %arg1[%c97] : memref<100xf32, #tpu.memory_space<smem>>
    %607 = vector.broadcast %605 : f32 to vector<4x1xf32>
    %608 = vector.broadcast %606 : f32 to vector<4x1xf32>
    %609 = arith.select %61, %607, %608 : vector<4x1xi1>, vector<4x1xf32>
    %610 = vector.broadcast %609 : vector<4x1xf32> to vector<4x256xf32>
    %611 = arith.mulf %610, %604 : vector<4x256xf32>
    %612 = arith.addf %601, %611 : vector<4x256xf32>
    %613 = vector.extract_strided_slice %612 {offsets = [0, 0], sizes = [2, 256], strides = [1, 1]} : vector<4x256xf32> to vector<2x256xf32>
    %614 = vector.extract_strided_slice %612 {offsets = [2, 0], sizes = [2, 256], strides = [1, 1]} : vector<4x256xf32> to vector<2x256xf32>
    %615 = arith.addf %613, %614 : vector<2x256xf32>
    %616 = vector.broadcast %68 : f32 to vector<2x256xf32>
    %617 = arith.mulf %615, %616 : vector<2x256xf32>
    %618 = vector.broadcast %69 : f32 to vector<2x256xf32>
    %619 = arith.addf %617, %618 : vector<2x256xf32>
    %620 = arith.negf %619 : vector<2x256xf32>
    %621 = math.exp %620 : vector<2x256xf32>
    %cst_85 = arith.constant 1.000000e+00 : f32
    %622 = vector.broadcast %cst_85 : f32 to vector<2x256xf32>
    %623 = arith.addf %622, %621 : vector<2x256xf32>
    %624 = arith.divf %622, %623 : vector<2x256xf32>
    %625 = arith.mulf %619, %624 : vector<2x256xf32>
    %626 = arith.negf %625 : vector<2x256xf32>
    %627 = math.exp %626 : vector<2x256xf32>
    %cst_86 = arith.constant 1.000000e+00 : f32
    %628 = vector.broadcast %cst_86 : f32 to vector<2x256xf32>
    %629 = arith.addf %628, %627 : vector<2x256xf32>
    %630 = arith.divf %628, %629 : vector<2x256xf32>
    %631 = vector.extract_strided_slice %37 {offsets = [0, 0, 0], sizes = [1, 32, 256], strides = [1, 1, 1]} : vector<2x32x256xf32> to vector<1x32x256xf32>
    %632 = vector.shape_cast %631 : vector<1x32x256xf32> to vector<32x256xf32>
    %633 = vector.extract_strided_slice %630 {offsets = [0, 0], sizes = [1, 256], strides = [1, 1]} : vector<2x256xf32> to vector<1x256xf32>
    %634 = vector.broadcast %633 : vector<1x256xf32> to vector<32x256xf32>
    %635 = arith.mulf %632, %634 : vector<32x256xf32>
    %c0_87 = arith.constant 0 : index
    %c0_88 = arith.constant 0 : index
    %c0_89 = arith.constant 0 : index
    %636 = vector.load %arg8[%c0_87, %c0_88, %c0_89] : memref<2x32x256xf32, #tpu.memory_space<vmem>>, vector<1x32x256xf32>
    %637 = vector.shape_cast %636 : vector<1x32x256xf32> to vector<32x256xf32>
    %638 = vector.shape_cast %635 : vector<32x256xf32> to vector<1x32x256xf32>
    tpu.vector_store %arg8[%c0_87, %c0_88, %c0_89], %638 {strides = array<i32>} : memref<2x32x256xf32, #tpu.memory_space<vmem>>, vector<1x32x256xf32>,
    %639 = vector.extract_strided_slice %37 {offsets = [1, 0, 0], sizes = [1, 32, 256], strides = [1, 1, 1]} : vector<2x32x256xf32> to vector<1x32x256xf32>
    %640 = vector.shape_cast %639 : vector<1x32x256xf32> to vector<32x256xf32>
    %641 = vector.extract_strided_slice %630 {offsets = [1, 0], sizes = [1, 256], strides = [1, 1]} : vector<2x256xf32> to vector<1x256xf32>
    %642 = vector.broadcast %641 : vector<1x256xf32> to vector<32x256xf32>
    %643 = arith.mulf %640, %642 : vector<32x256xf32>
    %c1_90 = arith.constant 1 : index
    %c0_91 = arith.constant 0 : index
    %c0_92 = arith.constant 0 : index
    %644 = vector.load %arg8[%c1_90, %c0_91, %c0_92] : memref<2x32x256xf32, #tpu.memory_space<vmem>>, vector<1x32x256xf32>
    %645 = vector.shape_cast %644 : vector<1x32x256xf32> to vector<32x256xf32>
    %646 = vector.shape_cast %643 : vector<32x256xf32> to vector<1x32x256xf32>
    tpu.vector_store %arg8[%c1_90, %c0_91, %c0_92], %646 {strides = array<i32>} : memref<2x32x256xf32, #tpu.memory_space<vmem>>, vector<1x32x256xf32>,
    return
  }
  func.func @transform_0(%arg0: i32) -> i32 {
    %c0_i32 = arith.constant 0 : i32
    %c0_i32_0 = arith.constant 0 : i32
    return %c0_i32 : i32
  }
  func.func @transform_1(%arg0: i32) -> (i32, i32) {
    %c0_i32 = arith.constant 0 : i32
    %c0_i32_0 = arith.constant 0 : i32
    %c0_i32_1 = arith.constant 0 : i32
    return %c0_i32, %c0_i32_0 : i32, i32
  }
  func.func @transform_2(%arg0: i32) -> (i32, i32, i32) {
    %c0_i32 = arith.constant 0 : i32
    %c0_i32_0 = arith.constant 0 : i32
    %c0_i32_1 = arith.constant 0 : i32
    return %arg0, %c0_i32, %c0_i32_0 : i32, i32, i32
  }
  func.func @transform_3(%arg0: i32) -> (i32, i32) {
    %c0_i32 = arith.constant 0 : i32
    %c0_i32_0 = arith.constant 0 : i32
    %c0_i32_1 = arith.constant 0 : i32
    return %c0_i32, %c0_i32_0 : i32, i32
  }
  func.func @transform_4(%arg0: i32) -> (i32, i32) {
    %c0_i32 = arith.constant 0 : i32
    %c0_i32_0 = arith.constant 0 : i32
    %c0_i32_1 = arith.constant 0 : i32
    return %c0_i32, %c0_i32_0 : i32, i32
  }
  func.func @transform_5(%arg0: i32) -> (i32, i32) {
    %c0_i32 = arith.constant 0 : i32
    %c0_i32_0 = arith.constant 0 : i32
    %c0_i32_1 = arith.constant 0 : i32
    return %c0_i32, %c0_i32_0 : i32, i32
  }
  func.func @transform_6(%arg0: i32) -> (i32, i32) {
    %c0_i32 = arith.constant 0 : i32
    %c0_i32_0 = arith.constant 0 : i32
    %c0_i32_1 = arith.constant 0 : i32
    return %c0_i32, %c0_i32_0 : i32, i32
  }
  func.func @transform_7(%arg0: i32) -> (i32, i32, i32) {
    %c0_i32 = arith.constant 0 : i32
    %c0_i32_0 = arith.constant 0 : i32
    %c0_i32_1 = arith.constant 0 : i32
    return %arg0, %c0_i32, %c0_i32_0 : i32, i32, i32
  }
}

</mosaic_0001>

<bundles_post_ra>
// kernel: cbam_forward.1
= control target key start
LH: loop header
LB: loop body
LE: loop exit
PB: predicated region body
PF: predicated region fallthrough
CT: control target
= control target key end

     0   :  { %12 = vsyncpa [#allocation3], 0  ;;  %s1895_s27 = smov [#allocation2]   ;;  %s3435_s0 = inlined_call_operand.vmem [shape: f32[100], index: 0, kind: input, shape index: {}]   ;;  %s3436_s1 = inlined_call_operand.vmem [shape: f32[14,256], index: 1, kind: input, shape index: {}]   ;;  %s3437_s2 = inlined_call_operand.vmem [shape: f32[2,32,256], index: 2, kind: input, shape index: {}]   ;;  %s3438_s3 = inlined_call_operand.vmem [shape: f32[2,32], index: 3, kind: input, shape index: {}]   ;;  %s3439_s4 = inlined_call_operand.vmem [shape: f32[2,1], index: 4, kind: input, shape index: {}]   ;;  %s3440_s5 = inlined_call_operand.vmem [shape: f32[32,2], index: 5, kind: input, shape index: {}]   ;;  %s3441_s6 = inlined_call_operand.vmem [shape: f32[32,1], index: 6, kind: input, shape index: {}]   ;;  %s3442_s7 = inlined_call_operand.vmem [shape: f32[2,32,256], index: 7, kind: output, shape index: {}]  }
   0x1   :  { %s18_s26 = sshll.u32 %s3435_s0, 4  ;;  %s19_s26 = int_to_ptr.vmem [resolvable:$true] %s18_s26 }
   0x2   :  { %21 = dma.vmem_to_smem %s19_s26, 16, %s1895_s27, [#allocation3]  }
   0x3   :  { %1893 = dma.done.wait [#allocation3], 16  }
   0x4   :  { %1894 = vsyncadd [#allocation3], 4294967280 }
   0x5   :  { %38 = sfence }
   0x6   :  { %v1955_v0 = vld [vmem:[%s3437_s2 + $0x30] sm:$0xff]  ;;  %v1960_v1 = vld [vmem:[%s3437_s2 + $0x38] sm:$0xff]  ;;  %v1965_v2 = vld [vmem:[%s3437_s2 + $0x20] sm:$0xff]  ;;  %vm111_vm0 = vcmask 7168   ;;  %v1896_v42 = vmov 0   ;;  %vm135_vm1 = vcmask 261120  }
   0x7   :  { %v96_v3 = vmax.f32 %v1955_v0, %v1960_v1  ;;  %v64_v4 = vadd.f32 %v1960_v1, %v1955_v0  ;;  %v1974_v5 = vld [vmem:[%s3437_s2 + $0x28] sm:$0xff]  ;;  %v1981_v7 = vld [vmem:[%s3437_s2 + $0x70] sm:$0xff]  ;;  %v1986_v8 = vld [vmem:[%s3437_s2 + $0x78] sm:$0xff]  ;;  %1830 = vset.pattern.permute.xlu1 %v1896_v42  ;;  %1832 = vset.pattern.permute.xlu0 %v1896_v42  ;;  %vm214_vm2 = vcmask 1041408   ;;  %vm201_vm3 = vcmask 15360   ;;  %s1897_s28 = smov 127  }
   0x8   :  { %v61_v6 = vadd.f32 %v1974_v5, %v1965_v2  ;;  %v1991_v9 = vld [vmem:[%s3437_s2 + $0x60] sm:$0xff]  ;;  %v1996_v10 = vld [vmem:[%s3437_s2 + $0x68] sm:$0xff]  ;;  %v108_v11 = vmax.f32 %v1981_v7, %v1986_v8  ;;  %v76_v12 = vadd.f32 %v1986_v8, %v1981_v7  ;;  %v2007_v14 = vld [vmem:[%s3437_s2 + $0x10] sm:$0xff]  ;;  %v93_v18 = vmax.f32 %v1965_v2, %v1974_v5  ;;  %1831 = vset.pattern.permute.xlu2 %v1896_v42  ;;  %s1899_s29 = smov 32   ;;  %s1900_s30 = smov 16  }
   0x9   :  { %97 = vmax.xlane.f32.xlu2 %v96_v3  ;;  %65 = vadd.xlane.f32.xlu0 %v64_v4  ;;  %v73_v13 = vadd.f32 %v1996_v10, %v1991_v9  ;;  %v2012_v15 = vld [vmem:[%s3437_s2 + $0x18] sm:$0xff]  ;;  %v2017_v16 = vld [vmem:[%s3437_s2 + $0x50] sm:$0xff]  ;;  %v2033_v21 = vld [vmem:[%s3437_s2 + $0x40] sm:$0xff]  ;;  %v105_v26 = vmax.f32 %v1991_v9, %v1996_v10  ;;  %s1901_s8 = smov 96   ;;  %s1902_s9 = smov 112  }
   0xa   :  { %62 = vadd.xlane.f32.xlu1 %v61_v6  ;;  %v2022_v17 = vld [vmem:[%s3437_s2 + $0x58] sm:$0xff]  ;;  %v58_v19 = vadd.f32 %v2012_v15, %v2007_v14  ;;  %v2038_v22 = vld [vmem:[%s3437_s2 + $0x48] sm:$0xff]  ;;  %v2043_v23 = vld [vmem:[%s3437_s2] sm:$0xff]  ;;  %v90_v28 = vmax.f32 %v2007_v14, %v2012_v15  ;;  %s1903_s10 = smov 3   ;;  %s1904_s0 = smov 2  }
   0xb   :  { %v70_v20 = vadd.f32 %v2022_v17, %v2017_v16  ;;  %v2048_v24 = vld [vmem:[%s3437_s2 + $0x8] sm:$0xff]  ;;  %v67_v25 = vadd.f32 %v2038_v22, %v2033_v21  ;;  %v102_v30 = vmax.f32 %v2017_v16, %v2022_v17  ;;  %v99_v31 = vmax.f32 %v2033_v21, %v2038_v22  ;;  %v121_v43 = vld [vmem:[%s3439_s4] sm:$0x3]  ;;  %v129_v49 = vld [vmem:[%s3441_s6 + $0x18] sm:$0xff]  ;;  %s1905_s11 = smov 80   ;;  %s1906_s2 = smov 1  }
   0xc   :  { %v55_v27 = vadd.f32 %v2048_v24, %v2043_v23  ;;  %v87_v29 = vmax.f32 %v2043_v23, %v2048_v24  ;;  %v120_v63 = vld [vmem:[%s3438_s3] sm:$0x3]  ;;  %s1907_s12 = smov 126   ;;  %s1908_s13 = smov 125  }
   0xd   :  { %s2477_s20 = sld [smem:[#allocation2 + $0x3]] }
   0xe   :  { %s2483_s21 = sld [smem:[#allocation2 + $0x34]] }
   0xf   :  { %s2485_s22 = sld [smem:[#allocation2]] }
  0x10   :  { %s2487_s23 = sld [smem:[#allocation2 + $0x31]] }
  0x11   :  { %109 = vmax.xlane.f32.xlu2 %v108_v11  ;;  %77 = vadd.xlane.f32.xlu0 %v76_v12  ;;  %v127_v12 = vld [vmem:[%s3441_s6 + $0x8] sm:$0xff]  ;;  %s2489_s24 = sld [smem:[#allocation2 + $0x1]] }
  0x12   :  { %74 = vadd.xlane.f32.xlu1 %v73_v13  ;;  %v126_v13 = vld [vmem:[%s3441_s6] sm:$0xff]  ;;  %s2491_s25 = sld [smem:[#allocation2 + $0x32]] }
  0x13   :  { %s2496_s27 = sld [smem:[#allocation2 + $0x2]] }
  0x14   :  { %s2540_s4 = sld [smem:[#allocation2 + $0x4]] }
  0x15   :  { %s2552_s15 = sld [smem:[#allocation2 + $0x35]] }
  0x16   :  { %s2594_s16 = sld [smem:[#allocation2 + $0x5]] }
  0x17   :  { %s2596_s17 = sld [smem:[#allocation2 + $0x36]] }
  0x18   :  { %s2601_s18 = sld [smem:[#allocation2 + $0x6]] }
  0x19   :  { %94 = vmax.xlane.f32.xlu2 %v93_v18  ;;  %59 = vadd.xlane.f32.xlu0 %v58_v19  ;;  %s1723_s14 = sld [smem:[#allocation2 + $0x3c]] }
  0x1a   :  { %71 = vadd.xlane.f32.xlu1 %v70_v20  ;;  %s2807_s19 = sld [smem:[#allocation2 + $0x40]] }
  0x1b   :  { %s2835_s3 = sld [smem:[#allocation2 + $0x49]] }
  0x1c   :  { %s2885_s26 = sld [smem:[#allocation2 + $0x44]] }
  0x21   :  { %68 = vadd.xlane.f32.xlu2 %v67_v25  ;;  %106 = vmax.xlane.f32.xlu0 %v105_v26  ;;  %v122_v26 = vld [vmem:[%s3440_s5] sm:$0xff] }
  0x22   :  { %56 = vadd.xlane.f32.xlu1 %v55_v27  ;;  %v123_v27 = vld [vmem:[%s3440_s5 + $0x8] sm:$0xff] }
  0x29   :  { %91 = vmax.xlane.f32.xlu0 %v90_v28  ;;  %88 = vmax.xlane.f32.xlu2 %v87_v29  ;;  %v128_v28 = vld [vmem:[%s3441_s6 + $0x10] sm:$0xff]  ;;  %s2643_s6 = sld [smem:[#allocation2 + $0x8]] }
  0x2a   :  { %103 = vmax.xlane.f32.xlu1 %v102_v30 }
  0x31   :  { %100 = vmax.xlane.f32.xlu0 %v99_v31 }
  0x41   :  { %183 = vperm.xlu2 %1831, %v126_v13  }
  0x43   :  { %132 = vperm.xlu1 %1830, %v121_v43  }
  0x45   :  { %188 = vperm.xlu0 %1832, %v127_v12  }
  0x49   :  { %193 = vperm.xlu2 %1831, %v128_v28  }
  0x4b   :  { %198 = vperm.xlu1 %1830, %v129_v49  }
  0x7c   :  { %v98_v32 = vpop.xlane.xlu2 %97  ;;  %v66_v33 = vpop.xlane.xlu0 %65 }
  0x7d   :  { %v82_v34 = vmul.f32 0.00390625, %v66_v33  ;;  %v63_v35 = vpop.xlane.xlu1 %62  ;;  %v125_v33 = vld [vmem:[%s3440_s5 + $0x18] sm:$0xff] }
  0x7e   :  { %v81_v44 = vmul.f32 0.00390625, %v63_v35 }
  0x7f   :  { %v115_v36 = vsel %vm111_vm0, %v82_v34, %v98_v32  ;;  %v124_v32 = vld [vmem:[%s3440_s5 + $0x10] sm:$0xff]  ;;  %s1898_s5 = smov 48  }
  0x80   :  { %151 = vmatpush.msra.mxu0 %v115_v36 }
  0x84   :  { %v110_v37 = vpop.xlane.xlu2 %109  ;;  %v78_v38 = vpop.xlane.xlu0 %77 }
  0x85   :  { %v86_v39 = vmul.f32 0.00390625, %v78_v38  ;;  %v75_v40 = vpop.xlane.xlu1 %74 }
  0x86   :  { %v85_v50 = vmul.f32 0.00390625, %v75_v40 }
  0x87   :  { %v119_v41 = vsel %vm111_vm0, %v86_v39, %v110_v37 }
  0x88   :  { %171 = vmatpush.msra.mxu1 %v119_v41 }
  0x8c   :  { %v95_v45 = vpop.xlane.xlu2 %94  ;;  %v60_v46 = vpop.xlane.xlu0 %59 }
  0x8d   :  { %v72_v47 = vpop.xlane.xlu1 %71  ;;  %v114_v48 = vsel %vm111_vm0, %v81_v44, %v95_v45  ;;  %v80_v55 = vmul.f32 0.00390625, %v60_v46 }
  0x8e   :  { %152 = vmatpush.msra.mxu0 %v114_v48  ;;  %v84_v57 = vmul.f32 0.00390625, %v72_v47 }
  0x94   :  { %v69_v51 = vpop.xlane.xlu2 %68  ;;  %v107_v52 = vpop.xlane.xlu0 %106 }
  0x95   :  { %v57_v53 = vpop.xlane.xlu1 %56  ;;  %v118_v54 = vsel %vm111_vm0, %v85_v50, %v107_v52  ;;  %v83_v4 = vmul.f32 0.00390625, %v69_v51 }
  0x96   :  { %172 = vmatpush.msra.mxu1 %v118_v54  ;;  %v79_v56 = vmul.f32 0.00390625, %v57_v53 }
  0x9c   :  { %v92_v58 = vpop.xlane.xlu0 %91  ;;  %v89_v59 = vpop.xlane.xlu2 %88 }
  0x9d   :  { %v104_v60 = vpop.xlane.xlu1 %103  ;;  %v113_v61 = vsel %vm111_vm0, %v80_v55, %v92_v58  ;;  %v112_v3 = vsel %vm111_vm0, %v79_v56, %v89_v59 }
  0x9e   :  { %153 = vmatpush.msra.mxu0 %v113_v61  ;;  %v117_v62 = vsel %vm111_vm0, %v84_v57, %v104_v60 }
  0x9f   :  { %173 = vmatpush.msra.mxu1 %v117_v62 }
  0xa0   :  { %154 = vmatpush.msra.mxu0 %v112_v3 }
  0xa1   :  { %1672 = vmatmul.msk.f32.vlgmr.msra.gmra.mxu0 %vm135_vm1, %v120_v63 }
  0xa4   :  { %v101_v6 = vpop.xlane.xlu0 %100  ;;  %v184_v34 = vpop.permute.xlu2 %183 }
  0xa5   :  { %v116_v11 = vsel %vm111_vm0, %v83_v4, %v101_v6 }
  0xa6   :  { %174 = vmatpush.msra.mxu1 %v116_v11 }
  0xa7   :  { %1673 = vmatmul.msk.f32.vlgmr.msra.gmra.mxu1 %vm135_vm1, %v120_v63 }
  0xac   :  { %v194_v43 = vpop.permute.xlu2 %193 }
  0xb5   :  { %v133_v18 = vpop.permute.xlu1 %132 }
  0xb7   :  { %v189_v37 = vpop.permute.xlu0 %188 }
  0xbd   :  { %v199_v49 = vpop.permute.xlu1 %198 }
 0x11e   :  { %v156_v19 = vpop.f32.mrf.mxu0 }
 0x11f   :  { %v157_v20 = vadd.f32 %v156_v19, %v133_v18 }
 0x121   :  { %v179_v25 = vmax.f32 %v157_v20, 0.0 }
 0x123   :  { %1674 = vmatpush.msk.msrb.mxu0 %vm214_vm2, %v179_v25  ;;  %1814 = vmatpush.msk.msra.mxu2 %vm214_vm2, %v179_v25 }
 0x124   :  { %v176_v29 = vpop.f32.mrf.mxu1  ;;  %1675 = vmatmul.msk.f32.vlgmr.msrb.gmra.mxu0 %vm201_vm3, %v122_v26  ;;  %1676 = vmatmul.msk.f32.vlgmr.msra.gmra.mxu2 %vm201_vm3, %v123_v27 }
 0x125   :  { %v177_v30 = vadd.f32 %v176_v29, %v133_v18 }
 0x127   :  { %v180_v31 = vmax.f32 %v177_v30, 0.0 }
 0x129   :  { %1679 = vmatpush.msk.msrb.mxu1 %vm214_vm2, %v180_v31  ;;  %1815 = vmatpush.msk.msra.mxu3 %vm214_vm2, %v180_v31 }
 0x12a   :  { %1681 = vmatmul.msk.f32.vlgmr.msra.gmra.mxu3 %vm201_vm3, %v123_v27  ;;  %1680 = vmatmul.msk.f32.vlgmr.msrb.gmra.mxu1 %vm201_vm3, %v122_v26 }
 0x12c   :  { %1677 = vmatmul.msk.f32.gmra.mxu2 %vm201_vm3, %v124_v32 }
 0x132   :  { %1682 = vmatmul.msk.f32.gmra.mxu3 %vm201_vm3, %v124_v32 }
 0x134   :  { %1678 = vmatmul.msk.f32.gmra.mxu2 %vm201_vm3, %v125_v33 }
 0x13a   :  { %1683 = vmatmul.msk.f32.gmra.mxu3 %vm201_vm3, %v125_v33 }
 0x1a1   :  { %v235_v35 = vpop.f32.mrf.mxu0 }
 0x1a2   :  { %v236_v36 = vadd.f32 %v235_v35, %v184_v34 }
 0x1a4   :  { %287 = vrot.lane.b32.xlu2 %v236_v36, %s1897_s28 }
 0x1a7   :  { %v238_v38 = vpop.f32.mrf.mxu2  ;;  %v267_v39 = vpop.f32.mrf.mxu1 }
 0x1a8   :  { %v239_v40 = vadd.f32 %v238_v38, %v189_v37  ;;  %v268_v41 = vadd.f32 %v267_v39, %v184_v34 }
 0x1aa   :  { %289 = vrot.lane.b32.xlu1 %v239_v40, %s1897_s28 }
 0x1ac   :  { %295 = vrot.lane.b32.xlu2 %v268_v41, %s1897_s28 }
 0x1ad   :  { %v270_v42 = vpop.f32.mrf.mxu3 }
 0x1ae   :  { %v2117_v45 = vadd.f32 %v270_v42, %v189_v37 }
 0x1af   :  { %v241_v44 = vpop.f32.mrf.mxu2 }
 0x1b0   :  { %v2119_v46 = vadd.f32 %v241_v44, %v194_v43 }
 0x1b2   :  { %291 = vrot.lane.b32.xlu0 %v2119_v46, %s1897_s28  ;;  %297 = vrot.lane.b32.xlu1 %v2117_v45, %s1897_s28 }
 0x1b5   :  { %v273_v47 = vpop.f32.mrf.mxu3 }
 0x1b6   :  { %v274_v48 = vadd.f32 %v273_v47, %v194_v43 }
 0x1b7   :  { %v244_v50 = vpop.f32.mrf.mxu2 }
 0x1b8   :  { %v2125_v51 = vadd.f32 %v244_v50, %v199_v49  ;;  %299 = vrot.lane.b32.xlu2 %v274_v48, %s1897_s28 }
 0x1ba   :  { %293 = vrot.lane.b32.xlu1 %v2125_v51, %s1897_s28 }
 0x1bd   :  { %v276_v52 = vpop.f32.mrf.mxu3 }
 0x1be   :  { %v2130_v53 = vadd.f32 %v276_v52, %v199_v49 }
 0x1c0   :  { %301 = vrot.lane.b32.xlu0 %v2130_v53, %s1897_s28 }
 0x1fe   :  { %v288_v54 = vpop.permute.xlu2 %287 }
 0x1ff   :  { %v311_v55 = vadd.f32 %v288_v54, %v236_v36 }
 0x201   :  { %v1684_v56 = vmul.f32 -1.442695, %v311_v55 }
 0x203   :  { %1833 = vpow2.f32 %v1684_v56 }
 0x206   :  { %v296_v57 = vpop.permute.xlu2 %295 }
 0x207   :  { %v315_v58 = vadd.f32 %v296_v57, %v268_v41 }
 0x209   :  { %v1834_v59 = vpop.eup %1833  ;;  %v1688_v60 = vmul.f32 -1.442695, %v315_v58 }
 0x20a   :  { %v343_v61 = vadd.f32 1.0, %v1834_v59 }
 0x20b   :  { %1835 = vpow2.f32 %v1688_v60 }
 0x20c   :  { %1837 = vrcp.f32 %v343_v61  ;;  %v362_v18 = vand.u32 2147483648, %v343_v61  ;;  %v360_v20 = vand.u32 2147483647, %v343_v61  ;;  %vm356_vm5 = vweird.f32 %v343_v61 }
 0x20e   :  { %v363_v27 = vor.u32 1.1754944e-38, %v362_v18  ;;  %vm361_vm7 = vcmp.eq.f32.partialorder %v360_v20, 8.507059e+37 }
 0x211   :  { %v1836_v62 = vpop.eup %1835 }
 0x212   :  { %v1838_v63 = vpop.eup %1837  ;;  %v347_v3 = vadd.f32 1.0, %v1836_v62  ;;  %v300_v4 = vpop.permute.xlu2 %299 }
 0x213   :  { %v317_v6 = vadd.f32 %v300_v4, %v274_v48  ;;  %v352_v11 = vmul.f32 %v1838_v63, %v343_v61  ;;  %vm357_vm4 = vweird.f32 %v1838_v63 }
 0x214   :  { %1839 = vrcp.f32 %v347_v3  ;;  %vm358_vm6 = vmor %vm356_vm5, %vm357_vm4  ;;  %v422_v36 = vand.u32 2147483648, %v347_v3  ;;  %v420_v39 = vand.u32 2147483647, %v347_v3  ;;  %vm416_vm9 = vweird.f32 %v347_v3 }
 0x215   :  { %v1690_v12 = vmul.f32 -1.442695, %v317_v6  ;;  %v353_v13 = vsub.f32 1.0, %v352_v11 }
 0x216   :  { %v423_v42 = vor.u32 1.1754944e-38, %v422_v36  ;;  %vm421_vm11 = vcmp.eq.f32.partialorder %v420_v39, 8.507059e+37 }
 0x217   :  { %1841 = vpow2.f32 %v1690_v12  ;;  %v354_v19 = vmul.f32 %v1838_v63, %v353_v13 }
 0x219   :  { %v355_v25 = vadd.f32 %v1838_v63, %v354_v19 }
 0x21a   :  { %v1840_v26 = vpop.eup %1839 }
 0x21b   :  { %v359_v28 = vsel %vm358_vm6, %v1838_v63, %v355_v25  ;;  %v412_v29 = vmul.f32 %v1840_v26, %v347_v3  ;;  %vm417_vm8 = vweird.f32 %v1840_v26 }
 0x21c   :  { %v290_v30 = vpop.permute.xlu1 %289  ;;  %v364_v31 = vsel %vm361_vm7, %v363_v27, %v359_v28  ;;  %vm418_vm10 = vmor %vm416_vm9, %vm417_vm8 }
 0x21d   :  { %v1842_v32 = vpop.eup %1841  ;;  %v312_v33 = vadd.f32 %v290_v30, %v239_v40  ;;  %473 = vperm.xlu2 %1831, %v364_v31   ;;  %v413_v34 = vsub.f32 1.0, %v412_v29 }
 0x21e   :  { %v349_v35 = vadd.f32 1.0, %v1842_v32 }
 0x21f   :  { %v1685_v37 = vmul.f32 -1.442695, %v312_v33  ;;  %v414_v38 = vmul.f32 %v1840_v26, %v413_v34 }
 0x220   :  { %1843 = vrcp.f32 %v349_v35  ;;  %v452_v59 = vand.u32 2147483648, %v349_v35  ;;  %v450_v61 = vand.u32 2147483647, %v349_v35  ;;  %vm446_vm13 = vweird.f32 %v349_v35 }
 0x221   :  { %1845 = vpow2.f32 %v1685_v37  ;;  %v415_v41 = vadd.f32 %v1840_v26, %v414_v38 }
 0x222   :  { %vm451_vm15 = vcmp.eq.f32.partialorder %v450_v61, 8.507059e+37 }
 0x223   :  { %v419_v43 = vsel %vm418_vm10, %v1840_v26, %v415_v41 }
 0x224   :  { %v292_v44 = vpop.permute.xlu0 %291  ;;  %v298_v47 = vpop.permute.xlu1 %297  ;;  %v424_v48 = vsel %vm421_vm11, %v423_v42, %v419_v43 }
 0x225   :  { %v313_v40 = vadd.f32 %v292_v44, %v2119_v46  ;;  %v316_v49 = vadd.f32 %v298_v47, %v2117_v45  ;;  %493 = vperm.xlu1 %1830, %v424_v48   ;;  %v453_v45 = vor.u32 1.1754944e-38, %v452_v59 }
 0x226   :  { %v1844_v50 = vpop.eup %1843 }
 0x227   :  { %v1846_v52 = vpop.eup %1845  ;;  %v1686_v54 = vmul.f32 -1.442695, %v313_v40  ;;  %v1689_v55 = vmul.f32 -1.442695, %v316_v49  ;;  %v442_v56 = vmul.f32 %v1844_v50, %v349_v35  ;;  %vm447_vm12 = vweird.f32 %v1844_v50 }
 0x228   :  { %v344_v57 = vadd.f32 1.0, %v1846_v52  ;;  %vm448_vm14 = vmor %vm446_vm13, %vm447_vm12 }
 0x229   :  { %1847 = vpow2.f32 %v1686_v54  ;;  %v443_v58 = vsub.f32 1.0, %v442_v56 }
 0x22a   :  { %1849 = vrcp.f32 %v344_v57  ;;  %v377_v27 = vand.u32 2147483648, %v344_v57  ;;  %v375_v30 = vand.u32 2147483647, %v344_v57  ;;  %vm371_vm1 = vweird.f32 %v344_v57 }
 0x22b   :  { %1851 = vpow2.f32 %v1689_v55  ;;  %v444_v60 = vmul.f32 %v1844_v50, %v443_v58 }
 0x22c   :  { %v294_v62 = vpop.permute.xlu1 %293  ;;  %v378_v35 = vor.u32 1.1754944e-38, %v377_v27  ;;  %vm376_vm4 = vcmp.eq.f32.partialorder %v375_v30, 8.507059e+37 }
 0x22d   :  { %v314_v46 = vadd.f32 %v294_v62, %v2125_v51  ;;  %v445_v63 = vadd.f32 %v1844_v50, %v444_v60 }
 0x22f   :  { %v1848_v3 = vpop.eup %1847  ;;  %v1687_v4 = vmul.f32 -1.442695, %v314_v46  ;;  %v449_v6 = vsel %vm448_vm14, %v1844_v50, %v445_v63 }
 0x230   :  { %v1850_v11 = vpop.eup %1849  ;;  %v2137_v12 = vadd.f32 1.0, %v1848_v3  ;;  %v454_v13 = vsel %vm451_vm15, %v453_v45, %v449_v6 }
 0x231   :  { %v1852_v18 = vpop.eup %1851  ;;  %1853 = vpow2.f32 %v1687_v4  ;;  %503 = vperm.xlu2 %1831, %v454_v13   ;;  %v367_v19 = vmul.f32 %v1850_v11, %v344_v57  ;;  %vm372_vm0 = vweird.f32 %v1850_v11 }
 0x232   :  { %1855 = vrcp.f32 %v2137_v12  ;;  %v348_v20 = vadd.f32 1.0, %v1852_v18  ;;  %v302_v51 = vpop.permute.xlu0 %301  ;;  %vm373_vm3 = vmor %vm371_vm1, %vm372_vm0  ;;  %vm386_vm11 = vweird.f32 %v2137_v12  ;;  %v392_v63 = vand.u32 2147483648, %v2137_v12 }
 0x233   :  { %v318_v25 = vadd.f32 %v302_v51, %v2130_v53  ;;  %v368_v26 = vsub.f32 1.0, %v367_v19  ;;  %v390_v3 = vand.u32 2147483647, %v2137_v12 }
 0x234   :  { %1857 = vrcp.f32 %v348_v20  ;;  %v437_v47 = vand.u32 2147483648, %v348_v20  ;;  %v435_v40 = vand.u32 2147483647, %v348_v20  ;;  %vm431_vm6 = vweird.f32 %v348_v20 }
 0x235   :  { %v1691_v28 = vmul.f32 -1.442695, %v318_v25  ;;  %v369_v29 = vmul.f32 %v1850_v11, %v368_v26  ;;  %vm391_vm0 = vcmp.eq.f32.partialorder %v390_v3, 8.507059e+37 }
 0x236   :  { %v438_v55 = vor.u32 1.1754944e-38, %v437_v47  ;;  %vm436_vm8 = vcmp.eq.f32.partialorder %v435_v40, 8.507059e+37 }
 0x237   :  { %v1854_v31 = vpop.eup %1853  ;;  %1859 = vpow2.f32 %v1691_v28  ;;  %v370_v32 = vadd.f32 %v1850_v11, %v369_v29 }
 0x238   :  { %v2141_v33 = vpop.eup %1855  ;;  %v346_v34 = vadd.f32 1.0, %v1854_v31 }
 0x239   :  { %v374_v36 = vsel %vm373_vm3, %v1850_v11, %v370_v32  ;;  %v382_v53 = vmul.f32 %v2141_v33, %v2137_v12  ;;  %vm387_vm9 = vweird.f32 %v2141_v33 }
 0x23a   :  { %v1858_v37 = vpop.eup %1857  ;;  %1861 = vrcp.f32 %v346_v34  ;;  %v379_v38 = vsel %vm376_vm4, %v378_v35, %v374_v36  ;;  %v407_v59 = vand.u32 2147483648, %v346_v34  ;;  %v405_v62 = vand.u32 2147483647, %v346_v34  ;;  %vm2150_vm12 = vmor %vm386_vm11, %vm387_vm9 }
 0x23b   :  { %478 = vperm.xlu1 %1830, %v379_v38   ;;  %v427_v39 = vmul.f32 %v1858_v37, %v348_v20  ;;  %v383_v43 = vsub.f32 1.0, %v382_v53  ;;  %vm432_vm5 = vweird.f32 %v1858_v37  ;;  %vm401_vm13 = vweird.f32 %v346_v34 }
 0x23c   :  { %vm433_vm7 = vmor %vm431_vm6, %vm432_vm5  ;;  %v408_v11 = vor.u32 1.1754944e-38, %v407_v59  ;;  %vm406_vm15 = vcmp.eq.f32.partialorder %v405_v62, 8.507059e+37  ;;  %v393_v20 = vor.u32 1.1754944e-38, %v392_v63  ;;  %vm603_vm6 = vcmask 1040384  }
 0x23d   :  { %v1860_v41 = vpop.eup %1859  ;;  %v428_v42 = vsub.f32 1.0, %v427_v39  ;;  %v384_v52 = vmul.f32 %v2141_v33, %v383_v43 }
 0x23e   :  { %v350_v44 = vadd.f32 1.0, %v1860_v41 }
 0x23f   :  { %v429_v48 = vmul.f32 %v1858_v37, %v428_v42  ;;  %v385_v60 = vadd.f32 %v2141_v33, %v384_v52 }
 0x240   :  { %v1862_v49 = vpop.eup %1861  ;;  %1863 = vrcp.f32 %v350_v44  ;;  %v467_v25 = vand.u32 2147483648, %v350_v44  ;;  %v465_v12 = vand.u32 2147483647, %v350_v44  ;;  %vm461_vm3 = vweird.f32 %v350_v44 }
 0x241   :  { %v430_v50 = vadd.f32 %v1858_v37, %v429_v48  ;;  %v397_v54 = vmul.f32 %v1862_v49, %v346_v34  ;;  %vm402_vm10 = vweird.f32 %v1862_v49  ;;  %v389_v13 = vsel %vm2150_vm12, %v2141_v33, %v385_v60 }
 0x242   :  { %vm403_vm14 = vmor %vm401_vm13, %vm402_vm10  ;;  %v394_v27 = vsel %vm391_vm0, %v393_v20, %v389_v13  ;;  %v468_v29 = vor.u32 1.1754944e-38, %v467_v25  ;;  %vm466_vm5 = vcmp.eq.f32.partialorder %v465_v12, 8.507059e+37 }
 0x243   :  { %v434_v56 = vsel %vm433_vm7, %v1858_v37, %v430_v50  ;;  %v398_v57 = vsub.f32 1.0, %v397_v54  ;;  %vm608_vm7 = vcmask 1042432  }
 0x244   :  { %v439_v58 = vsel %vm436_vm8, %v438_v55, %v434_v56 }
 0x245   :  { %498 = vperm.xlu0 %1832, %v439_v58   ;;  %v399_v61 = vmul.f32 %v1862_v49, %v398_v57 }
 0x246   :  { %v1864_v46 = vpop.eup %1863 }
 0x247   :  { %v400_v4 = vadd.f32 %v1862_v49, %v399_v61  ;;  %v457_v6 = vmul.f32 %v1864_v46, %v350_v44  ;;  %vm462_vm1 = vweird.f32 %v1864_v46 }
 0x248   :  { %vm463_vm4 = vmor %vm461_vm3, %vm462_vm1 }
 0x249   :  { %v404_v18 = vsel %vm403_vm14, %v1862_v49, %v400_v4  ;;  %v458_v19 = vsub.f32 1.0, %v457_v6 }
 0x24a   :  { %v409_v51 = vsel %vm406_vm15, %v408_v11, %v404_v18 }
 0x24b   :  { %488 = vperm.xlu2 %1831, %v409_v51   ;;  %v459_v26 = vmul.f32 %v1864_v46, %v458_v19 }
 0x24d   :  { %483 = vperm.xlu0 %1832, %v394_v27   ;;  %v460_v28 = vadd.f32 %v1864_v46, %v459_v26 }
 0x24f   :  { %v464_v30 = vsel %vm463_vm4, %v1864_v46, %v460_v28 }
 0x250   :  { %v469_v31 = vsel %vm466_vm5, %v468_v29, %v464_v30 }
 0x251   :  { %508 = vperm.xlu1 %1830, %v469_v31  }
 0x277   :  { %v474_v32 = vpop.permute.xlu2 %473 }
 0x278   :  { %v2171_v42 = vmul.f32 %v474_v32, %v2043_v23  ;;  %v2174_v43 = vmul.f32 %v474_v32, %v2048_v24 }
 0x27a   :  { %3466 = vst [vmem:[#allocation9_spill] sm:$0xff] %v2171_v42 }
 0x27b   :  { %3467 = vst [vmem:[#allocation10_spill] sm:$0xff] %v2174_v43 }
 0x28b   :  { %v504_v34 = vpop.permute.xlu2 %503 }
 0x28c   :  { %v2177_v44 = vmul.f32 %v504_v34, %v1991_v9 }
 0x28e   :  { %3468 = vst [vmem:[#allocation11_spill] sm:$0xff] %v2177_v44 }
 0x297   :  { %v494_v33 = vpop.permute.xlu1 %493 }
 0x2a5   :  { %v489_v53 = vpop.permute.xlu2 %488 }
 0x2a6   :  { %v2192_v23 = vmul.f32 %v489_v53, %v1960_v1 }
 0x2a8   :  { %3473 = vst [vmem:[#allocation16_spill] sm:$0xff] %v2192_v23 }
 0x2ad   :  { %v479_v36 = vpop.permute.xlu1 %478 }
 0x2ae   :  { %v2159_v37 = vmul.f32 %v479_v36, %v2007_v14  ;;  %v2162_v38 = vmul.f32 %v479_v36, %v2012_v15  ;;  %v2180_v14 = vmul.f32 %v504_v34, %v1996_v10  ;;  %v2183_v15 = vmul.f32 %v494_v33, %v2033_v21 }
 0x2b0   :  { %3462 = vst [vmem:[#allocation5_spill] sm:$0xff] %v2159_v37  ;;  %v527_v9 = vadd.f32 %v2159_v37, %v2171_v42  ;;  %v536_v10 = vadd.f32 %v2162_v38, %v2174_v43  ;;  %v577_v1 = vmax.f32 %v2162_v38, %v2192_v23  ;;  %v585_v50 = vmax.f32 %v2183_v15, %v2177_v44 }
 0x2b1   :  { %3463 = vst [vmem:[#allocation6_spill] sm:$0xff] %v2162_v38 }
 0x2b2   :  { %3469 = vst [vmem:[#allocation12_spill] sm:$0xff] %v2180_v14 }
 0x2b3   :  { %3470 = vst [vmem:[#allocation13_spill] sm:$0xff] %v2183_v15 }
 0x2b7   :  { %v499_v35 = vpop.permute.xlu0 %498 }
 0x2b8   :  { %v2165_v39 = vmul.f32 %v499_v35, %v2017_v16  ;;  %v2168_v41 = vmul.f32 %v499_v35, %v2022_v17  ;;  %v2186_v16 = vmul.f32 %v494_v33, %v2038_v22  ;;  %v2189_v17 = vmul.f32 %v489_v53, %v1955_v0 }
 0x2ba   :  { %3464 = vst [vmem:[#allocation7_spill] sm:$0xff] %v2165_v39  ;;  %v568_v0 = vmax.f32 %v2159_v37, %v2189_v17  ;;  %v547_v22 = vadd.f32 %v2165_v39, %v2183_v15  ;;  %v556_v48 = vadd.f32 %v2168_v41, %v2186_v16  ;;  %v594_v52 = vmax.f32 %v2186_v16, %v2180_v14 }
 0x2bb   :  { %3465 = vst [vmem:[#allocation8_spill] sm:$0xff] %v2168_v41 }
 0x2bc   :  { %3471 = vst [vmem:[#allocation14_spill] sm:$0xff] %v2186_v16  ;;  %v548_v59 = vadd.f32 %v547_v22, %v2177_v44  ;;  %v557_v60 = vadd.f32 %v556_v48, %v2180_v14 }
 0x2bd   :  { %3472 = vst [vmem:[#allocation15_spill] sm:$0xff] %v2189_v17 }
 0x2bf   :  { %v484_v24 = vpop.permute.xlu0 %483 }
 0x2c0   :  { %v2199_v47 = vmul.f32 %v484_v24, %v1965_v2  ;;  %v2202_v21 = vmul.f32 %v484_v24, %v1974_v5 }
 0x2c2   :  { %3474 = vst [vmem:[#allocation17_spill] sm:$0xff] %v2199_v47  ;;  %v528_v40 = vadd.f32 %v527_v9, %v2199_v47  ;;  %v537_v2 = vadd.f32 %v536_v10, %v2202_v21  ;;  %v567_v5 = vmax.f32 %v2171_v42, %v2199_v47  ;;  %v576_v49 = vmax.f32 %v2174_v43, %v2202_v21 }
 0x2c3   :  { %3475 = vst [vmem:[#allocation18_spill] sm:$0xff] %v2202_v21  ;;  %v509_v54 = vpop.permute.xlu1 %508 }
 0x2c4   :  { %v529_v55 = vadd.f32 %v528_v40, %v2189_v17  ;;  %v538_v56 = vadd.f32 %v537_v2, %v2192_v23  ;;  %v569_v57 = vmax.f32 %v567_v5, %v568_v0  ;;  %v578_v58 = vmax.f32 %v576_v49, %v577_v1 }
 0x2c5   :  { %v2227_v61 = vmul.f32 %v509_v54, %v1981_v7  ;;  %v2230_v62 = vmul.f32 %v509_v54, %v1986_v8 }
 0x2c6   :  { %v530_v46 = vrot.slane %v529_v55, 4  ;;  %v539_v63 = vrot.slane %v538_v56, 4  ;;  %v570_v45 = vrot.slane %v569_v57, 4  ;;  %v579_v3 = vrot.slane %v578_v58, 4 }
 0x2c7   :  { %3476 = vst [vmem:[#allocation19_spill] sm:$0xff] %v2227_v61  ;;  %v549_v4 = vadd.f32 %v548_v59, %v2227_v61  ;;  %v558_v6 = vadd.f32 %v557_v60, %v2230_v62  ;;  %v586_v11 = vmax.f32 %v2165_v39, %v2227_v61  ;;  %v595_v13 = vmax.f32 %v2168_v41, %v2230_v62 }
 0x2c8   :  { %3477 = vst [vmem:[#allocation20_spill] sm:$0xff] %v2230_v62  ;;  %v531_v18 = vadd.f32 %v530_v46, %v529_v55  ;;  %v540_v7 = vadd.f32 %v539_v63, %v538_v56  ;;  %v571_v19 = vmax.f32 %v569_v57, %v570_v45  ;;  %v580_v20 = vmax.f32 %v578_v58, %v579_v3 }
 0x2c9   :  { %v550_v8 = vrot.slane %v549_v4, 4  ;;  %v559_v51 = vrot.slane %v558_v6, 4  ;;  %v587_v25 = vmax.f32 %v585_v50, %v586_v11  ;;  %v596_v26 = vmax.f32 %v594_v52, %v595_v13 }
 0x2ca   :  { %v532_v12 = vrot.slane %v531_v18, 2  ;;  %v541_v27 = vrot.slane %v540_v7, 2  ;;  %v572_v28 = vrot.slane %v571_v19, 2  ;;  %v581_v29 = vrot.slane %v580_v20, 2 }
 0x2cb   :  { %v551_v30 = vadd.f32 %v550_v8, %v549_v4  ;;  %v560_v31 = vadd.f32 %v559_v51, %v558_v6  ;;  %v588_v32 = vrot.slane %v587_v25, 4  ;;  %v597_v33 = vrot.slane %v596_v26, 4 }
 0x2cc   :  { %v533_v34 = vadd.f32 %v532_v12, %v531_v18  ;;  %v542_v35 = vadd.f32 %v541_v27, %v540_v7  ;;  %v573_v1 = vmax.f32 %v571_v19, %v572_v28  ;;  %v582_v22 = vmax.f32 %v580_v20, %v581_v29 }
 0x2cd   :  { %v552_v36 = vrot.slane %v551_v30, 2  ;;  %v561_v53 = vrot.slane %v560_v31, 2  ;;  %v589_v24 = vmax.f32 %v587_v25, %v588_v32  ;;  %v598_v9 = vmax.f32 %v596_v26, %v597_v33 }
 0x2ce   :  { %v534_v10 = vrot.slane %v533_v34, 1  ;;  %v543_v0 = vrot.slane %v542_v35, 1  ;;  %v574_v57 = vrot.slane %v573_v1, 1  ;;  %v583_v58 = vrot.slane %v582_v22, 1 }
 0x2cf   :  { %v553_v48 = vadd.f32 %v552_v36, %v551_v30  ;;  %v562_v40 = vadd.f32 %v561_v53, %v560_v31  ;;  %v590_v2 = vrot.slane %v589_v24, 2  ;;  %v599_v5 = vrot.slane %v598_v9, 2  ;;  %v637_v30 = vld [vmem:[%s3436_s1] ss:$8 sm:$0x3] }
 0x2d0   :  { %v535_v49 = vadd.f32 %v534_v10, %v533_v34  ;;  %v544_v50 = vadd.f32 %v543_v0, %v542_v35  ;;  %v575_v11 = vmax.f32 %v573_v1, %v574_v57  ;;  %v584_v13 = vmax.f32 %v582_v22, %v583_v58 }
 0x2d1   :  { %v554_v52 = vrot.slane %v553_v48, 1  ;;  %v563_v54 = vrot.slane %v562_v40, 1  ;;  %v591_v55 = vmax.f32 %v589_v24, %v590_v2  ;;  %v600_v56 = vmax.f32 %v598_v9, %v599_v5 }
 0x2d2   :  { %v545_v45 = vmul.f32 0.03125, %v535_v49  ;;  %v546_v3 = vmul.f32 0.03125, %v544_v50  ;;  %v611_v28 = vlaneseq  ;;  %v639_v31 = vperm.slane %v637_v30, 0 }
 0x2d3   :  { %v555_v59 = vadd.f32 %v554_v52, %v553_v48  ;;  %v564_v60 = vadd.f32 %v563_v54, %v562_v40  ;;  %v592_v46 = vrot.slane %v591_v55, 1  ;;  %v601_v63 = vrot.slane %v600_v56, 1  ;;  %v1713_v52 = vld [vmem:[%s3436_s1 + $0x1] ss:$8 sm:$0x3] }
 0x2d4   :  { %v2283_v29 = vand.u32 127, %v611_v28  ;;  %v640_v32 = vperm.slane %v637_v30, 1  ;;  %v802_v54 = vperm.slane %v1713_v52, 0  ;;  %v685_v62 = vstv %s2491_s25  ;;  %s2869_s25 = sld [smem:[#allocation2 + $0x46]] }
 0x2d5   :  { %v565_v4 = vmul.f32 0.03125, %v555_v59  ;;  %v566_v6 = vmul.f32 0.03125, %v564_v60  ;;  %v593_v18 = vmax.f32 %v591_v55, %v592_v46  ;;  %v602_v7 = vmax.f32 %v600_v56, %v601_v63 }
 0x2d6   :  { %vm649_vm8 = vcmp.lt.s32.totalorder %v2283_v29, 3  ;;  %vm796_vm9 = vcmp.lt.s32.totalorder %v2283_v29, 32  ;;  %vm695_vm10 = vcmp.lt.s32.totalorder %v2283_v29, 1  ;;  %v803_v55 = vperm.slane %v1713_v52, 1 }
 0x2d7   :  { %v604_v19 = vsel %vm603_vm6, %v545_v45, %v565_v4  ;;  %v605_v20 = vsel %vm603_vm6, %v546_v3, %v566_v6  ;;  %vm1415_vm11 = vcmp.lt.s32.totalorder %v2283_v29, 80  ;;  %vm672_vm12 = vcmp.lt.s32.totalorder %v2283_v29, 2 }
 0x2d8   :  { %v606_v8 = vsel %vm214_vm2, %v604_v19, %v575_v11  ;;  %v607_v51 = vsel %vm214_vm2, %v605_v20, %v584_v13  ;;  %vm634_vm2 = vcmp.lt.s32.totalorder %v2283_v29, 48  ;;  %vm923_vm13 = vcmp.lt.s32.totalorder %v2283_v29, 16 }
 0x2d9   :  { %v2240_v25 = vsel %vm608_vm7, %v606_v8, %v593_v18  ;;  %v2242_v26 = vsel %vm608_vm7, %v607_v51, %v602_v7  ;;  %v1728_v7 = vld [vmem:[%s3436_s1 + $0x2] ss:$8 sm:$0x3]  ;;  %vm727_vm14 = vcmp.lt.s32.totalorder %v2283_v29, 127  ;;  %vm750_vm15 = vcmp.lt.s32.totalorder %v2283_v29, 126 }
 0x2da   :  { %630 = vrot.lane.b32.xlu2 %v2242_v26, %s1898_s5  ;;  %792 = vrot.lane.b32.xlu1 %v2240_v25, %s1899_s29  ;;  %v930_v19 = vperm.slane %v1728_v7, 1  ;;  %vm1161_vm0 = vcmp.lt.s32.totalorder %v2283_v29, 112  ;;  %vm1288_vm1 = vcmp.lt.s32.totalorder %v2283_v29, 96  ;;  %vm773_vm4 = vcmp.lt.s32.totalorder %v2283_v29, 125 }
 0x2db   :  { %628 = vrot.lane.b32.xlu0 %v2240_v25, %s1898_s5  ;;  %s2503_s5 = sld [smem:[#allocation2 + $0x33]] }
 0x2e2   :  { %921 = vrot.lane.b32.xlu2 %v2242_v26, %s1900_s30  ;;  %1284 = vrot.lane.b32.xlu1 %v2240_v25, %s1901_s8 }
 0x2e3   :  { %794 = vrot.lane.b32.xlu0 %v2242_v26, %s1899_s29  ;;  %s2901_s29 = sld [smem:[#allocation2 + $0x48]] }
 0x2ea   :  { %1159 = vrot.lane.b32.xlu2 %v2242_v26, %s1902_s9  ;;  %1048 = vrot.lane.b32.xlu1 %v2242_v26, %s1903_s10 }
 0x2eb   :  { %919 = vrot.lane.b32.xlu0 %v2240_v25, %s1900_s30  ;;  %s2727_s30 = sld [smem:[#allocation2 + $0x3b]] }
 0x2f2   :  { %1046 = vrot.lane.b32.xlu2 %v2240_v25, %s1903_s10  ;;  %1063 = vrot.lane.b32.xlu1 %v2240_v25, %s1904_s0 }
 0x2f3   :  { %1157 = vrot.lane.b32.xlu0 %v2240_v25, %s1902_s9  ;;  %s1719_s9 = sld [smem:[#allocation2 + $0x3a]] }
 0x2fa   :  { %1413 = vrot.lane.b32.xlu2 %v2242_v26, %s1905_s11  ;;  %1082 = vrot.lane.b32.xlu1 %v2242_v26, %s1906_s2 }
 0x2fb   :  { %1286 = vrot.lane.b32.xlu0 %v2242_v26, %s1901_s8  ;;  %s1718_s8 = sld [smem:[#allocation2 + $0x9]] }
 0x302   :  { %1080 = vrot.lane.b32.xlu2 %v2240_v25, %s1906_s2  ;;  %1123 = vrot.lane.b32.xlu1 %v2240_v25, %s1907_s12 }
 0x303   :  { %1411 = vrot.lane.b32.xlu0 %v2240_v25, %s1905_s11  ;;  %s2737_s11 = sld [smem:[#allocation2 + $0xb]] }
 0x30a   :  { %1108 = vrot.lane.b32.xlu2 %v2242_v26, %s1897_s28  ;;  %1142 = vrot.lane.b32.xlu1 %v2242_v26, %s1908_s13 }
 0x30b   :  { %1065 = vrot.lane.b32.xlu0 %v2242_v26, %s1904_s0 }
 0x312   :  { %1140 = vrot.lane.b32.xlu2 %v2240_v25, %s1908_s13 }
 0x313   :  { %1106 = vrot.lane.b32.xlu0 %v2240_v25, %s1897_s28 }
 0x31b   :  { %1125 = vrot.lane.b32.xlu0 %v2242_v26, %s1907_s12 }
 0x334   :  { %v631_v12 = vpop.permute.xlu2 %630 }
 0x33c   :  { %v2280_v27 = vpop.permute.xlu2 %921 }
 0x344   :  { %v2289_v35 = vpop.permute.xlu2 %1159 }
 0x34c   :  { %v793_v33 = vpop.permute.xlu1 %792  ;;  %v1047_v1 = vpop.permute.xlu2 %1046 }
 0x34d   :  { %v629_v34 = vpop.permute.xlu0 %628 }
 0x34e   :  { %v635_v36 = vsel %vm634_vm2, %v629_v34, %v631_v12  ;;  %v636_v53 = vsel %vm634_vm2, %v631_v12, %v629_v34 }
 0x34f   :  { %v2291_v24 = vmul.f32 %v639_v31, %v636_v53  ;;  %v2293_v9 = vmul.f32 %v640_v32, %v635_v36  ;;  %v929_v32 = vperm.slane %v1728_v7, 0 }
 0x351   :  { %668 = vrot.lane.b32.xlu2 %v2291_v24, %s1904_s0  ;;  %645 = vrot.lane.b32.xlu1 %v2291_v24, %s1903_s10 }
 0x352   :  { %647 = vrot.lane.b32.xlu0 %v2293_v9, %s1903_s10 }
 0x354   :  { %v2301_v10 = vpop.permute.xlu1 %1284  ;;  %v2322_v5 = vpop.permute.xlu2 %1413 }
 0x355   :  { %v795_v0 = vpop.permute.xlu0 %794 }
 0x356   :  { %v797_v56 = vsel %vm796_vm9, %v793_v33, %v795_v0  ;;  %v798_v57 = vsel %vm796_vm9, %v795_v0, %v793_v33 }
 0x357   :  { %v2349_v45 = vmul.f32 %v802_v54, %v798_v57  ;;  %v2351_v3 = vmul.f32 %v803_v55, %v797_v56 }
 0x359   :  { %693 = vrot.lane.b32.xlu2 %v2293_v9, %s1906_s2  ;;  %670 = vrot.lane.b32.xlu1 %v2293_v9, %s1904_s0 }
 0x35a   :  { %691 = vrot.lane.b32.xlu0 %v2291_v24, %s1906_s2 }
 0x35c   :  { %v1049_v22 = vpop.permute.xlu1 %1048  ;;  %v1081_v58 = vpop.permute.xlu2 %1080 }
 0x35d   :  { %v2312_v48 = vsel %vm649_vm8, %v1047_v1, %v1049_v22  ;;  %v2316_v40 = vsel %vm649_vm8, %v1049_v22, %v1047_v1  ;;  %v920_v2 = vpop.permute.xlu0 %919 }
 0x35e   :  { %v924_v20 = vsel %vm923_vm13, %v920_v2, %v2280_v27  ;;  %v925_v33 = vsel %vm923_vm13, %v2280_v27, %v920_v2  ;;  %v1757_v27 = vld [vmem:[%s3436_s1 + $0x4] ss:$8 sm:$0x3] }
 0x35f   :  { %v2403_v31 = vmul.f32 %v930_v19, %v924_v20  ;;  %v2421_v1 = vmul.f32 %v929_v32, %v925_v33  ;;  %v1167_v2 = vperm.slane %v1757_v27, 0  ;;  %v1168_v54 = vperm.slane %v1757_v27, 1 }
 0x361   :  { %746 = vrot.lane.b32.xlu2 %v2291_v24, %s1907_s12  ;;  %723 = vrot.lane.b32.xlu1 %v2291_v24, %s1897_s28 }
 0x362   :  { %725 = vrot.lane.b32.xlu0 %v2293_v9, %s1897_s28 }
 0x364   :  { %v1064_v49 = vpop.permute.xlu1 %1063  ;;  %v1109_v8 = vpop.permute.xlu2 %1108 }
 0x365   :  { %v2326_v50 = vpop.permute.xlu0 %1157 }
 0x366   :  { %v1163_v56 = vsel %vm1161_vm0, %v2289_v35, %v2326_v50 }
 0x367   :  { %v2461_v57 = vmul.f32 %v1168_v54, %v1163_v56  ;;  %v717_v54 = vstv %s2483_s21  ;;  %v661_v56 = vstv %s2485_s22  ;;  %s2631_s21 = sld [smem:[#allocation2 + $0x7]] }
 0x368   :  { %s2849_s22 = sld [smem:[#allocation2 + $0x12]] }
 0x369   :  { %771 = vrot.lane.b32.xlu2 %v2293_v9, %s1908_s13  ;;  %748 = vrot.lane.b32.xlu1 %v2293_v9, %s1907_s12 }
 0x36a   :  { %769 = vrot.lane.b32.xlu0 %v2291_v24, %s1908_s13 }
 0x36c   :  { %v1083_v59 = vpop.permute.xlu1 %1082  ;;  %v2445_v22 = vpop.permute.xlu2 %1140 }
 0x36d   :  { %v2341_v60 = vsel %vm695_vm10, %v1081_v58, %v1083_v59  ;;  %v2345_v46 = vsel %vm695_vm10, %v1083_v59, %v1081_v58  ;;  %v2347_v63 = vpop.permute.xlu0 %1286  ;;  %v1772_v59 = vld [vmem:[%s3436_s1 + $0x5] ss:$8 sm:$0x3] }
 0x36e   :  { %v1294_v7 = vperm.slane %v1772_v59, 0  ;;  %v1295_v41 = vperm.slane %v1772_v59, 1 }
 0x371   :  { %808 = vrot.lane.b32.xlu2 %v2349_v45, %s1903_s10  ;;  %810 = vrot.lane.b32.xlu1 %v2351_v3, %s1903_s10 }
 0x372   :  { %825 = vrot.lane.b32.xlu0 %v2349_v45, %s1904_s0 }
 0x374   :  { %v1124_v34 = vpop.permute.xlu1 %1123 }
 0x375   :  { %v2360_v4 = vpop.permute.xlu0 %1411 }
 0x376   :  { %v2366_v6 = vsel %vm1415_vm11, %v2322_v5, %v2360_v4 }
 0x379   :  { %827 = vrot.lane.b32.xlu2 %v2351_v3, %s1904_s0  ;;  %842 = vrot.lane.b32.xlu1 %v2349_v45, %s1906_s2 }
 0x37a   :  { %868 = vrot.lane.b32.xlu0 %v2349_v45, %s1897_s28 }
 0x37d   :  { %v1066_v11 = vpop.permute.xlu0 %1065 }
 0x37e   :  { %v2377_v13 = vsel %vm672_vm12, %v1064_v49, %v1066_v11  ;;  %v2381_v18 = vsel %vm672_vm12, %v1066_v11, %v1064_v49  ;;  %v1162_v49 = vsel %vm1161_vm0, %v2326_v50, %v2289_v35  ;;  %v2479_v35 = vpop.permute.xlu1 %1142  ;;  %v2506_v11 = vshrl.u32 %v611_v28, 7 }
 0x37f   :  { %v2449_v52 = vmul.f32 %v1167_v2, %v1162_v49  ;;  %v1289_v28 = vsel %vm1288_vm1, %v2301_v10, %v2347_v63  ;;  %v1693_v2 = vld [vmem:[%s3436_s1 + $0x10] ss:$8 sm:$0x3]  ;;  %v716_v49 = vstv %s2477_s20  ;;  %s2611_s20 = sld [smem:[#allocation2 + $0x37]] }
 0x380   :  { %vm613_vm3 = vcmp.lt.s32.totalorder %v2506_v11, 2  ;;  %v2529_v27 = vmul.f32 %v1294_v7, %v1289_v28  ;;  %v707_v7 = vstv %s2496_s27  ;;  %v708_v28 = vstv %s2503_s5  ;;  %s2651_s27 = sld [smem:[#allocation2 + $0x39]] }
 0x381   :  { %870 = vrot.lane.b32.xlu2 %v2351_v3, %s1897_s28  ;;  %844 = vrot.lane.b32.xlu1 %v2351_v3, %s1906_s2  ;;  %v2556_v39 = vperm.slane %v1693_v2, 0  ;;  %v2558_v16 = vperm.slane %v1693_v2, 1  ;;  %v718_v38 = vsel %vm613_vm3, %v716_v49, %v717_v54  ;;  %s2897_s5 = sld [smem:[#allocation2 + $0x17]] }
 0x382   :  { %887 = vrot.lane.b32.xlu0 %v2351_v3, %s1907_s12 }
 0x385   :  { %v1107_v51 = vpop.permute.xlu0 %1106 }
 0x386   :  { %v2397_v12 = vsel %vm727_vm14, %v1107_v51, %v1109_v8  ;;  %v2401_v30 = vsel %vm727_vm14, %v1109_v8, %v1107_v51  ;;  %v1692_v8 = vld [vmem:[%s3436_s1 + $0x7] ss:$8 sm:$0x3] }
 0x387   :  { %v2542_v61 = vperm.slane %v1692_v8, 1 }
 0x389   :  { %902 = vrot.lane.b32.xlu2 %v2349_v45, %s1908_s13  ;;  %885 = vrot.lane.b32.xlu1 %v2349_v45, %s1907_s12 }
 0x38a   :  { %937 = vrot.lane.b32.xlu0 %v2403_v31, %s1903_s10 }
 0x38d   :  { %v1126_v36 = vpop.permute.xlu0 %1125 }
 0x38e   :  { %v2415_v53 = vsel %vm750_vm15, %v1124_v34, %v1126_v36  ;;  %v2419_v0 = vsel %vm750_vm15, %v1126_v36, %v1124_v34  ;;  %v1694_v34 = vld [vmem:[%s3436_s1 + $0x11] ss:$8 sm:$0x3]  ;;  %v2527_v36 = vperm.slane %v1692_v8, 0  ;;  %v1290_v8 = vsel %vm1288_vm1, %v2347_v63, %v2301_v10 }
 0x38f   :  { %v2544_v14 = vperm.slane %v1694_v34, 0  ;;  %v2554_v44 = vperm.slane %v1694_v34, 1  ;;  %v709_v63 = vsel %vm613_vm3, %v707_v7, %v708_v28 }
 0x391   :  { %904 = vrot.lane.b32.xlu1 %v2351_v3, %s1908_s13  ;;  %952 = vrot.lane.b32.xlu2 %v2421_v1, %s1904_s0 }
 0x392   :  { %971 = vrot.lane.b32.xlu0 %v2403_v31, %s1906_s2 }
 0x399   :  { %935 = vrot.lane.b32.xlu1 %v2421_v1, %s1903_s10  ;;  %954 = vrot.lane.b32.xlu2 %v2403_v31, %s1904_s0 }
 0x39a   :  { %1012 = vrot.lane.b32.xlu0 %v2421_v1, %s1907_s12 }
 0x3a1   :  { %969 = vrot.lane.b32.xlu1 %v2421_v1, %s1906_s2  ;;  %995 = vrot.lane.b32.xlu2 %v2421_v1, %s1897_s28 }
 0x3a2   :  { %1031 = vrot.lane.b32.xlu0 %v2403_v31, %s1908_s13 }
 0x3a9   :  { %997 = vrot.lane.b32.xlu1 %v2403_v31, %s1897_s28  ;;  %1014 = vrot.lane.b32.xlu2 %v2403_v31, %s1907_s12 }
 0x3aa   :  { %1173 = vrot.lane.b32.xlu0 %v2449_v52, %s1903_s10 }
 0x3ab   :  { %v2457_v55 = vpop.permute.xlu2 %668 }
 0x3b1   :  { %1029 = vrot.lane.b32.xlu1 %v2421_v1, %s1908_s13  ;;  %1175 = vrot.lane.b32.xlu2 %v2461_v57, %s1903_s10 }
 0x3b2   :  { %1192 = vrot.lane.b32.xlu0 %v2461_v57, %s1904_s0 }
 0x3b3   :  { %v2469_v58 = vpop.permute.xlu2 %693 }
 0x3b9   :  { %1207 = vrot.lane.b32.xlu2 %v2449_v52, %s1906_s2  ;;  %1190 = vrot.lane.b32.xlu1 %v2449_v52, %s1904_s0 }
 0x3ba   :  { %1233 = vrot.lane.b32.xlu0 %v2449_v52, %s1897_s28 }
 0x3bb   :  { %v2481_v50 = vpop.permute.xlu2 %746 }
 0x3c1   :  { %1235 = vrot.lane.b32.xlu2 %v2461_v57, %s1897_s28  ;;  %1209 = vrot.lane.b32.xlu1 %v2461_v57, %s1906_s2 }
 0x3c2   :  { %1252 = vrot.lane.b32.xlu0 %v2461_v57, %s1907_s12 }
 0x3c3   :  { %v646_v19 = vpop.permute.xlu1 %645  ;;  %v2510_v20 = vpop.permute.xlu2 %771 }
 0x3c4   :  { %v648_v51 = vpop.permute.xlu0 %647 }
 0x3c5   :  { %v650_v32 = vsel %vm649_vm8, %v646_v19, %v648_v51  ;;  %v651_v33 = vsel %vm649_vm8, %v648_v51, %v646_v19  ;;  %v662_v19 = vstv %s2487_s23  ;;  %v684_v51 = vstv %s2489_s24  ;;  %s2636_s24 = sld [smem:[#allocation2 + $0x38]] }
 0x3c6   :  { %v663_v15 = vsel %vm613_vm3, %v661_v56, %v662_v19  ;;  %v657_v23 = vmul.f32 %v2527_v36, %v651_v33  ;;  %v658_v34 = vmul.f32 %v2542_v61, %v650_v32  ;;  %v686_v2 = vsel %vm613_vm3, %v684_v51, %v685_v62  ;;  %s2861_s23 = sld [smem:[#allocation2 + $0x43]] }
 0x3c7   :  { %v2590_v51 = vmul.f32 %v1295_v41, %v1290_v8  ;;  %v1695_v41 = vld [vmem:[%s3436_s1 + $0x13] ss:$8 sm:$0x3] }
 0x3c8   :  { %v664_v28 = vmul.f32 %v663_v15, %v657_v23 }
 0x3c9   :  { %1267 = vrot.lane.b32.xlu2 %v2449_v52, %s1908_s13  ;;  %1250 = vrot.lane.b32.xlu1 %v2449_v52, %s1907_s12 }
 0x3ca   :  { %1300 = vrot.lane.b32.xlu0 %v2529_v27, %s1903_s10 }
 0x3cb   :  { %v671_v59 = vpop.permute.xlu1 %670  ;;  %v2570_v17 = vpop.permute.xlu2 %808 }
 0x3cc   :  { %v673_v21 = vsel %vm672_vm12, %v2457_v55, %v671_v59  ;;  %v674_v10 = vsel %vm672_vm12, %v671_v59, %v2457_v55  ;;  %v692_v33 = vpop.permute.xlu0 %691  ;;  %v665_v59 = vmul.f32 %v663_v15, %v658_v34  ;;  %v740_v15 = vstv %s2552_s15  ;;  %s2752_s15 = sld [smem:[#allocation2 + $0x3d]] }
 0x3cd   :  { %v680_v32 = vmul.f32 %v2556_v39, %v674_v10  ;;  %v681_v56 = vmul.f32 %v2558_v16, %v673_v21  ;;  %v696_v62 = vsel %vm695_vm10, %v692_v33, %v2469_v58  ;;  %v697_v19 = vsel %vm695_vm10, %v2469_v58, %v692_v33 }
 0x3ce   :  { %v703_v55 = vmul.f32 %v2544_v14, %v697_v19  ;;  %v704_v7 = vmul.f32 %v2554_v44, %v696_v62  ;;  %v739_v58 = vstv %s2540_s4  ;;  %s2746_s4 = sld [smem:[#allocation2 + $0xc]] }
 0x3cf   :  { %v687_v21 = vmul.f32 %v686_v2, %v680_v32  ;;  %v688_v10 = vmul.f32 %v686_v2, %v681_v56  ;;  %v719_v2 = vmul.f32 %v718_v38, %v2291_v24  ;;  %v2619_v32 = vperm.slane %v1695_v41, 0 }
 0x3d0   :  { %v710_v47 = vmul.f32 %v709_v63, %v703_v55  ;;  %v711_v62 = vmul.f32 %v709_v63, %v704_v7  ;;  %v720_v63 = vmul.f32 %v718_v38, %v2293_v9  ;;  %v2621_v56 = vperm.slane %v1695_v41, 1 }
 0x3d1   :  { %v689_v8 = vadd.f32 %v687_v21, %v664_v28  ;;  %v690_v33 = vadd.f32 %v688_v10, %v665_v59  ;;  %1269 = vrot.lane.b32.xlu1 %v2461_v57, %s1908_s13  ;;  %1302 = vrot.lane.b32.xlu2 %v2590_v51, %s1903_s10  ;;  %v741_v19 = vsel %vm613_vm3, %v739_v58, %v740_v15  ;;  %v1697_v59 = vld [vmem:[%s3436_s1 + $0x15] ss:$8 sm:$0x3]  ;;  %v1696_v21 = vld [vmem:[%s3436_s1 + $0x14] ss:$8 sm:$0x3] }
 0x3d2   :  { %1319 = vrot.lane.b32.xlu0 %v2590_v51, %s1904_s0  ;;  %v762_v41 = vstv %s2594_s16  ;;  %s1729_s16 = sld [smem:[#allocation2 + $0xe]] }
 0x3d3   :  { %v712_v23 = vadd.f32 %v710_v47, %v689_v8  ;;  %v713_v49 = vadd.f32 %v711_v62, %v690_v33  ;;  %v724_v54 = vpop.permute.xlu1 %723  ;;  %v2615_v34 = vpop.permute.xlu2 %827  ;;  %v763_v8 = vstv %s2596_s17  ;;  %v785_v33 = vstv %s2601_s18  ;;  %s1730_s17 = sld [smem:[#allocation2 + $0x3f]] }
 0x3d4   :  { %v726_v55 = vpop.permute.xlu0 %725  ;;  %v786_v62 = vstv %s2611_s20  ;;  %s2805_s18 = sld [smem:[#allocation2 + $0xf]] }
 0x3d5   :  { %v721_v7 = vadd.f32 %v719_v2, %v712_v23  ;;  %v722_v47 = vadd.f32 %v720_v63, %v713_v49  ;;  %v728_v28 = vsel %vm727_vm14, %v724_v54, %v726_v55  ;;  %v729_v38 = vsel %vm727_vm14, %v726_v55, %v724_v54  ;;  %s2839_s20 = sld [smem:[#allocation2 + $0x11]] }
 0x3d6   :  { %v735_v24 = vmul.f32 %v2619_v32, %v728_v28  ;;  %v736_v9 = vmul.f32 %v2621_v56, %v729_v38  ;;  %v2656_v49 = vperm.slane %v1697_v59, 0  ;;  %v2658_v54 = vperm.slane %v1697_v59, 1 }
 0x3d7   :  { %v2660_v2 = vperm.slane %v1696_v21, 0  ;;  %v2662_v63 = vperm.slane %v1696_v21, 1  ;;  %v764_v28 = vsel %vm613_vm3, %v762_v41, %v763_v8  ;;  %v787_v38 = vsel %vm613_vm3, %v785_v33, %v786_v62  ;;  %v1787_v33 = vld [vmem:[%s3436_s1 + $0x6] ss:$8 sm:$0x3]  ;;  %s2723_s1 = sld [smem:[#allocation2 + $0xa]] }
 0x3d8   :  { %v742_v10 = vmul.f32 %v741_v19, %v735_v24  ;;  %v743_v58 = vmul.f32 %v741_v19, %v736_v9 }
 0x3d9   :  { %1334 = vrot.lane.b32.xlu2 %v2529_v27, %s1906_s2  ;;  %1317 = vrot.lane.b32.xlu1 %v2529_v27, %s1904_s0 }
 0x3da   :  { %v744_v15 = vadd.f32 %v742_v10, %v721_v7  ;;  %v745_v23 = vadd.f32 %v743_v58, %v722_v47  ;;  %1360 = vrot.lane.b32.xlu0 %v2529_v27, %s1897_s28 }
 0x3db   :  { %v749_v19 = vpop.permute.xlu1 %748  ;;  %v2664_v55 = vpop.permute.xlu2 %870 }
 0x3dc   :  { %v751_v7 = vsel %vm750_vm15, %v2481_v50, %v749_v19  ;;  %v752_v47 = vsel %vm750_vm15, %v749_v19, %v2481_v50  ;;  %v770_v24 = vpop.permute.xlu0 %769  ;;  %v818_v19 = vstv %s2631_s21  ;;  %s2845_s21 = sld [smem:[#allocation2 + $0x42]] }
 0x3dd   :  { %v758_v9 = vmul.f32 %v2660_v2, %v751_v7  ;;  %v759_v59 = vmul.f32 %v2662_v63, %v752_v47  ;;  %v774_v21 = vsel %vm773_vm4, %v770_v24, %v2510_v20  ;;  %v775_v10 = vsel %vm773_vm4, %v2510_v20, %v770_v24 }
 0x3de   :  { %v781_v58 = vmul.f32 %v2656_v49, %v774_v21  ;;  %v782_v50 = vmul.f32 %v2658_v54, %v775_v10  ;;  %v819_v7 = vstv %s2636_s24  ;;  %v835_v47 = vstv %s2643_s6  ;;  %s2865_s24 = sld [smem:[#allocation2 + $0x15]] }
 0x3df   :  { %v765_v41 = vmul.f32 %v764_v28, %v758_v9  ;;  %v766_v8 = vmul.f32 %v764_v28, %v759_v59  ;;  %v836_v20 = vstv %s2651_s27  ;;  %v1421_v28 = vperm.slane %v1787_v33, 0  ;;  %s2889_s6 = sld [smem:[#allocation2 + $0x14]] }
 0x3e0   :  { %v788_v62 = vmul.f32 %v787_v38, %v781_v58  ;;  %v789_v42 = vmul.f32 %v787_v38, %v782_v50  ;;  %v1416_v24 = vsel %vm1415_vm11, %v2360_v4, %v2322_v5  ;;  %v820_v59 = vsel %vm613_vm3, %v818_v19, %v819_v7  ;;  %s2895_s27 = sld [smem:[#allocation2 + $0x45]] }
 0x3e1   :  { %v767_v43 = vadd.f32 %v765_v41, %v744_v15  ;;  %v768_v37 = vadd.f32 %v766_v8, %v745_v23  ;;  %1362 = vrot.lane.b32.xlu2 %v2590_v51, %s1897_s28  ;;  %1336 = vrot.lane.b32.xlu1 %v2590_v51, %s1906_s2  ;;  %v837_v58 = vsel %vm613_vm3, %v835_v47, %v836_v20 }
 0x3e2   :  { %1379 = vrot.lane.b32.xlu0 %v2590_v51, %s1907_s12 }
 0x3e3   :  { %v790_v9 = vadd.f32 %v788_v62, %v767_v43  ;;  %v791_v15 = vadd.f32 %v789_v42, %v768_v37  ;;  %v2703_v23 = vpop.permute.xlu2 %902  ;;  %v811_v38 = vpop.permute.xlu1 %810  ;;  %v2729_v62 = vmul.f32 %v1421_v28, %v1416_v24 }
 0x3e4   :  { %v812_v21 = vsel %vm649_vm8, %v2570_v17, %v811_v38  ;;  %v813_v10 = vsel %vm649_vm8, %v811_v38, %v2570_v17  ;;  %v826_v5 = vpop.permute.xlu0 %825 }
 0x3e5   :  { %v814_v37 = vmul.f32 %v813_v10, %v2527_v36  ;;  %v815_v42 = vmul.f32 %v812_v21, %v2542_v61  ;;  %v829_v43 = vsel %vm672_vm12, %v826_v5, %v2615_v34  ;;  %v830_v4 = vsel %vm672_vm12, %v2615_v34, %v826_v5  ;;  %3478 = vst [vmem:[#allocation21_spill] sm:$0xff] %v2729_v62 }
 0x3e6   :  { %v831_v17 = vmul.f32 %v830_v4, %v2556_v39  ;;  %v832_v50 = vmul.f32 %v829_v43, %v2558_v16  ;;  %v1422_v34 = vperm.slane %v1787_v33, 1  ;;  %v852_v21 = vstv %s1718_s8  ;;  %s2935_s8 = sld [smem:[#allocation2 + $0x19]] }
 0x3e7   :  { %v821_v41 = vmul.f32 %v820_v59, %v814_v37  ;;  %v822_v8 = vmul.f32 %v820_v59, %v815_v42  ;;  %v853_v10 = vstv %s1719_s9  ;;  %v862_v5 = vstv %s2727_s30  ;;  %s2907_s30 = sld [smem:[#allocation2 + $0x47]] }
 0x3e8   :  { %v838_v19 = vmul.f32 %v837_v58, %v831_v17  ;;  %v839_v20 = vmul.f32 %v837_v58, %v832_v50  ;;  %v2742_v59 = vmul.f32 %v1422_v34, %v2366_v6  ;;  %v861_v58 = vstv %s2723_s1  ;;  %s2903_s1 = sld [smem:[#allocation2 + $0x16]] }
 0x3e9   :  { %v823_v7 = vadd.f32 %v821_v41, %v790_v9  ;;  %v824_v47 = vadd.f32 %v822_v8, %v791_v15  ;;  %1394 = vrot.lane.b32.xlu2 %v2529_v27, %s1908_s13  ;;  %1377 = vrot.lane.b32.xlu1 %v2529_v27, %s1907_s12  ;;  %v854_v6 = vsel %vm613_vm3, %v852_v21, %v853_v10  ;;  %v878_v41 = vstv %s2737_s11  ;;  %s2943_s9 = sld [smem:[#allocation2 + $0x4a]] }
 0x3ea   :  { %1427 = vrot.lane.b32.xlu0 %v2729_v62, %s1903_s10  ;;  %v863_v33 = vsel %vm613_vm3, %v861_v58, %v862_v5  ;;  %v879_v8 = vstv %s1723_s14  ;;  %s2947_s11 = sld [smem:[#allocation2 + $0x1a]] }
 0x3eb   :  { %v840_v38 = vadd.f32 %v838_v19, %v823_v7  ;;  %v841_v28 = vadd.f32 %v839_v20, %v824_v47  ;;  %v843_v24 = vpop.permute.xlu1 %842  ;;  %v2739_v15 = vpop.permute.xlu2 %952  ;;  %v864_v21 = vmul.f32 %v863_v33, %v2349_v45  ;;  %v865_v10 = vmul.f32 %v863_v33, %v2351_v3  ;;  %s2955_s14 = sld [smem:[#allocation2 + $0x4b]] }
 0x3ec   :  { %v869_v9 = vpop.permute.xlu0 %868 }
 0x3ed   :  { %v872_v42 = vsel %vm727_vm14, %v869_v9, %v2664_v55  ;;  %v873_v43 = vsel %vm727_vm14, %v2664_v55, %v869_v9 }
 0x3ee   :  { %v874_v47 = vmul.f32 %v872_v42, %v2619_v32  ;;  %v875_v20 = vmul.f32 %v873_v43, %v2621_v56  ;;  %v896_v42 = vstv %s2752_s15  ;;  %s2979_s15 = sld [smem:[#allocation2 + $0x4c]] }
 0x3f1   :  { %1396 = vrot.lane.b32.xlu1 %v2590_v51, %s1908_s13  ;;  %1429 = vrot.lane.b32.xlu2 %v2742_v59, %s1903_s10  ;;  %s1726_s10 = sld [smem:[#allocation2 + $0xd]] }
 0x3f2   :  { %1446 = vrot.lane.b32.xlu0 %v2742_v59, %s1904_s0 }
 0x3f3   :  { %v845_v37 = vpop.permute.xlu1 %844  ;;  %v2775_v9 = vpop.permute.xlu2 %954 }
 0x3f4   :  { %v846_v4 = vsel %vm695_vm10, %v843_v24, %v845_v37  ;;  %v847_v17 = vsel %vm695_vm10, %v845_v37, %v843_v24  ;;  %v888_v50 = vpop.permute.xlu0 %887  ;;  %v880_v24 = vsel %vm613_vm3, %v878_v41, %v879_v8  ;;  %v895_v37 = vstv %s2746_s4  ;;  %s2973_s4 = sld [smem:[#allocation2 + $0x1b]] }
 0x3f5   :  { %v848_v19 = vmul.f32 %v847_v17, %v2544_v14  ;;  %v849_v7 = vmul.f32 %v846_v4, %v2554_v44  ;;  %v882_v43 = vmul.f32 %v880_v24, %v875_v20  ;;  %v897_v3 = vsel %vm613_vm3, %v895_v37, %v896_v42 }
 0x3f7   :  { %v855_v55 = vmul.f32 %v854_v6, %v848_v19  ;;  %v856_v34 = vmul.f32 %v854_v6, %v849_v7  ;;  %v881_v6 = vmul.f32 %v880_v24, %v874_v47 }
 0x3f9   :  { %v857_v58 = vadd.f32 %v855_v55, %v840_v38  ;;  %v858_v5 = vadd.f32 %v856_v34, %v841_v28  ;;  %1461 = vrot.lane.b32.xlu2 %v2729_v62, %s1906_s2  ;;  %1444 = vrot.lane.b32.xlu1 %v2729_v62, %s1904_s0  ;;  %s1727_s0 = sld [smem:[#allocation2 + $0x3e]] }
 0x3fa   :  { %1487 = vrot.lane.b32.xlu0 %v2729_v62, %s1897_s28 }
 0x3fb   :  { %v866_v4 = vadd.f32 %v864_v21, %v857_v58  ;;  %v867_v17 = vadd.f32 %v865_v10, %v858_v5  ;;  %v886_v45 = vpop.permute.xlu1 %885  ;;  %v2797_v24 = vpop.permute.xlu2 %995  ;;  %v912_v5 = vstv %s1726_s10  ;;  %s1758_s10 = sld [smem:[#allocation2 + $0x1c]] }
 0x3fc   :  { %v889_v38 = vsel %vm750_vm15, %v886_v45, %v888_v50  ;;  %v890_v28 = vsel %vm750_vm15, %v888_v50, %v886_v45  ;;  %v938_v33 = vpop.permute.xlu0 %937 }
 0x3fd   :  { %v883_v41 = vadd.f32 %v881_v6, %v866_v4  ;;  %v884_v8 = vadd.f32 %v882_v43, %v867_v17  ;;  %v891_v19 = vmul.f32 %v889_v38, %v2660_v2  ;;  %v892_v7 = vmul.f32 %v890_v28, %v2662_v63 }
 0x3fe   :  { %v946_v38 = vstv %s1730_s17  ;;  %s1761_s17 = sld [smem:[#allocation2 + $0x4e]] }
 0x3ff   :  { %v898_v47 = vmul.f32 %v897_v3, %v891_v19  ;;  %v899_v20 = vmul.f32 %v897_v3, %v892_v7  ;;  %v913_v37 = vstv %s1727_s0  ;;  %v945_v3 = vstv %s1729_s16  ;;  %s1759_s0 = sld [smem:[#allocation2 + $0x4d]] }
 0x400   :  { %v914_v28 = vsel %vm613_vm3, %v912_v5, %v913_v37  ;;  %v947_v7 = vsel %vm613_vm3, %v945_v3, %v946_v38  ;;  %s1760_s16 = sld [smem:[#allocation2 + $0x1d]] }
 0x401   :  { %v900_v55 = vadd.f32 %v898_v47, %v883_v41  ;;  %v901_v34 = vadd.f32 %v899_v20, %v884_v8  ;;  %1489 = vrot.lane.b32.xlu2 %v2742_v59, %s1897_s28  ;;  %1463 = vrot.lane.b32.xlu1 %v2742_v59, %s1906_s2  ;;  %s2819_s28 = sld [smem:[#allocation2 + $0x10]]  ;;  %v962_v41 = vstv %s2805_s18  ;;  %v963_v8 = vstv %s2807_s19 }
 0x402   :  { %1506 = vrot.lane.b32.xlu0 %v2742_v59, %s1907_s12  ;;  %s2823_s2 = sld [smem:[#allocation2 + $0x41]]  ;;  %v956_v47 = vsel %vm672_vm12, %v2739_v15, %v2775_v9  ;;  %v957_v20 = vsel %vm672_vm12, %v2775_v9, %v2739_v15 }
 0x403   :  { %v905_v50 = vpop.permute.xlu1 %904  ;;  %v2821_v42 = vpop.permute.xlu2 %1014  ;;  %v958_v15 = vmul.f32 %v957_v20, %v2556_v39  ;;  %v959_v9 = vmul.f32 %v956_v47, %v2558_v16  ;;  %s3041_s18 = sld [smem:[#allocation2 + $0x1f]] }
 0x404   :  { %v972_v21 = vpop.permute.xlu0 %971  ;;  %v906_v10 = vsel %vm773_vm4, %v2703_v23, %v905_v50  ;;  %v907_v58 = vsel %vm773_vm4, %v905_v50, %v2703_v23  ;;  %s3051_s19 = sld [smem:[#allocation2 + $0x1e]] }
 0x405   :  { %v908_v23 = vmul.f32 %v906_v10, %v2656_v49  ;;  %v909_v45 = vmul.f32 %v907_v58, %v2658_v54  ;;  %v964_v58 = vsel %vm613_vm3, %v962_v41, %v963_v8 }
 0x406   :  { %v965_v47 = vmul.f32 %v964_v58, %v958_v15  ;;  %v966_v20 = vmul.f32 %v964_v58, %v959_v9 }
 0x407   :  { %v915_v50 = vmul.f32 %v914_v28, %v908_v23  ;;  %v916_v10 = vmul.f32 %v914_v28, %v909_v45 }
 0x409   :  { %1521 = vrot.lane.b32.xlu2 %v2729_v62, %s1908_s13  ;;  %1504 = vrot.lane.b32.xlu1 %v2729_v62, %s1907_s12  ;;  %s2831_s12 = sld [smem:[#allocation2 + $0x18]]  ;;  %v917_v38 = vadd.f32 %v915_v50, %v900_v55  ;;  %v918_v28 = vadd.f32 %v916_v10, %v901_v34  ;;  %v1100_v34 = vstv %s2835_s3  ;;  %v988_v50 = vstv %s2839_s20 }
 0x40a   :  { %v989_v10 = vstv %s2845_s21  ;;  %v1006_v62 = vstv %s2861_s23  ;;  %s3075_s3 = sld [smem:[#allocation2 + $0x57]] }
 0x40b   :  { %v936_v6 = vpop.permute.xlu1 %935  ;;  %v2879_v41 = vpop.permute.xlu2 %1175  ;;  %s3079_s20 = sld [smem:[#allocation2 + $0x20]] }
 0x40c   :  { %v939_v43 = vsel %vm649_vm8, %v936_v6, %v938_v33  ;;  %v940_v4 = vsel %vm649_vm8, %v938_v33, %v936_v6  ;;  %v2829_v17 = vpop.permute.xlu0 %1012  ;;  %v979_v6 = vstv %s2819_s28  ;;  %s3053_s28 = sld [smem:[#allocation2 + $0x4f]] }
 0x40d   :  { %v941_v33 = vmul.f32 %v940_v4, %v2527_v36  ;;  %v942_v19 = vmul.f32 %v939_v43, %v2542_v61  ;;  %v980_v43 = vstv %s2823_s2  ;;  %s3057_s2 = sld [smem:[#allocation2 + $0x50]] }
 0x40e   :  { %s3083_s21 = sld [smem:[#allocation2 + $0x51]] }
 0x40f   :  { %v948_v5 = vmul.f32 %v947_v7, %v941_v33  ;;  %v949_v37 = vmul.f32 %v947_v7, %v942_v19  ;;  %v1099_v55 = vstv %s2831_s12  ;;  %s3073_s12 = sld [smem:[#allocation2 + $0x26]] }
 0x410   :  { %s3099_s23 = sld [smem:[#allocation2 + $0x52]] }
 0x411   :  { %1523 = vrot.lane.b32.xlu1 %v2742_v59, %s1908_s13  ;;  %s2881_s13 = sld [smem:[#allocation2 + $0x13]]  ;;  %v950_v19 = vadd.f32 %v948_v5, %v917_v38  ;;  %v951_v7 = vadd.f32 %v949_v37, %v918_v28  ;;  %v2921_v28 = vsel %vm613_vm3, %v1099_v55, %v1100_v34 }
 0x413   :  { %v970_v4 = vpop.permute.xlu1 %969  ;;  %v967_v5 = vadd.f32 %v965_v47, %v950_v19  ;;  %v968_v37 = vadd.f32 %v966_v20, %v951_v7  ;;  %v1017_v19 = vsel %vm750_vm15, %v2821_v42, %v2829_v17  ;;  %v1023_v47 = vstv %s2885_s26  ;;  %v2939_v20 = vpop.permute.xlu2 %1207  ;;  %s3115_s26 = sld [smem:[#allocation2 + $0x54]] }
 0x414   :  { %v973_v23 = vsel %vm695_vm10, %v970_v4, %v972_v21  ;;  %v974_v45 = vsel %vm695_vm10, %v972_v21, %v970_v4  ;;  %v2877_v3 = vpop.permute.xlu0 %1031  ;;  %v981_v21 = vsel %vm613_vm3, %v979_v6, %v980_v43  ;;  %v990_v6 = vsel %vm613_vm3, %v988_v50, %v989_v10 }
 0x415   :  { %v975_v8 = vmul.f32 %v974_v45, %v2544_v14  ;;  %v976_v33 = vmul.f32 %v973_v23, %v2554_v44  ;;  %v1005_v45 = vstv %s2849_s22  ;;  %v991_v7 = vmul.f32 %v990_v6, %v2421_v1  ;;  %s3093_s22 = sld [smem:[#allocation2 + $0x21]] }
 0x416   :  { %v1007_v43 = vsel %vm613_vm3, %v1005_v45, %v1006_v62  ;;  %v992_v55 = vmul.f32 %v990_v6, %v2403_v31  ;;  %v1019_v1 = vmul.f32 %v1017_v19, %v2662_v63  ;;  %v1090_v6 = vstv %s2897_s5  ;;  %s3133_s5 = sld [smem:[#allocation2 + $0x25]] }
 0x417   :  { %v982_v4 = vmul.f32 %v981_v21, %v975_v8  ;;  %v983_v23 = vmul.f32 %v981_v21, %v976_v33  ;;  %v1022_v34 = vstv %s2881_s13  ;;  %v1074_v19 = vstv %s2907_s30  ;;  %s3111_s13 = sld [smem:[#allocation2 + $0x53]] }
 0x418   :  { %s3199_s30 = sld [smem:[#allocation2 + $0x58]] }
 0x419   :  { %v984_v8 = vadd.f32 %v982_v4, %v967_v5  ;;  %v985_v33 = vadd.f32 %v983_v23, %v968_v37  ;;  %v1056_v4 = vstv %s2865_s24  ;;  %v1057_v23 = vstv %s2869_s25  ;;  %s3105_s24 = sld [smem:[#allocation2 + $0x23]] }
 0x41a   :  { %v1052_v37 = vmul.f32 %v2316_v40, %v2527_v36  ;;  %s3109_s25 = sld [smem:[#allocation2 + $0x22]] }
 0x41b   :  { %v998_v58 = vpop.permute.xlu1 %997  ;;  %v993_v45 = vadd.f32 %v991_v7, %v984_v8  ;;  %v994_v5 = vadd.f32 %v992_v55, %v985_v33 }
 0x41c   :  { %v999_v15 = vsel %vm727_vm14, %v2797_v24, %v998_v58  ;;  %v1000_v9 = vsel %vm727_vm14, %v998_v58, %v2797_v24  ;;  %v2917_v38 = vpop.permute.xlu0 %1173  ;;  %v1016_v24 = vsel %vm750_vm15, %v2829_v17, %v2821_v42  ;;  %v1039_v42 = vstv %s2889_s6  ;;  %s3127_s6 = sld [smem:[#allocation2 + $0x24]] }
 0x41d   :  { %v1001_v62 = vmul.f32 %v999_v15, %v2619_v32  ;;  %v1002_v21 = vmul.f32 %v1000_v9, %v2621_v56  ;;  %v1040_v17 = vstv %s2895_s27  ;;  %v1018_v31 = vmul.f32 %v1016_v24, %v2660_v2  ;;  %s3131_s27 = sld [smem:[#allocation2 + $0x55]] }
 0x41e   :  { %v1091_v58 = vstv %s2901_s29  ;;  %v1053_v15 = vmul.f32 %v2312_v48, %v2542_v61  ;;  %v1073_v9 = vstv %s2903_s1  ;;  %v1041_v8 = vsel %vm613_vm3, %v1039_v42, %v1040_v17  ;;  %s3139_s29 = sld [smem:[#allocation2 + $0x56]] }
 0x41f   :  { %v1008_v50 = vmul.f32 %v1007_v43, %v1001_v62  ;;  %v1009_v10 = vmul.f32 %v1007_v43, %v1002_v21  ;;  %v1024_v43 = vsel %vm613_vm3, %v1022_v34, %v1023_v47  ;;  %v1103_v42 = vmul.f32 %v2921_v28, %v2242_v26  ;;  %s3189_s1 = sld [smem:[#allocation2 + $0x27]] }
 0x420   :  { %v1025_v48 = vmul.f32 %v1024_v43, %v1018_v31  ;;  %v1026_v55 = vmul.f32 %v1024_v43, %v1019_v1  ;;  %v2995_v43 = vpop.permute.xlu2 %1235 }
 0x421   :  { %v1010_v62 = vadd.f32 %v1008_v50, %v993_v45  ;;  %v1011_v21 = vadd.f32 %v1009_v10, %v994_v5  ;;  %v1058_v50 = vsel %vm613_vm3, %v1056_v4, %v1057_v23  ;;  %v1069_v10 = vmul.f32 %v2381_v18, %v2556_v39 }
 0x422   :  { %v1092_v4 = vsel %vm613_vm3, %v1090_v6, %v1091_v58  ;;  %v1086_v18 = vmul.f32 %v2345_v46, %v2544_v14  ;;  %v1087_v23 = vmul.f32 %v2341_v60, %v2554_v44  ;;  %v1059_v5 = vmul.f32 %v1058_v50, %v1052_v37 }
 0x423   :  { %v1030_v24 = vpop.permute.xlu1 %1029  ;;  %v1027_v17 = vadd.f32 %v1025_v48, %v1010_v62  ;;  %v1028_v31 = vadd.f32 %v1026_v55, %v1011_v21  ;;  %v1060_v26 = vmul.f32 %v1058_v50, %v1053_v15  ;;  %v1134_v6 = vstv %s2955_s14  ;;  %s3233_s14 = sld [smem:[#allocation2 + $0x5a]] }
 0x424   :  { %v1033_v40 = vsel %vm773_vm4, %v1030_v24, %v2877_v3  ;;  %v1034_v33 = vsel %vm773_vm4, %v2877_v3, %v1030_v24  ;;  %v2971_v7 = vpop.permute.xlu0 %1192  ;;  %v1070_v3 = vmul.f32 %v2377_v13, %v2558_v16  ;;  %v1075_v13 = vsel %vm613_vm3, %v1073_v9, %v1074_v19 }
 0x425   :  { %v1035_v34 = vmul.f32 %v1033_v40, %v2656_v49  ;;  %v1036_v47 = vmul.f32 %v1034_v33, %v2658_v54  ;;  %v1116_v24 = vstv %s2935_s8  ;;  %v1133_v40 = vstv %s2947_s11  ;;  %s3219_s8 = sld [smem:[#allocation2 + $0x28]] }
 0x426   :  { %v1076_v58 = vmul.f32 %v1075_v13, %v1069_v10  ;;  %v1077_v46 = vmul.f32 %v1075_v13, %v1070_v3  ;;  %v1093_v55 = vmul.f32 %v1092_v4, %v1086_v18  ;;  %v1144_v37 = vsel %vm773_vm4, %v2445_v22, %v2479_v35  ;;  %s3231_s11 = sld [smem:[#allocation2 + $0x29]] }
 0x427   :  { %v1042_v1 = vmul.f32 %v1041_v8, %v1035_v34  ;;  %v1043_v45 = vmul.f32 %v1041_v8, %v1036_v47  ;;  %v1117_v8 = vstv %s2943_s9  ;;  %v1094_v34 = vmul.f32 %v1092_v4, %v1087_v23  ;;  %s3223_s9 = sld [smem:[#allocation2 + $0x59]] }
 0x428   :  { %v1145_v15 = vsel %vm773_vm4, %v2479_v35, %v2445_v22  ;;  %v1112_v19 = vmul.f32 %v2397_v12, %v2619_v32  ;;  %v1113_v47 = vmul.f32 %v2401_v30, %v2621_v56  ;;  %v1150_v3 = vstv %s2973_s4  ;;  %s3237_s4 = sld [smem:[#allocation2 + $0x2a]] }
 0x429   :  { %v1044_v62 = vadd.f32 %v1042_v1, %v1027_v17  ;;  %v1045_v21 = vadd.f32 %v1043_v45, %v1028_v31  ;;  %v1151_v17 = vstv %s2979_s15  ;;  %v1118_v31 = vsel %vm613_vm3, %v1116_v24, %v1117_v8  ;;  %s3240_s15 = sld [smem:[#allocation2 + $0x5b]] }
 0x42a   :  { %v1102_v1 = vmul.f32 %v2921_v28, %v2240_v25  ;;  %v1129_v22 = vmul.f32 %v2415_v53, %v2660_v2  ;;  %v1130_v35 = vmul.f32 %v2419_v0, %v2662_v63  ;;  %v1146_v30 = vmul.f32 %v1144_v37, %v2656_v49 }
 0x42b   :  { %v1061_v33 = vadd.f32 %v1059_v5, %v1044_v62  ;;  %v1062_v48 = vadd.f32 %v1060_v26, %v1045_v21  ;;  %v1191_v60 = vpop.permute.xlu1 %1190  ;;  %v1147_v4 = vmul.f32 %v1145_v15, %v2658_v54  ;;  %v1135_v18 = vsel %vm613_vm3, %v1133_v40, %v1134_v6  ;;  %v3031_v62 = vpop.permute.xlu2 %1267 }
 0x42c   :  { %v3009_v9 = vpop.permute.xlu0 %1233  ;;  %v1119_v23 = vmul.f32 %v1118_v31, %v1112_v19  ;;  %v1120_v13 = vmul.f32 %v1118_v31, %v1113_v47  ;;  %v1152_v25 = vsel %vm613_vm3, %v1150_v3, %v1151_v17  ;;  %v1136_v53 = vmul.f32 %v1135_v18, %v1129_v22 }
 0x42d   :  { %v1078_v50 = vadd.f32 %v1076_v58, %v1061_v33  ;;  %v1079_v10 = vadd.f32 %v1077_v46, %v1062_v48  ;;  %v1137_v28 = vmul.f32 %v1135_v18, %v1130_v35  ;;  %v1153_v58 = vmul.f32 %v1152_v25, %v1146_v30 }
 0x42e   :  { %v1154_v46 = vmul.f32 %v1152_v25, %v1147_v4  ;;  %v1177_v37 = vsel %vm649_vm8, %v2917_v38, %v2879_v41  ;;  %v1178_v15 = vsel %vm649_vm8, %v2879_v41, %v2917_v38  ;;  %v1183_v19 = vstv %s1758_s10  ;;  %s3250_s10 = sld [smem:[#allocation2 + $0x2b]] }
 0x42f   :  { %v1095_v12 = vadd.f32 %v1093_v55, %v1078_v50  ;;  %v1096_v45 = vadd.f32 %v1094_v34, %v1079_v10  ;;  %v1184_v47 = vstv %s1759_s0  ;;  %v1179_v3 = vmul.f32 %v1178_v15, %v2527_v36  ;;  %s3261_s0 = sld [smem:[#allocation2 + $0x5c]] }
 0x430   :  { %v1180_v17 = vmul.f32 %v1177_v37, %v2542_v61  ;;  %v1185_v31 = vsel %vm613_vm3, %v1183_v19, %v1184_v47  ;;  %v1194_v41 = vsel %vm672_vm12, %v1191_v60, %v2971_v7  ;;  %v1195_v38 = vsel %vm672_vm12, %v2971_v7, %v1191_v60 }
 0x431   :  { %v1104_v5 = vadd.f32 %v1102_v1, %v1095_v12  ;;  %v1105_v26 = vadd.f32 %v1103_v42, %v1096_v45  ;;  %v1200_v1 = vstv %s1760_s16  ;;  %v1201_v22 = vstv %s1761_s17  ;;  %s3265_s16 = sld [smem:[#allocation2 + $0x2c]] }
 0x432   :  { %v1186_v12 = vmul.f32 %v1185_v31, %v1179_v3  ;;  %v1187_v45 = vmul.f32 %v1185_v31, %v1180_v17  ;;  %v1196_v30 = vmul.f32 %v1195_v38, %v2556_v39  ;;  %v1197_v4 = vmul.f32 %v1194_v41, %v2558_v16  ;;  %s3275_s17 = sld [smem:[#allocation2 + $0x5d]] }
 0x433   :  { %v1121_v0 = vadd.f32 %v1119_v23, %v1104_v5  ;;  %v1122_v21 = vadd.f32 %v1120_v13, %v1105_v26  ;;  %v1210_v24 = vpop.permute.xlu1 %1209  ;;  %v3039_v34 = vpop.permute.xlu2 %1302  ;;  %v1202_v7 = vsel %vm613_vm3, %v1200_v1, %v1201_v22  ;;  %v1217_v5 = vstv %s3051_s19  ;;  %s3291_s19 = sld [smem:[#allocation2 + $0x5e]] }
 0x434   :  { %v3033_v8 = vpop.permute.xlu0 %1252  ;;  %v1211_v60 = vsel %vm695_vm10, %v2939_v20, %v1210_v24  ;;  %v1212_v18 = vsel %vm695_vm10, %v1210_v24, %v2939_v20  ;;  %v1218_v26 = vstv %s3053_s28  ;;  %v1238_v37 = vsel %vm727_vm14, %v2995_v43, %v3009_v9  ;;  %s3307_s28 = sld [smem:[#allocation2 + $0x2e]] }
 0x435   :  { %v1138_v33 = vadd.f32 %v1136_v53, %v1121_v0  ;;  %v1139_v40 = vadd.f32 %v1137_v28, %v1122_v21  ;;  %v1226_v53 = vstv %s3041_s18  ;;  %v1227_v28 = vstv %s3057_s2  ;;  %s3286_s18 = sld [smem:[#allocation2 + $0x2d]] }
 0x436   :  { %v1203_v21 = vmul.f32 %v1202_v7, %v1196_v30  ;;  %v1214_v20 = vmul.f32 %v1211_v60, %v2554_v44  ;;  %v1219_v24 = vsel %vm613_vm3, %v1217_v5, %v1218_v26  ;;  %v1243_v3 = vstv %s3079_s20  ;;  %s3313_s2 = sld [smem:[#allocation2 + $0x5f]] }
 0x437   :  { %v1155_v6 = vadd.f32 %v1153_v58, %v1138_v33  ;;  %v1156_v48 = vadd.f32 %v1154_v46, %v1139_v40  ;;  %v1204_v58 = vmul.f32 %v1202_v7, %v1197_v4  ;;  %v1213_v46 = vmul.f32 %v1212_v18, %v2544_v14  ;;  %s3333_s20 = sld [smem:[#allocation2 + $0x30]] }
 0x438   :  { %v1221_v19 = vmul.f32 %v1219_v24, %v1214_v20  ;;  %v1244_v17 = vstv %s3083_s21  ;;  %v1353_v38 = vstv %s3073_s12  ;;  %v1260_v7 = vstv %s3093_s22  ;;  %s3323_s12 = sld [smem:[#allocation2 + $0x2f]] }
 0x439   :  { %v1188_v23 = vadd.f32 %v1186_v12, %v1155_v6  ;;  %v1189_v13 = vadd.f32 %v1187_v45, %v1156_v48  ;;  %v1228_v6 = vsel %vm613_vm3, %v1226_v53, %v1227_v28  ;;  %v1237_v48 = vsel %vm727_vm14, %v3009_v9, %v2995_v43  ;;  %s3335_s21 = sld [smem:[#allocation2 + $0x61]] }
 0x43a   :  { %v1220_v15 = vmul.f32 %v1219_v24, %v1213_v46  ;;  %v1239_v43 = vmul.f32 %v1237_v48, %v2619_v32  ;;  %v1240_v9 = vmul.f32 %v1238_v37, %v2621_v56  ;;  %v1230_v22 = vmul.f32 %v1228_v6, %v2461_v57  ;;  %s1698_s22 = sld [smem:[#allocation2 + $0x62]] }
 0x43b   :  { %v3035_v42 = vpop.permute.xlu1 %1250  ;;  %v3071_v35 = vpop.permute.xlu2 %1334  ;;  %v1205_v33 = vadd.f32 %v1203_v21, %v1188_v23  ;;  %v1206_v40 = vadd.f32 %v1204_v58, %v1189_v13  ;;  %v1354_v12 = vstv %s3075_s3  ;;  %v1245_v30 = vsel %vm613_vm3, %v1243_v3, %v1244_v17  ;;  %s3327_s3 = sld [smem:[#allocation2 + $0x60]] }
 0x43c   :  { %v3037_v55 = vpop.permute.xlu0 %1300  ;;  %v1229_v4 = vmul.f32 %v1228_v6, %v2449_v52  ;;  %v1261_v60 = vstv %s3099_s23  ;;  %v1254_v18 = vsel %vm750_vm15, %v3035_v42, %v3033_v8  ;;  %v1255_v57 = vsel %vm750_vm15, %v3033_v8, %v3035_v42  ;;  %s1699_s23 = sld [smem:[#allocation2 + $0x63]] }
 0x43d   :  { %v1222_v31 = vadd.f32 %v1220_v15, %v1205_v33  ;;  %v1223_v41 = vadd.f32 %v1221_v19, %v1206_v40  ;;  %v1277_v26 = vstv %s3109_s25  ;;  %v1278_v53 = vstv %s3111_s13 }
 0x43e   :  { %v1246_v28 = vmul.f32 %v1245_v30, %v1239_v43  ;;  %v1247_v21 = vmul.f32 %v1245_v30, %v1240_v9  ;;  %v1262_v8 = vsel %vm613_vm3, %v1260_v7, %v1261_v60  ;;  %v1310_v42 = vstv %s3105_s24 }
 0x43f   :  { %v1231_v13 = vadd.f32 %v1229_v4, %v1222_v31  ;;  %v1232_v5 = vadd.f32 %v1230_v22, %v1223_v41  ;;  %v1256_v58 = vmul.f32 %v1254_v18, %v2660_v2  ;;  %v1257_v46 = vmul.f32 %v1255_v57, %v2662_v63 }
 0x440   :  { %v1279_v24 = vsel %vm613_vm3, %v1277_v26, %v1278_v53  ;;  %v1327_v33 = vstv %s3127_s6  ;;  %v1328_v40 = vstv %s3131_s27  ;;  %v1304_v37 = vsel %vm649_vm8, %v3037_v55, %v3039_v34 }
 0x441   :  { %v1248_v6 = vadd.f32 %v1246_v28, %v1231_v13  ;;  %v1249_v48 = vadd.f32 %v1247_v21, %v1232_v5  ;;  %v1305_v15 = vsel %vm649_vm8, %v3039_v34, %v3037_v55  ;;  %v1344_v41 = vstv %s3133_s5 }
 0x442   :  { %v1345_v43 = vstv %s3139_s29  ;;  %v1263_v55 = vmul.f32 %v1262_v8, %v1256_v58  ;;  %v1264_v34 = vmul.f32 %v1262_v8, %v1257_v46  ;;  %v1306_v4 = vmul.f32 %v1305_v15, %v2527_v36 }
 0x443   :  { %v3055_v50 = vpop.permute.xlu1 %1269  ;;  %v3125_v47 = vpop.permute.xlu2 %1362  ;;  %v1307_v7 = vmul.f32 %v1304_v37, %v2542_v61  ;;  %v1329_v13 = vsel %vm613_vm3, %v1327_v33, %v1328_v40  ;;  %v1346_v53 = vsel %vm613_vm3, %v1344_v41, %v1345_v43  ;;  %v1355_v28 = vsel %vm613_vm3, %v1353_v38, %v1354_v12 }
 0x444   :  { %v3059_v10 = vpop.permute.xlu0 %1319  ;;  %v1271_v23 = vsel %vm773_vm4, %v3031_v62, %v3055_v50  ;;  %v1272_v52 = vsel %vm773_vm4, %v3055_v50, %v3031_v62  ;;  %v1311_v50 = vstv %s3115_s26  ;;  %v1266_v18 = vadd.f32 %v1264_v34, %v1249_v48 }
 0x445   :  { %v1273_v20 = vmul.f32 %v1271_v23, %v2656_v49  ;;  %v1274_v62 = vmul.f32 %v1272_v52, %v2658_v54  ;;  %v1312_v52 = vsel %vm613_vm3, %v1310_v42, %v1311_v50  ;;  %v1357_v38 = vmul.f32 %v1355_v28, %v2590_v51 }
 0x446   :  { %v1313_v21 = vmul.f32 %v1312_v52, %v1306_v4  ;;  %v1314_v8 = vmul.f32 %v1312_v52, %v1307_v7  ;;  %v1388_v34 = vstv %s3223_s9  ;;  %v1404_v7 = vstv %s3231_s11 }
 0x447   :  { %v1280_v9 = vmul.f32 %v1279_v24, %v1273_v20  ;;  %v1281_v22 = vmul.f32 %v1279_v24, %v1274_v62  ;;  %v1370_v20 = vstv %s3189_s1  ;;  %v1371_v62 = vstv %s3199_s30 }
 0x448   :  { %v1372_v51 = vsel %vm613_vm3, %v1370_v20, %v1371_v62  ;;  %v1549_v29 = vstv %s1699_s23 }
 0x449   :  { %v1283_v26 = vadd.f32 %v1281_v22, %v1266_v18  ;;  %v1437_v18 = vstv %s3237_s4 }
 0x44b   :  { %v3095_v25 = vpop.permute.xlu1 %1317  ;;  %v3187_v19 = vpop.permute.xlu2 %1394  ;;  %v1316_v24 = vadd.f32 %v1314_v8, %v1283_v26  ;;  %v1438_v26 = vstv %s3240_s15 }
 0x44c   :  { %v3101_v0 = vpop.permute.xlu0 %1360  ;;  %v1321_v17 = vsel %vm672_vm12, %v3095_v25, %v3059_v10  ;;  %v1322_v31 = vsel %vm672_vm12, %v3059_v10, %v3095_v25  ;;  %v1265_v25 = vadd.f32 %v1263_v55, %v1248_v6  ;;  %v1387_v55 = vstv %s3219_s8 }
 0x44d   :  { %v1323_v57 = vmul.f32 %v1322_v31, %v2556_v39  ;;  %v1324_v23 = vmul.f32 %v1321_v17, %v2558_v16  ;;  %v1364_v37 = vsel %vm727_vm14, %v3101_v0, %v3125_v47  ;;  %v1365_v15 = vsel %vm727_vm14, %v3125_v47, %v3101_v0 }
 0x44e   :  { %v1282_v5 = vadd.f32 %v1280_v9, %v1265_v25  ;;  %v1356_v31 = vmul.f32 %v1355_v28, %v2529_v27  ;;  %v1366_v27 = vmul.f32 %v1364_v37, %v2619_v32  ;;  %v1367_v9 = vmul.f32 %v1365_v15, %v2621_v56 }
 0x44f   :  { %v1330_v42 = vmul.f32 %v1329_v13, %v1323_v57  ;;  %v1331_v58 = vmul.f32 %v1329_v13, %v1324_v23  ;;  %v1389_v25 = vsel %vm613_vm3, %v1387_v55, %v1388_v34  ;;  %v1480_v55 = vstv %s3286_s18 }
 0x450   :  { %v1315_v50 = vadd.f32 %v1313_v21, %v1282_v5  ;;  %v1373_v13 = vmul.f32 %v1372_v51, %v1366_v27  ;;  %v1374_v5 = vmul.f32 %v1372_v51, %v1367_v9  ;;  %v1481_v34 = vstv %s3291_s19 }
 0x451   :  { %v1333_v48 = vadd.f32 %v1331_v58, %v1316_v24  ;;  %v1455_v58 = vstv %s3261_s0 }
 0x452   :  { %v1332_v12 = vadd.f32 %v1330_v42, %v1315_v50  ;;  %v1454_v42 = vstv %s3250_s10 }
 0x453   :  { %v1337_v1 = vpop.permute.xlu1 %1336  ;;  %v1430_v33 = vpop.permute.xlu2 %1429 }
 0x454   :  { %v3142_v45 = vpop.permute.xlu0 %1379  ;;  %v1338_v60 = vsel %vm695_vm10, %v3071_v35, %v1337_v1  ;;  %v1339_v10 = vsel %vm695_vm10, %v1337_v1, %v3071_v35 }
 0x455   :  { %v1340_v35 = vmul.f32 %v1339_v10, %v2544_v14  ;;  %v1341_v1 = vmul.f32 %v1338_v60, %v2554_v44  ;;  %v1405_v60 = vstv %s3233_s14 }
 0x457   :  { %v1347_v40 = vmul.f32 %v1346_v53, %v1340_v35  ;;  %v1348_v6 = vmul.f32 %v1346_v53, %v1341_v1  ;;  %v1406_v35 = vsel %vm613_vm3, %v1404_v7, %v1405_v60  ;;  %v1482_v60 = vsel %vm613_vm3, %v1480_v55, %v1481_v34 }
 0x459   :  { %v1349_v0 = vadd.f32 %v1347_v40, %v1332_v12  ;;  %v1350_v47 = vadd.f32 %v1348_v6, %v1333_v48 }
 0x45b   :  { %v1378_v3 = vpop.permute.xlu1 %1377  ;;  %v1358_v57 = vadd.f32 %v1356_v31, %v1349_v0  ;;  %v1359_v23 = vadd.f32 %v1357_v38, %v1350_v47  ;;  %v1462_v1 = vpop.permute.xlu2 %1461 }
 0x45c   :  { %v3203_v30 = vpop.permute.xlu0 %1427  ;;  %v1381_v41 = vsel %vm750_vm15, %v1378_v3, %v3142_v45  ;;  %v1382_v43 = vsel %vm750_vm15, %v3142_v45, %v1378_v3 }
 0x45d   :  { %v1383_v3 = vmul.f32 %v1381_v41, %v2660_v2  ;;  %v1384_v4 = vmul.f32 %v1382_v43, %v2662_v63  ;;  %v1431_v21 = vsel %vm649_vm8, %v3203_v30, %v1430_v33  ;;  %v1432_v8 = vsel %vm649_vm8, %v1430_v33, %v3203_v30 }
 0x45e   :  { %v1375_v62 = vadd.f32 %v1373_v13, %v1358_v57  ;;  %v1376_v50 = vadd.f32 %v1374_v5, %v1359_v23  ;;  %v1433_v38 = vmul.f32 %v1432_v8, %v2527_v36  ;;  %v1434_v12 = vmul.f32 %v1431_v21, %v2542_v61  ;;  %v3479_v8 = vld [vmem:[#allocation21_spill] sm:$0xff] }
 0x45f   :  { %v1390_v53 = vmul.f32 %v1389_v25, %v1383_v3  ;;  %v1391_v28 = vmul.f32 %v1389_v25, %v1384_v4  ;;  %v1471_v30 = vstv %s3265_s16  ;;  %v1472_v33 = vstv %s3275_s17 }
 0x460   :  { %v1439_v36 = vsel %vm613_vm3, %v1437_v18, %v1438_v26  ;;  %v1456_v61 = vsel %vm613_vm3, %v1454_v42, %v1455_v58  ;;  %v1473_v47 = vsel %vm613_vm3, %v1471_v30, %v1472_v33  ;;  %v1497_v18 = vstv %s3307_s28 }
 0x461   :  { %v1392_v48 = vadd.f32 %v1390_v53, %v1375_v62  ;;  %v1393_v37 = vadd.f32 %v1391_v28, %v1376_v50  ;;  %v1440_v27 = vmul.f32 %v1439_v36, %v1433_v38  ;;  %v1441_v9 = vmul.f32 %v1439_v36, %v1434_v12 }
 0x462   :  { %v1498_v57 = vstv %s3313_s2  ;;  %v1514_v53 = vstv %s3323_s12  ;;  %v1515_v28 = vstv %s3327_s3  ;;  %v1484_v21 = vmul.f32 %v1482_v60, %v2742_v59 }
 0x463   :  { %v1397_v46 = vpop.permute.xlu1 %1396  ;;  %v1490_v3 = vpop.permute.xlu2 %1489  ;;  %v1483_v42 = vmul.f32 %v1482_v60, %v3479_v8  ;;  %v1499_v50 = vsel %vm613_vm3, %v1497_v18, %v1498_v57  ;;  %v1531_v38 = vstv %s3333_s20  ;;  %v1532_v59 = vstv %s3335_s21 }
 0x464   :  { %v1447_v17 = vpop.permute.xlu0 %1446  ;;  %v1398_v22 = vsel %vm773_vm4, %v3187_v19, %v1397_v46  ;;  %v1399_v45 = vsel %vm773_vm4, %v1397_v46, %v3187_v19 }
 0x465   :  { %v1400_v19 = vmul.f32 %v1398_v22, %v2656_v49  ;;  %v1401_v52 = vmul.f32 %v1399_v45, %v2658_v54 }
 0x467   :  { %v1407_v24 = vmul.f32 %v1406_v35, %v1400_v19  ;;  %v1408_v40 = vmul.f32 %v1406_v35, %v1401_v52 }
 0x469   :  { %v1410_v43 = vadd.f32 %v1408_v40, %v1393_v37 }
 0x46b   :  { %v1445_v10 = vpop.permute.xlu1 %1444  ;;  %v1522_v12 = vpop.permute.xlu2 %1521 }
 0x46c   :  { %v1448_v46 = vsel %vm672_vm12, %v1445_v10, %v1447_v17  ;;  %v1449_v20 = vsel %vm672_vm12, %v1447_v17, %v1445_v10  ;;  %v1488_v6 = vpop.permute.xlu0 %1487 }
 0x46d   :  { %v1450_v15 = vmul.f32 %v1449_v20, %v2556_v39  ;;  %v1451_v17 = vmul.f32 %v1448_v46, %v2558_v16  ;;  %v1409_v39 = vadd.f32 %v1407_v24, %v1392_v48  ;;  %v1491_v52 = vsel %vm727_vm14, %v1488_v6, %v1490_v3 }
 0x46e   :  { %v1492_v13 = vsel %vm727_vm14, %v1490_v3, %v1488_v6  ;;  %v1493_v58 = vmul.f32 %v1491_v52, %v2619_v32  ;;  %v1516_v24 = vsel %vm613_vm3, %v1514_v53, %v1515_v28 }
 0x46f   :  { %v1457_v22 = vmul.f32 %v1456_v61, %v1450_v15  ;;  %v1458_v45 = vmul.f32 %v1456_v61, %v1451_v17  ;;  %v1442_v4 = vadd.f32 %v1440_v27, %v1409_v39  ;;  %v1494_v46 = vmul.f32 %v1492_v13, %v2621_v56 }
 0x470   :  { %v1500_v30 = vmul.f32 %v1499_v50, %v1493_v58 }
 0x471   :  { %v1459_v10 = vadd.f32 %v1457_v22, %v1442_v4  ;;  %v1501_v33 = vmul.f32 %v1499_v50, %v1494_v46 }
 0x473   :  { %v1464_v51 = vpop.permute.xlu1 %1463 }
 0x474   :  { %v1465_v31 = vsel %vm695_vm10, %v1462_v1, %v1464_v51  ;;  %v1466_v41 = vsel %vm695_vm10, %v1464_v51, %v1462_v1  ;;  %v1507_v23 = vpop.permute.xlu0 %1506 }
 0x475   :  { %v1467_v16 = vmul.f32 %v1466_v41, %v2544_v14  ;;  %v1468_v0 = vmul.f32 %v1465_v31, %v2554_v44  ;;  %v1443_v14 = vadd.f32 %v1441_v9, %v1410_v43 }
 0x477   :  { %v1474_v7 = vmul.f32 %v1473_v47, %v1467_v16  ;;  %v1475_v44 = vmul.f32 %v1473_v47, %v1468_v0  ;;  %v1460_v25 = vadd.f32 %v1458_v45, %v1443_v14  ;;  %v1546_v47 = vstv %s1698_s22 }
 0x479   :  { %v1476_v35 = vadd.f32 %v1474_v7, %v1459_v10  ;;  %v1477_v1 = vadd.f32 %v1475_v44, %v1460_v25 }
 0x47b   :  { %v1505_v19 = vpop.permute.xlu1 %1504  ;;  %v1485_v40 = vadd.f32 %v1483_v42, %v1476_v35  ;;  %v1486_v6 = vadd.f32 %v1484_v21, %v1477_v1 }
 0x47c   :  { %v1508_v5 = vsel %vm750_vm15, %v1505_v19, %v1507_v23  ;;  %v1509_v26 = vsel %vm750_vm15, %v1507_v23, %v1505_v19 }
 0x47d   :  { %v1510_v20 = vmul.f32 %v1508_v5, %v2660_v2  ;;  %v1511_v62 = vmul.f32 %v1509_v26, %v2662_v63  ;;  %v1533_v2 = vsel %vm613_vm3, %v1531_v38, %v1532_v59  ;;  %v1502_v15 = vadd.f32 %v1500_v30, %v1485_v40 }
 0x47e   :  { %v1503_v17 = vadd.f32 %v1501_v33, %v1486_v6 }
 0x47f   :  { %v1517_v32 = vmul.f32 %v1516_v24, %v1510_v20  ;;  %v1518_v48 = vmul.f32 %v1516_v24, %v1511_v62 }
 0x481   :  { %v1519_v61 = vadd.f32 %v1517_v32, %v1502_v15  ;;  %v1520_v31 = vadd.f32 %v1518_v48, %v1503_v17 }
 0x483   :  { %v1524_v56 = vpop.permute.xlu1 %1523 }
 0x484   :  { %v1525_v63 = vsel %vm773_vm4, %v1522_v12, %v1524_v56  ;;  %v1526_v37 = vsel %vm773_vm4, %v1524_v56, %v1522_v12 }
 0x485   :  { %v1527_v51 = vmul.f32 %v1525_v63, %v2656_v49  ;;  %v1528_v36 = vmul.f32 %v1526_v37, %v2658_v54 }
 0x487   :  { %v1534_v41 = vmul.f32 %v1533_v2, %v1527_v51  ;;  %v1535_v39 = vmul.f32 %v1533_v2, %v1528_v36 }
 0x489   :  { %v1536_v43 = vadd.f32 %v1534_v41, %v1519_v61  ;;  %v1537_v11 = vadd.f32 %v1535_v39, %v1520_v31 }
 0x48b   :  { %v1540_v16 = vrot.slane %v1536_v43, 2  ;;  %v1541_v0 = vrot.slane %v1537_v11, 2 }
 0x48d   :  { %v1544_v55 = vadd.f32 %v1540_v16, %v1536_v43  ;;  %v1545_v34 = vadd.f32 %v1541_v0, %v1537_v11 }
 0x48f   :  { %v1547_v27 = vmul.f32 %v1546_v47, %v1544_v55  ;;  %v1548_v9 = vmul.f32 %v1546_v47, %v1545_v34  ;;  %v3480_v47 = vld [vmem:[#allocation9_spill] sm:$0xff] }
 0x490   :  { %v3481_v34 = vld [vmem:[#allocation5_spill] sm:$0xff] }
 0x491   :  { %v1550_v22 = vadd.f32 %v1549_v29, %v1547_v27  ;;  %v1551_v45 = vadd.f32 %v1549_v29, %v1548_v9  ;;  %v3482_v27 = vld [vmem:[#allocation10_spill] sm:$0xff] }
 0x493   :  { %v1802_v49 = vmul.f32 -1.442695, %v1550_v22  ;;  %v1803_v3 = vmul.f32 -1.442695, %v1551_v45 }
 0x495   :  { %1865 = vpow2.f32 %v1802_v49  ;;  %v3484_v49 = vld [vmem:[#allocation17_spill] sm:$0xff] }
 0x496   :  { %1867 = vpow2.f32 %v1803_v3 }
 0x49b   :  { %v1866_v54 = vpop.eup %1865 }
 0x49c   :  { %v1868_v4 = vpop.eup %1867  ;;  %v1558_v14 = vadd.f32 1.0, %v1866_v54 }
 0x49d   :  { %v1559_v7 = vadd.f32 1.0, %v1868_v4  ;;  %v3485_v4 = vld [vmem:[#allocation18_spill] sm:$0xff] }
 0x49e   :  { %1869 = vrcp.f32 %v1558_v14  ;;  %v1571_v57 = vand.u32 2147483648, %v1558_v14  ;;  %v1569_v52 = vand.u32 2147483647, %v1558_v14  ;;  %vm1565_vm7 = vweird.f32 %v1558_v14 }
 0x49f   :  { %1871 = vrcp.f32 %v1559_v7  ;;  %v1586_v13 = vand.u32 2147483648, %v1559_v7  ;;  %v1584_v26 = vand.u32 2147483647, %v1559_v7  ;;  %vm1580_vm8 = vweird.f32 %v1559_v7 }
 0x4a0   :  { %v1572_v1 = vor.u32 1.1754944e-38, %v1571_v57  ;;  %vm1570_vm9 = vcmp.eq.f32.partialorder %v1569_v52, 8.507059e+37  ;;  %v3490_v52 = vld [vmem:[#allocation7_spill] sm:$0xff] }
 0x4a1   :  { %v1587_v21 = vor.u32 1.1754944e-38, %v1586_v13  ;;  %vm1585_vm11 = vcmp.eq.f32.partialorder %v1584_v26, 8.507059e+37 }
 0x4a4   :  { %v1870_v44 = vpop.eup %1869 }
 0x4a5   :  { %v1872_v60 = vpop.eup %1871  ;;  %v1561_v10 = vmul.f32 %v1870_v44, %v1558_v14  ;;  %vm1566_vm5 = vweird.f32 %v1870_v44 }
 0x4a6   :  { %v1576_v25 = vmul.f32 %v1872_v60, %v1559_v7  ;;  %vm1581_vm6 = vweird.f32 %v1872_v60  ;;  %vm1567_vm2 = vmor %vm1565_vm7, %vm1566_vm5 }
 0x4a7   :  { %v1562_v18 = vsub.f32 1.0, %v1561_v10  ;;  %vm1582_vm10 = vmor %vm1580_vm8, %vm1581_vm6  ;;  %v3487_v10 = vld [vmem:[#allocation16_spill] sm:$0xff] }
 0x4a8   :  { %v1577_v23 = vsub.f32 1.0, %v1576_v25 }
 0x4a9   :  { %v1563_v19 = vmul.f32 %v1870_v44, %v1562_v18  ;;  %v3488_v18 = vld [vmem:[#allocation13_spill] sm:$0xff] }
 0x4aa   :  { %v1578_v5 = vmul.f32 %v1872_v60, %v1577_v23  ;;  %v3489_v23 = vld [vmem:[#allocation14_spill] sm:$0xff] }
 0x4ab   :  { %v1564_v35 = vadd.f32 %v1870_v44, %v1563_v19 }
 0x4ac   :  { %v1579_v53 = vadd.f32 %v1872_v60, %v1578_v5  ;;  %v3491_v5 = vld [vmem:[#allocation8_spill] sm:$0xff] }
 0x4ad   :  { %v1568_v28 = vsel %vm1567_vm2, %v1870_v44, %v1564_v35  ;;  %v3486_v44 = vld [vmem:[#allocation15_spill] sm:$0xff] }
 0x4ae   :  { %v1573_v8 = vsel %vm1570_vm9, %v1572_v1, %v1568_v28  ;;  %v1583_v42 = vsel %vm1582_vm10, %v1872_v60, %v1579_v53  ;;  %v3492_v35 = vld [vmem:[#allocation11_spill] sm:$0xff]  ;;  %v3493_v53 = vld [vmem:[#allocation12_spill] sm:$0xff] }
 0x4af   :  { %v1588_v58 = vsel %vm1585_vm11, %v1587_v21, %v1583_v42  ;;  %v1590_v46 = vmul.f32 %v1573_v8, %v1550_v22  ;;  %v3483_v22 = vld [vmem:[#allocation6_spill] sm:$0xff]  ;;  %v3494_v21 = vld [vmem:[#allocation19_spill] sm:$0xff]  ;;  %v3495_v42 = vld [vmem:[#allocation20_spill] sm:$0xff] }
 0x4b0   :  { %v1591_v20 = vmul.f32 %v1588_v58, %v1551_v45 }
 0x4b1   :  { %v1804_v62 = vmul.f32 -1.442695, %v1590_v46 }
 0x4b2   :  { %v1805_v50 = vmul.f32 -1.442695, %v1591_v20 }
 0x4b3   :  { %1873 = vpow2.f32 %v1804_v62 }
 0x4b4   :  { %1875 = vpow2.f32 %v1805_v50 }
 0x4b9   :  { %v1874_v24 = vpop.eup %1873 }
 0x4ba   :  { %v1876_v40 = vpop.eup %1875  ;;  %v1598_v6 = vadd.f32 1.0, %v1874_v24 }
 0x4bb   :  { %v1599_v38 = vadd.f32 1.0, %v1876_v40 }
 0x4bc   :  { %1877 = vrcp.f32 %v1598_v6  ;;  %v1611_v48 = vand.u32 2147483648, %v1598_v6  ;;  %v1609_v63 = vand.u32 2147483647, %v1598_v6  ;;  %vm1605_vm14 = vweird.f32 %v1598_v6 }
 0x4bd   :  { %1879 = vrcp.f32 %v1599_v38  ;;  %v1626_v37 = vand.u32 2147483648, %v1599_v38  ;;  %v1624_v17 = vand.u32 2147483647, %v1599_v38  ;;  %vm1620_vm0 = vweird.f32 %v1599_v38 }
 0x4be   :  { %v1612_v36 = vor.u32 1.1754944e-38, %v1611_v48  ;;  %vm1610_vm1 = vcmp.eq.f32.partialorder %v1609_v63, 8.507059e+37 }
 0x4bf   :  { %v1627_v41 = vor.u32 1.1754944e-38, %v1626_v37  ;;  %vm1625_vm4 = vcmp.eq.f32.partialorder %v1624_v17, 8.507059e+37 }
 0x4c2   :  { %v1878_v59 = vpop.eup %1877 }
 0x4c3   :  { %v1880_v12 = vpop.eup %1879  ;;  %v1601_v30 = vmul.f32 %v1878_v59, %v1598_v6  ;;  %vm1606_vm12 = vweird.f32 %v1878_v59 }
 0x4c4   :  { %v1616_v33 = vmul.f32 %v1880_v12, %v1599_v38  ;;  %vm1621_vm13 = vweird.f32 %v1880_v12  ;;  %vm1607_vm15 = vmor %vm1605_vm14, %vm1606_vm12 }
 0x4c5   :  { %v1602_v32 = vsub.f32 1.0, %v1601_v30  ;;  %vm1622_vm3 = vmor %vm1620_vm0, %vm1621_vm13 }
 0x4c6   :  { %v1617_v56 = vsub.f32 1.0, %v1616_v33 }
 0x4c7   :  { %v1603_v2 = vmul.f32 %v1878_v59, %v1602_v32 }
 0x4c8   :  { %v1618_v15 = vmul.f32 %v1880_v12, %v1617_v56 }
 0x4c9   :  { %v1604_v51 = vadd.f32 %v1878_v59, %v1603_v2 }
 0x4ca   :  { %v1619_v61 = vadd.f32 %v1880_v12, %v1618_v15 }
 0x4cb   :  { %v1608_v31 = vsel %vm1607_vm15, %v1878_v59, %v1604_v51 }
 0x4cc   :  { %v1613_v39 = vsel %vm1610_vm1, %v1612_v36, %v1608_v31  ;;  %v1623_v43 = vsel %vm1622_vm3, %v1880_v12, %v1619_v61 }
 0x4cd   :  { %v1628_v11 = vsel %vm1625_vm4, %v1627_v41, %v1623_v43  ;;  %v1630_v16 = vperm.slane %v1613_v39, 0  ;;  %v1648_v54 = vperm.slane %v1613_v39, 1 }
 0x4ce   :  { %v1631_v0 = vperm.slane %v1628_v11, 0  ;;  %v1649_v7 = vperm.slane %v1628_v11, 1 }
 0x4cf   :  { %v1632_v55 = vmul.f32 %v1630_v16, %v3480_v47  ;;  %v1634_v29 = vmul.f32 %v1630_v16, %v3481_v34  ;;  %v1636_v3 = vmul.f32 %v1630_v16, %v3484_v49  ;;  %v1638_v60 = vmul.f32 %v1630_v16, %v3486_v44 }
 0x4d0   :  { %v1633_v9 = vmul.f32 %v1631_v0, %v3482_v27  ;;  %v1635_v45 = vmul.f32 %v1631_v0, %v3483_v22  ;;  %v1637_v14 = vmul.f32 %v1631_v0, %v3485_v4  ;;  %v1639_v25 = vmul.f32 %v1631_v0, %v3487_v10 }
 0x4d1   :  { %1640 = vst [vmem:[%s3442_s7] sm:$0xff] %v1632_v55  ;;  %v1650_v57 = vmul.f32 %v1648_v54, %v3488_v18  ;;  %v1651_v19 = vmul.f32 %v1649_v7, %v3489_v23  ;;  %v1652_v13 = vmul.f32 %v1648_v54, %v3490_v52  ;;  %v1653_v26 = vmul.f32 %v1649_v7, %v3491_v5 }
 0x4d2   :  { %1641 = vst [vmem:[%s3442_s7 + $0x8] sm:$0xff] %v1633_v9  ;;  %v1654_v1 = vmul.f32 %v1648_v54, %v3492_v35  ;;  %v1655_v28 = vmul.f32 %v1649_v7, %v3493_v53  ;;  %v1656_v8 = vmul.f32 %v1648_v54, %v3494_v21  ;;  %v1657_v58 = vmul.f32 %v1649_v7, %v3495_v42 }
 0x4d3   :  { %1642 = vst [vmem:[%s3442_s7 + $0x10] sm:$0xff] %v1634_v29 }
 0x4d4   :  { %1643 = vst [vmem:[%s3442_s7 + $0x18] sm:$0xff] %v1635_v45 }
 0x4d5   :  { %1644 = vst [vmem:[%s3442_s7 + $0x20] sm:$0xff] %v1636_v3 }
 0x4d6   :  { %1645 = vst [vmem:[%s3442_s7 + $0x28] sm:$0xff] %v1637_v14 }
 0x4d7   :  { %1646 = vst [vmem:[%s3442_s7 + $0x30] sm:$0xff] %v1638_v60 }
 0x4d8   :  { %1647 = vst [vmem:[%s3442_s7 + $0x38] sm:$0xff] %v1639_v25 }
 0x4d9   :  { %1806 = vst [vmem:[%s3442_s7 + $0x40] sm:$0xff] %v1650_v57 }
 0x4da   :  { %1807 = vst [vmem:[%s3442_s7 + $0x48] sm:$0xff] %v1651_v19 }
 0x4db   :  { %1808 = vst [vmem:[%s3442_s7 + $0x50] sm:$0xff] %v1652_v13 }
 0x4dc   :  { %1809 = vst [vmem:[%s3442_s7 + $0x58] sm:$0xff] %v1653_v26 }
 0x4dd   :  { %1810 = vst [vmem:[%s3442_s7 + $0x60] sm:$0xff] %v1654_v1 }
 0x4de   :  { %1811 = vst [vmem:[%s3442_s7 + $0x68] sm:$0xff] %v1655_v28 }
 0x4df   :  { %1812 = vst [vmem:[%s3442_s7 + $0x70] sm:$0xff] %v1656_v8 }
 0x4e0   :  { %1813 = vst [vmem:[%s3442_s7 + $0x78] sm:$0xff] %v1657_v58 }
 0x4e1   :  { %1671 = vsyncpa [#allocation3], 1 }

</bundles_post_ra>
